<compile_context>
chip_gen: v5e
topology: v5e:2x2
jax: 0.10.0
libtpu: 0.0.40
codegen_flags: <defaults>
</compile_context>

<pallas_src>
import jax
import jax.numpy as jnp
import numpy as np
from jax.experimental import pallas as pl
from jax.experimental.pallas import tpu as pltpu

# ---- constants implied by the PyTorch module ---------------------------------
NUM_WIN_SAMPLES = 128
SAMP_RATE = 60
WINDOW = int(NUM_WIN_SAMPLES * (SAMP_RATE / 60))   # 128
C_IN = 6
C_IN_PAD = 8                                       # pad 6 -> 8 input channels (zeros)
C_HID = 64
L_POOL = WINDOW // 2                               # 64 pooled positions
FC_HID = 100
FC_PAD = 128                                       # fc1 hidden padded to a full vreg
N_CLASSES = 4
OUT_PAD = 128                                      # lane-dense logits block
BN_EPS = 1e-5
B_TILE_MAX = 32                                    # cap keeps per-step VMEM well under v7x's 64 MiB


# ------------------------------- fused kernel ----------------------------------
def _fused_kernel(x_ref, w1_ref, sc1_ref, sh1_ref, w2_ref, sc2_ref, sh2_ref,
                  wf1_ref, bf1_ref, wf2_ref, bf2_ref, out_ref, feat_scr):
    """Whole forward pass for one batch tile of b_tile samples.

    x_ref  : (2*m, 24) bf16 im2col conv1 input, m = b_tile*L_POOL.  Rows ordered
             (slab[even,odd], position, sample); lane = tap*8 + in_channel.
    w1_ref : (24, 64) bf16        conv1 weights, taps fused along K
    sc1/sh1: (1, 64)  f32         folded BN1 scale / shift (conv bias folded in)
    w2_ref : (3, 64, 64) bf16     conv2 weights, w2_ref[k][c, o]
    sc2/sh2: (1, 64)  f32
    wf1_ref: (4096, 128) bf16     fc1 weights, rows ordered (position, channel), padded 100->128
    bf1_ref: (1, 128) f32
    wf2_ref: (128, 128) bf16      fc2 weights padded (hidden 100->128, classes 4->128)
    bf2_ref: (1, 128) f32
    out_ref: (b_tile, 128) f32    lane-dense logits (first 4 lanes are real classes)
    feat_scr: (b_tile, 4096) f32  VMEM scratch holding the per-sample flatten
    """
    b_tile = out_ref.shape[0]
    m = b_tile * L_POOL

    # conv1 + bn1 + relu for even AND odd output positions in one matmul.
    h = jnp.dot(x_ref[...], w1_ref[...], preferred_element_type=jnp.float32)
    h = jnp.maximum(h * sc1_ref[...] + sh1_ref[...], 0.0)            # (2m, 64) f32
    # TODO(synk): dropout layers are identity here (eval mode); no RNG mask applied.

    # MaxPool1d(2) == elementwise max of the even / odd slabs.
    hp = jnp.maximum(h[:m, :], h[m:, :])                              # (m, 64), rows (pos, sample)

    # conv2 neighbours: rows are (position-major, sample-minor), so position +-1 is a
    # +-b_tile row shift.  b_tile % 8 == 0 => 8-aligned sublane slices/concat (whole-vreg
    # re-indexing); the explicit zero rows ARE the conv padding, so no wrap masks needed.
    zrows = jnp.zeros((b_tile, C_HID), jnp.float32)
    h_m1 = jnp.concatenate([zrows, hp[:m - b_tile, :]], axis=0)       # hp at position l-1
    h_p1 = jnp.concatenate([hp[b_tile:, :], zrows], axis=0)           # hp at position l+1

    # conv2 + bn2 + relu as three accumulating K=64 bf16 matmuls (no lane-axis concat).
    h2 = jnp.dot(h_m1.astype(jnp.bfloat16), w2_ref[0], preferred_element_type=jnp.float32)
    h2 = h2 + jnp.dot(hp.astype(jnp.bfloat16), w2_ref[1], preferred_element_type=jnp.float32)
    h2 = h2 + jnp.dot(h_p1.astype(jnp.bfloat16), w2_ref[2], preferred_element_type=jnp.float32)
    h2 = jnp.maximum(h2 * sc2_ref[...] + sh2_ref[...], 0.0)          # (m, 64)

    # Flatten to (b_tile, 4096): position l's (b_tile, 64) slab -> lanes [l*64, (l+1)*64).
    # 64 aligned slab stores into VMEM scratch (robust alternative to a lane reshape).
    for l in range(L_POOL):
        feat_scr[:, l * C_HID:(l + 1) * C_HID] = h2[l * b_tile:(l + 1) * b_tile, :]

    # fc1 -> relu -> fc2 (fc1 is one K=4096 bf16 matmul against the resident weights).
    feat = feat_scr[...].astype(jnp.bfloat16)
    f1 = jnp.dot(feat, wf1_ref[...], preferred_element_type=jnp.float32) + bf1_ref[...]
    f1 = jnp.maximum(f1, 0.0)
    out_ref[...] = (jnp.dot(f1.astype(jnp.bfloat16), wf2_ref[...],
                            preferred_element_type=jnp.float32) + bf2_ref[...])


# ------------------------------- wrapper ---------------------------------------
def motion_cnn_forward(x, p, b_tile_max=B_TILE_MAX):
    """x: (B, 6, WINDOW) float32 in PyTorch NCL layout. Returns (B, N_CLASSES) float32."""
    B = x.shape[0]
    # Tile size: multiple of 8 (keeps all sublane shifts / slices vreg-aligned) and,
    # when the batch is large enough, >= 2 tiles so the parallel grid axis can shard
    # across v7x's two TensorCores.
    half = -(-B // 2)
    b_tile = int(min(b_tile_max, max(8, -(-half // 8) * 8)))
    n_tiles = -(-B // b_tile)
    Bp = n_tiles * b_tile
    if Bp != B:
        x = jnp.pad(x, ((0, Bp - B), (0, 0), (0, 0)))                 # zero-pad batch

    # ---- plain-JAX glue: im2col, even/odd pre-split, (tile, slab, pos, sample) rows ----
    # TODO(synk): conv1 im2col could be moved in-kernel from a lane-dense (Bp, 8, 128)
    # input to further cut kernel input bytes; kept in the wrapper for robustness.
    x_lc = jnp.transpose(x, (0, 2, 1))                                 # (Bp, 128, 6)
    x_lc = jnp.pad(x_lc, ((0, 0), (1, 1), (0, C_IN_PAD - C_IN)))       # (Bp, 130, 8)
    taps = jnp.concatenate([x_lc[:, k:k + WINDOW, :] for k in range(3)], axis=-1)  # (Bp,128,24)
    x_eo = jnp.stack([taps[:, 0::2, :], taps[:, 1::2, :]], axis=1)     # (Bp, 2, 64, 24)
    x_eo = x_eo.reshape(n_tiles, b_tile, 2, L_POOL, 3 * C_IN_PAD)
    x_eo = jnp.transpose(x_eo, (0, 2, 3, 1, 4))                        # (nt, 2, 64, b_tile, 24)
    x_eo = x_eo.reshape(n_tiles * 2 * L_POOL * b_tile, 3 * C_IN_PAD).astype(jnp.bfloat16)

    # ---- parameter folding / layout prep (bf16 matmul operands, f32 BN) ----
    w1c = jnp.pad(jnp.transpose(p["w1"], (2, 1, 0)),
                  ((0, 0), (0, C_IN_PAD - C_IN), (0, 0)))
    w1c = w1c.reshape(3 * C_IN_PAD, C_HID).astype(jnp.bfloat16)        # (24, 64)
    w2c = jnp.transpose(p["w2"], (2, 1, 0)).astype(jnp.bfloat16)       # (3, 64, 64) [k, c, o]
    sc1 = p["g1"] / jnp.sqrt(p["v1"] + BN_EPS)
    sh1 = (p["b1"] - p["m1"]) * sc1 + p["beta1"]
    sc2 = p["g2"] / jnp.sqrt(p["v2"] + BN_EPS)
    sh2 = (p["b2"] - p["m2"]) * sc2 + p["beta2"]
    sc1, sh1, sc2, sh2 = (a.reshape(1, C_HID).astype(jnp.float32)
                          for a in (sc1, sh1, sc2, sh2))

    # fc1: reorder columns from PyTorch's (c, l) flatten to our (l, c) flatten; pad 100->128.
    wf1_r = jnp.transpose(p["wf1"].reshape(FC_HID, C_HID, L_POOL), (2, 1, 0))  # (l, c, j)
    wf1_r = wf1_r.reshape(L_POOL * C_HID, FC_HID)
    wf1_r = jnp.pad(wf1_r, ((0, 0), (0, FC_PAD - FC_HID))).astype(jnp.bfloat16)     # (4096, 128)
    bf1_r = jnp.pad(p["bf1"], (0, FC_PAD - FC_HID)).reshape(1, FC_PAD)               # (1, 128)
    wf2_r = jnp.pad(jnp.transpose(p["wf2"]),
                    ((0, FC_PAD - FC_HID), (0, OUT_PAD - N_CLASSES))).astype(jnp.bfloat16)  # (128,128)
    bf2_r = jnp.pad(p["bf2"], (0, OUT_PAD - N_CLASSES)).reshape(1, OUT_PAD)          # (1, 128)

    m2 = 2 * L_POOL * b_tile                                           # conv1 rows / tile
    out = pl.pallas_call(
        _fused_kernel,
        out_shape=jax.ShapeDtypeStruct((Bp, OUT_PAD), jnp.float32),
        grid=(n_tiles,),
        in_specs=[
            pl.BlockSpec((m2, 3 * C_IN_PAD), lambda t: (t, 0)),
            pl.BlockSpec((3 * C_IN_PAD, C_HID), lambda t: (0, 0)),
            pl.BlockSpec((1, C_HID), lambda t: (0, 0)),
            pl.BlockSpec((1, C_HID), lambda t: (0, 0)),
            pl.BlockSpec((3, C_HID, C_HID), lambda t: (0, 0, 0)),
            pl.BlockSpec((1, C_HID), lambda t: (0, 0)),
            pl.BlockSpec((1, C_HID), lambda t: (0, 0)),
            pl.BlockSpec((L_POOL * C_HID, FC_PAD), lambda t: (0, 0)),  # wf1 stays resident
            pl.BlockSpec((1, FC_PAD), lambda t: (0, 0)),
            pl.BlockSpec((FC_PAD, OUT_PAD), lambda t: (0, 0)),
            pl.BlockSpec((1, OUT_PAD), lambda t: (0, 0)),
        ],
        out_specs=pl.BlockSpec((b_tile, OUT_PAD), lambda t: (t, 0)),
        scratch_shapes=[pltpu.VMEM((b_tile, L_POOL * C_HID), jnp.float32)],
        compiler_params=pltpu.CompilerParams(
            dimension_semantics=("parallel",),
            vmem_limit_bytes=32 * 1024 * 1024),
    )(x_eo, w1c, sc1, sh1, w2c, sc2, sh2, wf1_r, bf1_r, wf2_r, bf2_r)
    return out[:B, :N_CLASSES]


# ------------------------- deterministic parameters ----------------------------
def init_params(key):
    ks = jax.random.split(key, 16)
    p = {}
    p["w1"] = 0.10 * jax.random.normal(ks[0], (C_HID, C_IN, 3), jnp.float32)
    p["b1"] = 0.10 * jax.random.normal(ks[1], (C_HID,), jnp.float32)
    p["g1"] = 1.0 + 0.10 * jax.random.normal(ks[2], (C_HID,), jnp.float32)
    p["beta1"] = 0.10 * jax.random.normal(ks[3], (C_HID,), jnp.float32)
    p["m1"] = 0.10 * jax.random.normal(ks[4], (C_HID,), jnp.float32)
    p["v1"] = 0.5 + jax.random.uniform(ks[5], (C_HID,), jnp.float32)
    p["w2"] = 0.05 * jax.random.normal(ks[6], (C_HID, C_HID, 3), jnp.float32)
    p["b2"] = 0.10 * jax.random.normal(ks[7], (C_HID,), jnp.float32)
    p["g2"] = 1.0 + 0.10 * jax.random.normal(ks[8], (C_HID,), jnp.float32)
    p["beta2"] = 0.10 * jax.random.normal(ks[9], (C_HID,), jnp.float32)
    p["m2"] = 0.10 * jax.random.normal(ks[10], (C_HID,), jnp.float32)
    p["v2"] = 0.5 + jax.random.uniform(ks[11], (C_HID,), jnp.float32)
    p["wf1"] = 0.02 * jax.random.normal(ks[12], (FC_HID, C_HID * L_POOL), jnp.float32)
    p["bf1"] = 0.10 * jax.random.normal(ks[13], (FC_HID,), jnp.float32)
    p["wf2"] = 0.10 * jax.random.normal(ks[14], (N_CLASSES, FC_HID), jnp.float32)
    p["bf2"] = 0.10 * jax.random.normal(ks[15], (N_CLASSES,), jnp.float32)
    return p


# ----------------------------- pure-JAX reference -------------------------------
def reference_forward(x, p):
    def conv1d(x, w, b):
        y = jax.lax.conv_general_dilated(
            x, w, window_strides=(1,), padding=((1, 1),),
            dimension_numbers=("NCH", "OIH", "NCH"))
        return y + b[None, :, None]

    def bn(x, g, beta, m, v):
        return ((x - m[None, :, None]) / jnp.sqrt(v[None, :, None] + BN_EPS)
                * g[None, :, None] + beta[None, :, None])

    B = x.shape[0]
    h = jax.nn.relu(bn(conv1d(x, p["w1"], p["b1"]), p["g1"], p["beta1"], p["m1"], p["v1"]))
    h = h.reshape(B, C_HID, WINDOW // 2, 2).max(axis=-1)            # MaxPool1d(2)
    h = jax.nn.relu(bn(conv1d(h, p["w2"], p["b2"]), p["g2"], p["beta2"], p["m2"], p["v2"]))
    h = h.reshape(B, -1)
    h = jax.nn.relu(h @ p["wf1"].T + p["bf1"])
    return h @ p["wf2"].T + p["bf2"]


if __name__ == "__main__":
    key = jax.random.PRNGKey(0)
    k_x, k_p = jax.random.split(key)
    B = 2
    x = jax.random.normal(k_x, (B, C_IN, WINDOW), jnp.float32)      # (2, 6, 128) NCL
    params = init_params(k_p)

    out = jax.block_until_ready(motion_cnn_forward(x, params))
    ref = jax.block_until_ready(reference_forward(x, params))
    assert out.shape == (B, N_CLASSES)
    np.testing.assert_allclose(np.asarray(out), np.asarray(ref), rtol=5e-2, atol=5e-2)
    print("KERNEL_OK")
</pallas_src>

<mosaic_0001>
module attributes {stable_mosaic.version = 11 : i64} {
  func.func @_fused_kernel(%arg0: i32, %arg1: memref<1024x24xbf16, #tpu.memory_space<vmem>>, %arg2: memref<24x64xbf16, #tpu.memory_space<vmem>>, %arg3: memref<1x64xf32, #tpu.memory_space<vmem>>, %arg4: memref<1x64xf32, #tpu.memory_space<vmem>>, %arg5: memref<3x64x64xbf16, #tpu.memory_space<vmem>>, %arg6: memref<1x64xf32, #tpu.memory_space<vmem>>, %arg7: memref<1x64xf32, #tpu.memory_space<vmem>>, %arg8: memref<4096x128xbf16, #tpu.memory_space<vmem>>, %arg9: memref<1x128xf32, #tpu.memory_space<vmem>>, %arg10: memref<128x128xbf16, #tpu.memory_space<vmem>>, %arg11: memref<1x128xf32, #tpu.memory_space<vmem>>, %arg12: memref<8x128xf32, #tpu.memory_space<vmem>>, %arg13: memref<8x4096xf32, #tpu.memory_space<vmem>>) attributes {dimension_semantics = [#tpu.dimension_semantics<parallel>], iteration_bounds = array<i64: 1>, scalar_prefetch = 0 : i64, scratch_operands = 1 : i64, tpu.core_type = #tpu.core_type<tc>, window_params = [{transform_indices = @transform_0, window_bounds = array<i64: 1024, 24>}, {pipeline_mode = #tpu.pipeline_mode<synchronous>, transform_indices = @transform_1, window_bounds = array<i64: 24, 64>}, {pipeline_mode = #tpu.pipeline_mode<synchronous>, transform_indices = @transform_2, window_bounds = array<i64: 1, 64>}, {pipeline_mode = #tpu.pipeline_mode<synchronous>, transform_indices = @transform_3, window_bounds = array<i64: 1, 64>}, {pipeline_mode = #tpu.pipeline_mode<synchronous>, transform_indices = @transform_4, window_bounds = array<i64: 3, 64, 64>}, {pipeline_mode = #tpu.pipeline_mode<synchronous>, transform_indices = @transform_5, window_bounds = array<i64: 1, 64>}, {pipeline_mode = #tpu.pipeline_mode<synchronous>, transform_indices = @transform_6, window_bounds = array<i64: 1, 64>}, {pipeline_mode = #tpu.pipeline_mode<synchronous>, transform_indices = @transform_7, window_bounds = array<i64: 4096, 128>}, {pipeline_mode = #tpu.pipeline_mode<synchronous>, transform_indices = @transform_8, window_bounds = array<i64: 1, 128>}, {pipeline_mode = #tpu.pipeline_mode<synchronous>, transform_indices = @transform_9, window_bounds = array<i64: 128, 128>}, {pipeline_mode = #tpu.pipeline_mode<synchronous>, transform_indices = @transform_10, window_bounds = array<i64: 1, 128>}, {transform_indices = @transform_11, window_bounds = array<i64: 8, 128>}]} {
    %c0 = arith.constant 0 : index
    %c0_0 = arith.constant 0 : index
    %0 = vector.load %arg1[%c0, %c0_0] : memref<1024x24xbf16, #tpu.memory_space<vmem>>, vector<1024x24xbf16>
    %c0_1 = arith.constant 0 : index
    %c0_2 = arith.constant 0 : index
    %1 = vector.load %arg2[%c0_1, %c0_2] : memref<24x64xbf16, #tpu.memory_space<vmem>>, vector<24x64xbf16>
    %cst = arith.constant dense<0.000000e+00> : vector<1024x64xf32>
    %2 = tpu.matmul %0, %1, %cst {dimension_numbers = #tpu.dot_dimension_numbers<[1], [0], [0], [1], [0, 0, 1, 1], [], []>} : vector<1024x24xbf16>, vector<24x64xbf16>, vector<1024x64xf32> -> vector<1024x64xf32>
    %c0_3 = arith.constant 0 : index
    %c0_4 = arith.constant 0 : index
    %3 = vector.load %arg3[%c0_3, %c0_4] : memref<1x64xf32, #tpu.memory_space<vmem>>, vector<1x64xf32>
    %4 = vector.broadcast %3 : vector<1x64xf32> to vector<1024x64xf32>
    %5 = arith.mulf %2, %4 : vector<1024x64xf32>
    %c0_5 = arith.constant 0 : index
    %c0_6 = arith.constant 0 : index
    %6 = vector.load %arg4[%c0_5, %c0_6] : memref<1x64xf32, #tpu.memory_space<vmem>>, vector<1x64xf32>
    %7 = vector.broadcast %6 : vector<1x64xf32> to vector<1024x64xf32>
    %8 = arith.addf %5, %7 : vector<1024x64xf32>
    %cst_7 = arith.constant 0.000000e+00 : f32
    %9 = vector.broadcast %cst_7 : f32 to vector<1024x64xf32>
    %10 = arith.maximumf %8, %9 : vector<1024x64xf32>
    %11 = vector.extract_strided_slice %10 {offsets = [0, 0], sizes = [512, 64], strides = [1, 1]} : vector<1024x64xf32> to vector<512x64xf32>
    %12 = vector.extract_strided_slice %10 {offsets = [512, 0], sizes = [512, 64], strides = [1, 1]} : vector<1024x64xf32> to vector<512x64xf32>
    %13 = arith.maximumf %11, %12 : vector<512x64xf32>
    %cst_8 = arith.constant 0.000000e+00 : f32
    %14 = vector.broadcast %cst_8 : f32 to vector<8x64xf32>
    %15 = vector.extract_strided_slice %13 {offsets = [0, 0], sizes = [504, 64], strides = [1, 1]} : vector<512x64xf32> to vector<504x64xf32>
    %16 = tpu.concatenate %14, %15 in 0 : vector<8x64xf32>, vector<504x64xf32> -> vector<512x64xf32>
    %17 = vector.extract_strided_slice %13 {offsets = [8, 0], sizes = [504, 64], strides = [1, 1]} : vector<512x64xf32> to vector<504x64xf32>
    %18 = tpu.concatenate %17, %14 in 0 : vector<504x64xf32>, vector<8x64xf32> -> vector<512x64xf32>
    %19 = arith.truncf %16 : vector<512x64xf32> to vector<512x64xbf16>
    %c0_9 = arith.constant 0 : index
    %c0_10 = arith.constant 0 : index
    %c0_11 = arith.constant 0 : index
    %20 = vector.load %arg5[%c0_9, %c0_10, %c0_11] : memref<3x64x64xbf16, #tpu.memory_space<vmem>>, vector<1x64x64xbf16>
    %21 = vector.shape_cast %20 : vector<1x64x64xbf16> to vector<64x64xbf16>
    %cst_12 = arith.constant dense<0.000000e+00> : vector<512x64xf32>
    %22 = tpu.matmul %19, %21, %cst_12 {dimension_numbers = #tpu.dot_dimension_numbers<[1], [0], [0], [1], [0, 0, 1, 1], [], []>} : vector<512x64xbf16>, vector<64x64xbf16>, vector<512x64xf32> -> vector<512x64xf32>
    %23 = arith.truncf %13 : vector<512x64xf32> to vector<512x64xbf16>
    %c1 = arith.constant 1 : index
    %c0_13 = arith.constant 0 : index
    %c0_14 = arith.constant 0 : index
    %24 = vector.load %arg5[%c1, %c0_13, %c0_14] : memref<3x64x64xbf16, #tpu.memory_space<vmem>>, vector<1x64x64xbf16>
    %25 = vector.shape_cast %24 : vector<1x64x64xbf16> to vector<64x64xbf16>
    %cst_15 = arith.constant dense<0.000000e+00> : vector<512x64xf32>
    %26 = tpu.matmul %23, %25, %cst_15 {dimension_numbers = #tpu.dot_dimension_numbers<[1], [0], [0], [1], [0, 0, 1, 1], [], []>} : vector<512x64xbf16>, vector<64x64xbf16>, vector<512x64xf32> -> vector<512x64xf32>
    %27 = arith.addf %22, %26 : vector<512x64xf32>
    %28 = arith.truncf %18 : vector<512x64xf32> to vector<512x64xbf16>
    %c2 = arith.constant 2 : index
    %c0_16 = arith.constant 0 : index
    %c0_17 = arith.constant 0 : index
    %29 = vector.load %arg5[%c2, %c0_16, %c0_17] : memref<3x64x64xbf16, #tpu.memory_space<vmem>>, vector<1x64x64xbf16>
    %30 = vector.shape_cast %29 : vector<1x64x64xbf16> to vector<64x64xbf16>
    %cst_18 = arith.constant dense<0.000000e+00> : vector<512x64xf32>
    %31 = tpu.matmul %28, %30, %cst_18 {dimension_numbers = #tpu.dot_dimension_numbers<[1], [0], [0], [1], [0, 0, 1, 1], [], []>} : vector<512x64xbf16>, vector<64x64xbf16>, vector<512x64xf32> -> vector<512x64xf32>
    %32 = arith.addf %27, %31 : vector<512x64xf32>
    %c0_19 = arith.constant 0 : index
    %c0_20 = arith.constant 0 : index
    %33 = vector.load %arg6[%c0_19, %c0_20] : memref<1x64xf32, #tpu.memory_space<vmem>>, vector<1x64xf32>
    %34 = vector.broadcast %33 : vector<1x64xf32> to vector<512x64xf32>
    %35 = arith.mulf %32, %34 : vector<512x64xf32>
    %c0_21 = arith.constant 0 : index
    %c0_22 = arith.constant 0 : index
    %36 = vector.load %arg7[%c0_21, %c0_22] : memref<1x64xf32, #tpu.memory_space<vmem>>, vector<1x64xf32>
    %37 = vector.broadcast %36 : vector<1x64xf32> to vector<512x64xf32>
    %38 = arith.addf %35, %37 : vector<512x64xf32>
    %cst_23 = arith.constant 0.000000e+00 : f32
    %39 = vector.broadcast %cst_23 : f32 to vector<512x64xf32>
    %40 = arith.maximumf %38, %39 : vector<512x64xf32>
    %41 = vector.extract_strided_slice %40 {offsets = [0, 0], sizes = [8, 64], strides = [1, 1]} : vector<512x64xf32> to vector<8x64xf32>
    %c0_24 = arith.constant 0 : index
    %c0_25 = arith.constant 0 : index
    %42 = vector.load %arg13[%c0_24, %c0_25] : memref<8x4096xf32, #tpu.memory_space<vmem>>, vector<8x64xf32>
    tpu.vector_store %arg13[%c0_24, %c0_25], %41 {strides = array<i32>} : memref<8x4096xf32, #tpu.memory_space<vmem>>, vector<8x64xf32>,
    %43 = vector.extract_strided_slice %40 {offsets = [8, 0], sizes = [8, 64], strides = [1, 1]} : vector<512x64xf32> to vector<8x64xf32>
    %c0_26 = arith.constant 0 : index
    %c64 = arith.constant 64 : index
    %44 = vector.load %arg13[%c0_26, %c64] : memref<8x4096xf32, #tpu.memory_space<vmem>>, vector<8x64xf32>
    tpu.vector_store %arg13[%c0_26, %c64], %43 {strides = array<i32>} : memref<8x4096xf32, #tpu.memory_space<vmem>>, vector<8x64xf32>,
    %45 = vector.extract_strided_slice %40 {offsets = [16, 0], sizes = [8, 64], strides = [1, 1]} : vector<512x64xf32> to vector<8x64xf32>
    %c0_27 = arith.constant 0 : index
    %c128 = arith.constant 128 : index
    %46 = vector.load %arg13[%c0_27, %c128] : memref<8x4096xf32, #tpu.memory_space<vmem>>, vector<8x64xf32>
    tpu.vector_store %arg13[%c0_27, %c128], %45 {strides = array<i32>} : memref<8x4096xf32, #tpu.memory_space<vmem>>, vector<8x64xf32>,
    %47 = vector.extract_strided_slice %40 {offsets = [24, 0], sizes = [8, 64], strides = [1, 1]} : vector<512x64xf32> to vector<8x64xf32>
    %c0_28 = arith.constant 0 : index
    %c192 = arith.constant 192 : index
    %48 = vector.load %arg13[%c0_28, %c192] : memref<8x4096xf32, #tpu.memory_space<vmem>>, vector<8x64xf32>
    tpu.vector_store %arg13[%c0_28, %c192], %47 {strides = array<i32>} : memref<8x4096xf32, #tpu.memory_space<vmem>>, vector<8x64xf32>,
    %49 = vector.extract_strided_slice %40 {offsets = [32, 0], sizes = [8, 64], strides = [1, 1]} : vector<512x64xf32> to vector<8x64xf32>
    %c0_29 = arith.constant 0 : index
    %c256 = arith.constant 256 : index
    %50 = vector.load %arg13[%c0_29, %c256] : memref<8x4096xf32, #tpu.memory_space<vmem>>, vector<8x64xf32>
    tpu.vector_store %arg13[%c0_29, %c256], %49 {strides = array<i32>} : memref<8x4096xf32, #tpu.memory_space<vmem>>, vector<8x64xf32>,
    %51 = vector.extract_strided_slice %40 {offsets = [40, 0], sizes = [8, 64], strides = [1, 1]} : vector<512x64xf32> to vector<8x64xf32>
    %c0_30 = arith.constant 0 : index
    %c320 = arith.constant 320 : index
    %52 = vector.load %arg13[%c0_30, %c320] : memref<8x4096xf32, #tpu.memory_space<vmem>>, vector<8x64xf32>
    tpu.vector_store %arg13[%c0_30, %c320], %51 {strides = array<i32>} : memref<8x4096xf32, #tpu.memory_space<vmem>>, vector<8x64xf32>,
    %53 = vector.extract_strided_slice %40 {offsets = [48, 0], sizes = [8, 64], strides = [1, 1]} : vector<512x64xf32> to vector<8x64xf32>
    %c0_31 = arith.constant 0 : index
    %c384 = arith.constant 384 : index
    %54 = vector.load %arg13[%c0_31, %c384] : memref<8x4096xf32, #tpu.memory_space<vmem>>, vector<8x64xf32>
    tpu.vector_store %arg13[%c0_31, %c384], %53 {strides = array<i32>} : memref<8x4096xf32, #tpu.memory_space<vmem>>, vector<8x64xf32>,
    %55 = vector.extract_strided_slice %40 {offsets = [56, 0], sizes = [8, 64], strides = [1, 1]} : vector<512x64xf32> to vector<8x64xf32>
    %c0_32 = arith.constant 0 : index
    %c448 = arith.constant 448 : index
    %56 = vector.load %arg13[%c0_32, %c448] : memref<8x4096xf32, #tpu.memory_space<vmem>>, vector<8x64xf32>
    tpu.vector_store %arg13[%c0_32, %c448], %55 {strides = array<i32>} : memref<8x4096xf32, #tpu.memory_space<vmem>>, vector<8x64xf32>,
    %57 = vector.extract_strided_slice %40 {offsets = [64, 0], sizes = [8, 64], strides = [1, 1]} : vector<512x64xf32> to vector<8x64xf32>
    %c0_33 = arith.constant 0 : index
    %c512 = arith.constant 512 : index
    %58 = vector.load %arg13[%c0_33, %c512] : memref<8x4096xf32, #tpu.memory_space<vmem>>, vector<8x64xf32>
    tpu.vector_store %arg13[%c0_33, %c512], %57 {strides = array<i32>} : memref<8x4096xf32, #tpu.memory_space<vmem>>, vector<8x64xf32>,
    %59 = vector.extract_strided_slice %40 {offsets = [72, 0], sizes = [8, 64], strides = [1, 1]} : vector<512x64xf32> to vector<8x64xf32>
    %c0_34 = arith.constant 0 : index
    %c576 = arith.constant 576 : index
    %60 = vector.load %arg13[%c0_34, %c576] : memref<8x4096xf32, #tpu.memory_space<vmem>>, vector<8x64xf32>
    tpu.vector_store %arg13[%c0_34, %c576], %59 {strides = array<i32>} : memref<8x4096xf32, #tpu.memory_space<vmem>>, vector<8x64xf32>,
    %61 = vector.extract_strided_slice %40 {offsets = [80, 0], sizes = [8, 64], strides = [1, 1]} : vector<512x64xf32> to vector<8x64xf32>
    %c0_35 = arith.constant 0 : index
    %c640 = arith.constant 640 : index
    %62 = vector.load %arg13[%c0_35, %c640] : memref<8x4096xf32, #tpu.memory_space<vmem>>, vector<8x64xf32>
    tpu.vector_store %arg13[%c0_35, %c640], %61 {strides = array<i32>} : memref<8x4096xf32, #tpu.memory_space<vmem>>, vector<8x64xf32>,
    %63 = vector.extract_strided_slice %40 {offsets = [88, 0], sizes = [8, 64], strides = [1, 1]} : vector<512x64xf32> to vector<8x64xf32>
    %c0_36 = arith.constant 0 : index
    %c704 = arith.constant 704 : index
    %64 = vector.load %arg13[%c0_36, %c704] : memref<8x4096xf32, #tpu.memory_space<vmem>>, vector<8x64xf32>
    tpu.vector_store %arg13[%c0_36, %c704], %63 {strides = array<i32>} : memref<8x4096xf32, #tpu.memory_space<vmem>>, vector<8x64xf32>,
    %65 = vector.extract_strided_slice %40 {offsets = [96, 0], sizes = [8, 64], strides = [1, 1]} : vector<512x64xf32> to vector<8x64xf32>
    %c0_37 = arith.constant 0 : index
    %c768 = arith.constant 768 : index
    %66 = vector.load %arg13[%c0_37, %c768] : memref<8x4096xf32, #tpu.memory_space<vmem>>, vector<8x64xf32>
    tpu.vector_store %arg13[%c0_37, %c768], %65 {strides = array<i32>} : memref<8x4096xf32, #tpu.memory_space<vmem>>, vector<8x64xf32>,
    %67 = vector.extract_strided_slice %40 {offsets = [104, 0], sizes = [8, 64], strides = [1, 1]} : vector<512x64xf32> to vector<8x64xf32>
    %c0_38 = arith.constant 0 : index
    %c832 = arith.constant 832 : index
    %68 = vector.load %arg13[%c0_38, %c832] : memref<8x4096xf32, #tpu.memory_space<vmem>>, vector<8x64xf32>
    tpu.vector_store %arg13[%c0_38, %c832], %67 {strides = array<i32>} : memref<8x4096xf32, #tpu.memory_space<vmem>>, vector<8x64xf32>,
    %69 = vector.extract_strided_slice %40 {offsets = [112, 0], sizes = [8, 64], strides = [1, 1]} : vector<512x64xf32> to vector<8x64xf32>
    %c0_39 = arith.constant 0 : index
    %c896 = arith.constant 896 : index
    %70 = vector.load %arg13[%c0_39, %c896] : memref<8x4096xf32, #tpu.memory_space<vmem>>, vector<8x64xf32>
    tpu.vector_store %arg13[%c0_39, %c896], %69 {strides = array<i32>} : memref<8x4096xf32, #tpu.memory_space<vmem>>, vector<8x64xf32>,
    %71 = vector.extract_strided_slice %40 {offsets = [120, 0], sizes = [8, 64], strides = [1, 1]} : vector<512x64xf32> to vector<8x64xf32>
    %c0_40 = arith.constant 0 : index
    %c960 = arith.constant 960 : index
    %72 = vector.load %arg13[%c0_40, %c960] : memref<8x4096xf32, #tpu.memory_space<vmem>>, vector<8x64xf32>
    tpu.vector_store %arg13[%c0_40, %c960], %71 {strides = array<i32>} : memref<8x4096xf32, #tpu.memory_space<vmem>>, vector<8x64xf32>,
    %73 = vector.extract_strided_slice %40 {offsets = [128, 0], sizes = [8, 64], strides = [1, 1]} : vector<512x64xf32> to vector<8x64xf32>
    %c0_41 = arith.constant 0 : index
    %c1024 = arith.constant 1024 : index
    %74 = vector.load %arg13[%c0_41, %c1024] : memref<8x4096xf32, #tpu.memory_space<vmem>>, vector<8x64xf32>
    tpu.vector_store %arg13[%c0_41, %c1024], %73 {strides = array<i32>} : memref<8x4096xf32, #tpu.memory_space<vmem>>, vector<8x64xf32>,
    %75 = vector.extract_strided_slice %40 {offsets = [136, 0], sizes = [8, 64], strides = [1, 1]} : vector<512x64xf32> to vector<8x64xf32>
    %c0_42 = arith.constant 0 : index
    %c1088 = arith.constant 1088 : index
    %76 = vector.load %arg13[%c0_42, %c1088] : memref<8x4096xf32, #tpu.memory_space<vmem>>, vector<8x64xf32>
    tpu.vector_store %arg13[%c0_42, %c1088], %75 {strides = array<i32>} : memref<8x4096xf32, #tpu.memory_space<vmem>>, vector<8x64xf32>,
    %77 = vector.extract_strided_slice %40 {offsets = [144, 0], sizes = [8, 64], strides = [1, 1]} : vector<512x64xf32> to vector<8x64xf32>
    %c0_43 = arith.constant 0 : index
    %c1152 = arith.constant 1152 : index
    %78 = vector.load %arg13[%c0_43, %c1152] : memref<8x4096xf32, #tpu.memory_space<vmem>>, vector<8x64xf32>
    tpu.vector_store %arg13[%c0_43, %c1152], %77 {strides = array<i32>} : memref<8x4096xf32, #tpu.memory_space<vmem>>, vector<8x64xf32>,
    %79 = vector.extract_strided_slice %40 {offsets = [152, 0], sizes = [8, 64], strides = [1, 1]} : vector<512x64xf32> to vector<8x64xf32>
    %c0_44 = arith.constant 0 : index
    %c1216 = arith.constant 1216 : index
    %80 = vector.load %arg13[%c0_44, %c1216] : memref<8x4096xf32, #tpu.memory_space<vmem>>, vector<8x64xf32>
    tpu.vector_store %arg13[%c0_44, %c1216], %79 {strides = array<i32>} : memref<8x4096xf32, #tpu.memory_space<vmem>>, vector<8x64xf32>,
    %81 = vector.extract_strided_slice %40 {offsets = [160, 0], sizes = [8, 64], strides = [1, 1]} : vector<512x64xf32> to vector<8x64xf32>
    %c0_45 = arith.constant 0 : index
    %c1280 = arith.constant 1280 : index
    %82 = vector.load %arg13[%c0_45, %c1280] : memref<8x4096xf32, #tpu.memory_space<vmem>>, vector<8x64xf32>
    tpu.vector_store %arg13[%c0_45, %c1280], %81 {strides = array<i32>} : memref<8x4096xf32, #tpu.memory_space<vmem>>, vector<8x64xf32>,
    %83 = vector.extract_strided_slice %40 {offsets = [168, 0], sizes = [8, 64], strides = [1, 1]} : vector<512x64xf32> to vector<8x64xf32>
    %c0_46 = arith.constant 0 : index
    %c1344 = arith.constant 1344 : index
    %84 = vector.load %arg13[%c0_46, %c1344] : memref<8x4096xf32, #tpu.memory_space<vmem>>, vector<8x64xf32>
    tpu.vector_store %arg13[%c0_46, %c1344], %83 {strides = array<i32>} : memref<8x4096xf32, #tpu.memory_space<vmem>>, vector<8x64xf32>,
    %85 = vector.extract_strided_slice %40 {offsets = [176, 0], sizes = [8, 64], strides = [1, 1]} : vector<512x64xf32> to vector<8x64xf32>
    %c0_47 = arith.constant 0 : index
    %c1408 = arith.constant 1408 : index
    %86 = vector.load %arg13[%c0_47, %c1408] : memref<8x4096xf32, #tpu.memory_space<vmem>>, vector<8x64xf32>
    tpu.vector_store %arg13[%c0_47, %c1408], %85 {strides = array<i32>} : memref<8x4096xf32, #tpu.memory_space<vmem>>, vector<8x64xf32>,
    %87 = vector.extract_strided_slice %40 {offsets = [184, 0], sizes = [8, 64], strides = [1, 1]} : vector<512x64xf32> to vector<8x64xf32>
    %c0_48 = arith.constant 0 : index
    %c1472 = arith.constant 1472 : index
    %88 = vector.load %arg13[%c0_48, %c1472] : memref<8x4096xf32, #tpu.memory_space<vmem>>, vector<8x64xf32>
    tpu.vector_store %arg13[%c0_48, %c1472], %87 {strides = array<i32>} : memref<8x4096xf32, #tpu.memory_space<vmem>>, vector<8x64xf32>,
    %89 = vector.extract_strided_slice %40 {offsets = [192, 0], sizes = [8, 64], strides = [1, 1]} : vector<512x64xf32> to vector<8x64xf32>
    %c0_49 = arith.constant 0 : index
    %c1536 = arith.constant 1536 : index
    %90 = vector.load %arg13[%c0_49, %c1536] : memref<8x4096xf32, #tpu.memory_space<vmem>>, vector<8x64xf32>
    tpu.vector_store %arg13[%c0_49, %c1536], %89 {strides = array<i32>} : memref<8x4096xf32, #tpu.memory_space<vmem>>, vector<8x64xf32>,
    %91 = vector.extract_strided_slice %40 {offsets = [200, 0], sizes = [8, 64], strides = [1, 1]} : vector<512x64xf32> to vector<8x64xf32>
    %c0_50 = arith.constant 0 : index
    %c1600 = arith.constant 1600 : index
    %92 = vector.load %arg13[%c0_50, %c1600] : memref<8x4096xf32, #tpu.memory_space<vmem>>, vector<8x64xf32>
    tpu.vector_store %arg13[%c0_50, %c1600], %91 {strides = array<i32>} : memref<8x4096xf32, #tpu.memory_space<vmem>>, vector<8x64xf32>,
    %93 = vector.extract_strided_slice %40 {offsets = [208, 0], sizes = [8, 64], strides = [1, 1]} : vector<512x64xf32> to vector<8x64xf32>
    %c0_51 = arith.constant 0 : index
    %c1664 = arith.constant 1664 : index
    %94 = vector.load %arg13[%c0_51, %c1664] : memref<8x4096xf32, #tpu.memory_space<vmem>>, vector<8x64xf32>
    tpu.vector_store %arg13[%c0_51, %c1664], %93 {strides = array<i32>} : memref<8x4096xf32, #tpu.memory_space<vmem>>, vector<8x64xf32>,
    %95 = vector.extract_strided_slice %40 {offsets = [216, 0], sizes = [8, 64], strides = [1, 1]} : vector<512x64xf32> to vector<8x64xf32>
    %c0_52 = arith.constant 0 : index
    %c1728 = arith.constant 1728 : index
    %96 = vector.load %arg13[%c0_52, %c1728] : memref<8x4096xf32, #tpu.memory_space<vmem>>, vector<8x64xf32>
    tpu.vector_store %arg13[%c0_52, %c1728], %95 {strides = array<i32>} : memref<8x4096xf32, #tpu.memory_space<vmem>>, vector<8x64xf32>,
    %97 = vector.extract_strided_slice %40 {offsets = [224, 0], sizes = [8, 64], strides = [1, 1]} : vector<512x64xf32> to vector<8x64xf32>
    %c0_53 = arith.constant 0 : index
    %c1792 = arith.constant 1792 : index
    %98 = vector.load %arg13[%c0_53, %c1792] : memref<8x4096xf32, #tpu.memory_space<vmem>>, vector<8x64xf32>
    tpu.vector_store %arg13[%c0_53, %c1792], %97 {strides = array<i32>} : memref<8x4096xf32, #tpu.memory_space<vmem>>, vector<8x64xf32>,
    %99 = vector.extract_strided_slice %40 {offsets = [232, 0], sizes = [8, 64], strides = [1, 1]} : vector<512x64xf32> to vector<8x64xf32>
    %c0_54 = arith.constant 0 : index
    %c1856 = arith.constant 1856 : index
    %100 = vector.load %arg13[%c0_54, %c1856] : memref<8x4096xf32, #tpu.memory_space<vmem>>, vector<8x64xf32>
    tpu.vector_store %arg13[%c0_54, %c1856], %99 {strides = array<i32>} : memref<8x4096xf32, #tpu.memory_space<vmem>>, vector<8x64xf32>,
    %101 = vector.extract_strided_slice %40 {offsets = [240, 0], sizes = [8, 64], strides = [1, 1]} : vector<512x64xf32> to vector<8x64xf32>
    %c0_55 = arith.constant 0 : index
    %c1920 = arith.constant 1920 : index
    %102 = vector.load %arg13[%c0_55, %c1920] : memref<8x4096xf32, #tpu.memory_space<vmem>>, vector<8x64xf32>
    tpu.vector_store %arg13[%c0_55, %c1920], %101 {strides = array<i32>} : memref<8x4096xf32, #tpu.memory_space<vmem>>, vector<8x64xf32>,
    %103 = vector.extract_strided_slice %40 {offsets = [248, 0], sizes = [8, 64], strides = [1, 1]} : vector<512x64xf32> to vector<8x64xf32>
    %c0_56 = arith.constant 0 : index
    %c1984 = arith.constant 1984 : index
    %104 = vector.load %arg13[%c0_56, %c1984] : memref<8x4096xf32, #tpu.memory_space<vmem>>, vector<8x64xf32>
    tpu.vector_store %arg13[%c0_56, %c1984], %103 {strides = array<i32>} : memref<8x4096xf32, #tpu.memory_space<vmem>>, vector<8x64xf32>,
    %105 = vector.extract_strided_slice %40 {offsets = [256, 0], sizes = [8, 64], strides = [1, 1]} : vector<512x64xf32> to vector<8x64xf32>
    %c0_57 = arith.constant 0 : index
    %c2048 = arith.constant 2048 : index
    %106 = vector.load %arg13[%c0_57, %c2048] : memref<8x4096xf32, #tpu.memory_space<vmem>>, vector<8x64xf32>
    tpu.vector_store %arg13[%c0_57, %c2048], %105 {strides = array<i32>} : memref<8x4096xf32, #tpu.memory_space<vmem>>, vector<8x64xf32>,
    %107 = vector.extract_strided_slice %40 {offsets = [264, 0], sizes = [8, 64], strides = [1, 1]} : vector<512x64xf32> to vector<8x64xf32>
    %c0_58 = arith.constant 0 : index
    %c2112 = arith.constant 2112 : index
    %108 = vector.load %arg13[%c0_58, %c2112] : memref<8x4096xf32, #tpu.memory_space<vmem>>, vector<8x64xf32>
    tpu.vector_store %arg13[%c0_58, %c2112], %107 {strides = array<i32>} : memref<8x4096xf32, #tpu.memory_space<vmem>>, vector<8x64xf32>,
    %109 = vector.extract_strided_slice %40 {offsets = [272, 0], sizes = [8, 64], strides = [1, 1]} : vector<512x64xf32> to vector<8x64xf32>
    %c0_59 = arith.constant 0 : index
    %c2176 = arith.constant 2176 : index
    %110 = vector.load %arg13[%c0_59, %c2176] : memref<8x4096xf32, #tpu.memory_space<vmem>>, vector<8x64xf32>
    tpu.vector_store %arg13[%c0_59, %c2176], %109 {strides = array<i32>} : memref<8x4096xf32, #tpu.memory_space<vmem>>, vector<8x64xf32>,
    %111 = vector.extract_strided_slice %40 {offsets = [280, 0], sizes = [8, 64], strides = [1, 1]} : vector<512x64xf32> to vector<8x64xf32>
    %c0_60 = arith.constant 0 : index
    %c2240 = arith.constant 2240 : index
    %112 = vector.load %arg13[%c0_60, %c2240] : memref<8x4096xf32, #tpu.memory_space<vmem>>, vector<8x64xf32>
    tpu.vector_store %arg13[%c0_60, %c2240], %111 {strides = array<i32>} : memref<8x4096xf32, #tpu.memory_space<vmem>>, vector<8x64xf32>,
    %113 = vector.extract_strided_slice %40 {offsets = [288, 0], sizes = [8, 64], strides = [1, 1]} : vector<512x64xf32> to vector<8x64xf32>
    %c0_61 = arith.constant 0 : index
    %c2304 = arith.constant 2304 : index
    %114 = vector.load %arg13[%c0_61, %c2304] : memref<8x4096xf32, #tpu.memory_space<vmem>>, vector<8x64xf32>
    tpu.vector_store %arg13[%c0_61, %c2304], %113 {strides = array<i32>} : memref<8x4096xf32, #tpu.memory_space<vmem>>, vector<8x64xf32>,
    %115 = vector.extract_strided_slice %40 {offsets = [296, 0], sizes = [8, 64], strides = [1, 1]} : vector<512x64xf32> to vector<8x64xf32>
    %c0_62 = arith.constant 0 : index
    %c2368 = arith.constant 2368 : index
    %116 = vector.load %arg13[%c0_62, %c2368] : memref<8x4096xf32, #tpu.memory_space<vmem>>, vector<8x64xf32>
    tpu.vector_store %arg13[%c0_62, %c2368], %115 {strides = array<i32>} : memref<8x4096xf32, #tpu.memory_space<vmem>>, vector<8x64xf32>,
    %117 = vector.extract_strided_slice %40 {offsets = [304, 0], sizes = [8, 64], strides = [1, 1]} : vector<512x64xf32> to vector<8x64xf32>
    %c0_63 = arith.constant 0 : index
    %c2432 = arith.constant 2432 : index
    %118 = vector.load %arg13[%c0_63, %c2432] : memref<8x4096xf32, #tpu.memory_space<vmem>>, vector<8x64xf32>
    tpu.vector_store %arg13[%c0_63, %c2432], %117 {strides = array<i32>} : memref<8x4096xf32, #tpu.memory_space<vmem>>, vector<8x64xf32>,
    %119 = vector.extract_strided_slice %40 {offsets = [312, 0], sizes = [8, 64], strides = [1, 1]} : vector<512x64xf32> to vector<8x64xf32>
    %c0_64 = arith.constant 0 : index
    %c2496 = arith.constant 2496 : index
    %120 = vector.load %arg13[%c0_64, %c2496] : memref<8x4096xf32, #tpu.memory_space<vmem>>, vector<8x64xf32>
    tpu.vector_store %arg13[%c0_64, %c2496], %119 {strides = array<i32>} : memref<8x4096xf32, #tpu.memory_space<vmem>>, vector<8x64xf32>,
    %121 = vector.extract_strided_slice %40 {offsets = [320, 0], sizes = [8, 64], strides = [1, 1]} : vector<512x64xf32> to vector<8x64xf32>
    %c0_65 = arith.constant 0 : index
    %c2560 = arith.constant 2560 : index
    %122 = vector.load %arg13[%c0_65, %c2560] : memref<8x4096xf32, #tpu.memory_space<vmem>>, vector<8x64xf32>
    tpu.vector_store %arg13[%c0_65, %c2560], %121 {strides = array<i32>} : memref<8x4096xf32, #tpu.memory_space<vmem>>, vector<8x64xf32>,
    %123 = vector.extract_strided_slice %40 {offsets = [328, 0], sizes = [8, 64], strides = [1, 1]} : vector<512x64xf32> to vector<8x64xf32>
    %c0_66 = arith.constant 0 : index
    %c2624 = arith.constant 2624 : index
    %124 = vector.load %arg13[%c0_66, %c2624] : memref<8x4096xf32, #tpu.memory_space<vmem>>, vector<8x64xf32>
    tpu.vector_store %arg13[%c0_66, %c2624], %123 {strides = array<i32>} : memref<8x4096xf32, #tpu.memory_space<vmem>>, vector<8x64xf32>,
    %125 = vector.extract_strided_slice %40 {offsets = [336, 0], sizes = [8, 64], strides = [1, 1]} : vector<512x64xf32> to vector<8x64xf32>
    %c0_67 = arith.constant 0 : index
    %c2688 = arith.constant 2688 : index
    %126 = vector.load %arg13[%c0_67, %c2688] : memref<8x4096xf32, #tpu.memory_space<vmem>>, vector<8x64xf32>
    tpu.vector_store %arg13[%c0_67, %c2688], %125 {strides = array<i32>} : memref<8x4096xf32, #tpu.memory_space<vmem>>, vector<8x64xf32>,
    %127 = vector.extract_strided_slice %40 {offsets = [344, 0], sizes = [8, 64], strides = [1, 1]} : vector<512x64xf32> to vector<8x64xf32>
    %c0_68 = arith.constant 0 : index
    %c2752 = arith.constant 2752 : index
    %128 = vector.load %arg13[%c0_68, %c2752] : memref<8x4096xf32, #tpu.memory_space<vmem>>, vector<8x64xf32>
    tpu.vector_store %arg13[%c0_68, %c2752], %127 {strides = array<i32>} : memref<8x4096xf32, #tpu.memory_space<vmem>>, vector<8x64xf32>,
    %129 = vector.extract_strided_slice %40 {offsets = [352, 0], sizes = [8, 64], strides = [1, 1]} : vector<512x64xf32> to vector<8x64xf32>
    %c0_69 = arith.constant 0 : index
    %c2816 = arith.constant 2816 : index
    %130 = vector.load %arg13[%c0_69, %c2816] : memref<8x4096xf32, #tpu.memory_space<vmem>>, vector<8x64xf32>
    tpu.vector_store %arg13[%c0_69, %c2816], %129 {strides = array<i32>} : memref<8x4096xf32, #tpu.memory_space<vmem>>, vector<8x64xf32>,
    %131 = vector.extract_strided_slice %40 {offsets = [360, 0], sizes = [8, 64], strides = [1, 1]} : vector<512x64xf32> to vector<8x64xf32>
    %c0_70 = arith.constant 0 : index
    %c2880 = arith.constant 2880 : index
    %132 = vector.load %arg13[%c0_70, %c2880] : memref<8x4096xf32, #tpu.memory_space<vmem>>, vector<8x64xf32>
    tpu.vector_store %arg13[%c0_70, %c2880], %131 {strides = array<i32>} : memref<8x4096xf32, #tpu.memory_space<vmem>>, vector<8x64xf32>,
    %133 = vector.extract_strided_slice %40 {offsets = [368, 0], sizes = [8, 64], strides = [1, 1]} : vector<512x64xf32> to vector<8x64xf32>
    %c0_71 = arith.constant 0 : index
    %c2944 = arith.constant 2944 : index
    %134 = vector.load %arg13[%c0_71, %c2944] : memref<8x4096xf32, #tpu.memory_space<vmem>>, vector<8x64xf32>
    tpu.vector_store %arg13[%c0_71, %c2944], %133 {strides = array<i32>} : memref<8x4096xf32, #tpu.memory_space<vmem>>, vector<8x64xf32>,
    %135 = vector.extract_strided_slice %40 {offsets = [376, 0], sizes = [8, 64], strides = [1, 1]} : vector<512x64xf32> to vector<8x64xf32>
    %c0_72 = arith.constant 0 : index
    %c3008 = arith.constant 3008 : index
    %136 = vector.load %arg13[%c0_72, %c3008] : memref<8x4096xf32, #tpu.memory_space<vmem>>, vector<8x64xf32>
    tpu.vector_store %arg13[%c0_72, %c3008], %135 {strides = array<i32>} : memref<8x4096xf32, #tpu.memory_space<vmem>>, vector<8x64xf32>,
    %137 = vector.extract_strided_slice %40 {offsets = [384, 0], sizes = [8, 64], strides = [1, 1]} : vector<512x64xf32> to vector<8x64xf32>
    %c0_73 = arith.constant 0 : index
    %c3072 = arith.constant 3072 : index
    %138 = vector.load %arg13[%c0_73, %c3072] : memref<8x4096xf32, #tpu.memory_space<vmem>>, vector<8x64xf32>
    tpu.vector_store %arg13[%c0_73, %c3072], %137 {strides = array<i32>} : memref<8x4096xf32, #tpu.memory_space<vmem>>, vector<8x64xf32>,
    %139 = vector.extract_strided_slice %40 {offsets = [392, 0], sizes = [8, 64], strides = [1, 1]} : vector<512x64xf32> to vector<8x64xf32>
    %c0_74 = arith.constant 0 : index
    %c3136 = arith.constant 3136 : index
    %140 = vector.load %arg13[%c0_74, %c3136] : memref<8x4096xf32, #tpu.memory_space<vmem>>, vector<8x64xf32>
    tpu.vector_store %arg13[%c0_74, %c3136], %139 {strides = array<i32>} : memref<8x4096xf32, #tpu.memory_space<vmem>>, vector<8x64xf32>,
    %141 = vector.extract_strided_slice %40 {offsets = [400, 0], sizes = [8, 64], strides = [1, 1]} : vector<512x64xf32> to vector<8x64xf32>
    %c0_75 = arith.constant 0 : index
    %c3200 = arith.constant 3200 : index
    %142 = vector.load %arg13[%c0_75, %c3200] : memref<8x4096xf32, #tpu.memory_space<vmem>>, vector<8x64xf32>
    tpu.vector_store %arg13[%c0_75, %c3200], %141 {strides = array<i32>} : memref<8x4096xf32, #tpu.memory_space<vmem>>, vector<8x64xf32>,
    %143 = vector.extract_strided_slice %40 {offsets = [408, 0], sizes = [8, 64], strides = [1, 1]} : vector<512x64xf32> to vector<8x64xf32>
    %c0_76 = arith.constant 0 : index
    %c3264 = arith.constant 3264 : index
    %144 = vector.load %arg13[%c0_76, %c3264] : memref<8x4096xf32, #tpu.memory_space<vmem>>, vector<8x64xf32>
    tpu.vector_store %arg13[%c0_76, %c3264], %143 {strides = array<i32>} : memref<8x4096xf32, #tpu.memory_space<vmem>>, vector<8x64xf32>,
    %145 = vector.extract_strided_slice %40 {offsets = [416, 0], sizes = [8, 64], strides = [1, 1]} : vector<512x64xf32> to vector<8x64xf32>
    %c0_77 = arith.constant 0 : index
    %c3328 = arith.constant 3328 : index
    %146 = vector.load %arg13[%c0_77, %c3328] : memref<8x4096xf32, #tpu.memory_space<vmem>>, vector<8x64xf32>
    tpu.vector_store %arg13[%c0_77, %c3328], %145 {strides = array<i32>} : memref<8x4096xf32, #tpu.memory_space<vmem>>, vector<8x64xf32>,
    %147 = vector.extract_strided_slice %40 {offsets = [424, 0], sizes = [8, 64], strides = [1, 1]} : vector<512x64xf32> to vector<8x64xf32>
    %c0_78 = arith.constant 0 : index
    %c3392 = arith.constant 3392 : index
    %148 = vector.load %arg13[%c0_78, %c3392] : memref<8x4096xf32, #tpu.memory_space<vmem>>, vector<8x64xf32>
    tpu.vector_store %arg13[%c0_78, %c3392], %147 {strides = array<i32>} : memref<8x4096xf32, #tpu.memory_space<vmem>>, vector<8x64xf32>,
    %149 = vector.extract_strided_slice %40 {offsets = [432, 0], sizes = [8, 64], strides = [1, 1]} : vector<512x64xf32> to vector<8x64xf32>
    %c0_79 = arith.constant 0 : index
    %c3456 = arith.constant 3456 : index
    %150 = vector.load %arg13[%c0_79, %c3456] : memref<8x4096xf32, #tpu.memory_space<vmem>>, vector<8x64xf32>
    tpu.vector_store %arg13[%c0_79, %c3456], %149 {strides = array<i32>} : memref<8x4096xf32, #tpu.memory_space<vmem>>, vector<8x64xf32>,
    %151 = vector.extract_strided_slice %40 {offsets = [440, 0], sizes = [8, 64], strides = [1, 1]} : vector<512x64xf32> to vector<8x64xf32>
    %c0_80 = arith.constant 0 : index
    %c3520 = arith.constant 3520 : index
    %152 = vector.load %arg13[%c0_80, %c3520] : memref<8x4096xf32, #tpu.memory_space<vmem>>, vector<8x64xf32>
    tpu.vector_store %arg13[%c0_80, %c3520], %151 {strides = array<i32>} : memref<8x4096xf32, #tpu.memory_space<vmem>>, vector<8x64xf32>,
    %153 = vector.extract_strided_slice %40 {offsets = [448, 0], sizes = [8, 64], strides = [1, 1]} : vector<512x64xf32> to vector<8x64xf32>
    %c0_81 = arith.constant 0 : index
    %c3584 = arith.constant 3584 : index
    %154 = vector.load %arg13[%c0_81, %c3584] : memref<8x4096xf32, #tpu.memory_space<vmem>>, vector<8x64xf32>
    tpu.vector_store %arg13[%c0_81, %c3584], %153 {strides = array<i32>} : memref<8x4096xf32, #tpu.memory_space<vmem>>, vector<8x64xf32>,
    %155 = vector.extract_strided_slice %40 {offsets = [456, 0], sizes = [8, 64], strides = [1, 1]} : vector<512x64xf32> to vector<8x64xf32>
    %c0_82 = arith.constant 0 : index
    %c3648 = arith.constant 3648 : index
    %156 = vector.load %arg13[%c0_82, %c3648] : memref<8x4096xf32, #tpu.memory_space<vmem>>, vector<8x64xf32>
    tpu.vector_store %arg13[%c0_82, %c3648], %155 {strides = array<i32>} : memref<8x4096xf32, #tpu.memory_space<vmem>>, vector<8x64xf32>,
    %157 = vector.extract_strided_slice %40 {offsets = [464, 0], sizes = [8, 64], strides = [1, 1]} : vector<512x64xf32> to vector<8x64xf32>
    %c0_83 = arith.constant 0 : index
    %c3712 = arith.constant 3712 : index
    %158 = vector.load %arg13[%c0_83, %c3712] : memref<8x4096xf32, #tpu.memory_space<vmem>>, vector<8x64xf32>
    tpu.vector_store %arg13[%c0_83, %c3712], %157 {strides = array<i32>} : memref<8x4096xf32, #tpu.memory_space<vmem>>, vector<8x64xf32>,
    %159 = vector.extract_strided_slice %40 {offsets = [472, 0], sizes = [8, 64], strides = [1, 1]} : vector<512x64xf32> to vector<8x64xf32>
    %c0_84 = arith.constant 0 : index
    %c3776 = arith.constant 3776 : index
    %160 = vector.load %arg13[%c0_84, %c3776] : memref<8x4096xf32, #tpu.memory_space<vmem>>, vector<8x64xf32>
    tpu.vector_store %arg13[%c0_84, %c3776], %159 {strides = array<i32>} : memref<8x4096xf32, #tpu.memory_space<vmem>>, vector<8x64xf32>,
    %161 = vector.extract_strided_slice %40 {offsets = [480, 0], sizes = [8, 64], strides = [1, 1]} : vector<512x64xf32> to vector<8x64xf32>
    %c0_85 = arith.constant 0 : index
    %c3840 = arith.constant 3840 : index
    %162 = vector.load %arg13[%c0_85, %c3840] : memref<8x4096xf32, #tpu.memory_space<vmem>>, vector<8x64xf32>
    tpu.vector_store %arg13[%c0_85, %c3840], %161 {strides = array<i32>} : memref<8x4096xf32, #tpu.memory_space<vmem>>, vector<8x64xf32>,
    %163 = vector.extract_strided_slice %40 {offsets = [488, 0], sizes = [8, 64], strides = [1, 1]} : vector<512x64xf32> to vector<8x64xf32>
    %c0_86 = arith.constant 0 : index
    %c3904 = arith.constant 3904 : index
    %164 = vector.load %arg13[%c0_86, %c3904] : memref<8x4096xf32, #tpu.memory_space<vmem>>, vector<8x64xf32>
    tpu.vector_store %arg13[%c0_86, %c3904], %163 {strides = array<i32>} : memref<8x4096xf32, #tpu.memory_space<vmem>>, vector<8x64xf32>,
    %165 = vector.extract_strided_slice %40 {offsets = [496, 0], sizes = [8, 64], strides = [1, 1]} : vector<512x64xf32> to vector<8x64xf32>
    %c0_87 = arith.constant 0 : index
    %c3968 = arith.constant 3968 : index
    %166 = vector.load %arg13[%c0_87, %c3968] : memref<8x4096xf32, #tpu.memory_space<vmem>>, vector<8x64xf32>
    tpu.vector_store %arg13[%c0_87, %c3968], %165 {strides = array<i32>} : memref<8x4096xf32, #tpu.memory_space<vmem>>, vector<8x64xf32>,
    %167 = vector.extract_strided_slice %40 {offsets = [504, 0], sizes = [8, 64], strides = [1, 1]} : vector<512x64xf32> to vector<8x64xf32>
    %c0_88 = arith.constant 0 : index
    %c4032 = arith.constant 4032 : index
    %168 = vector.load %arg13[%c0_88, %c4032] : memref<8x4096xf32, #tpu.memory_space<vmem>>, vector<8x64xf32>
    tpu.vector_store %arg13[%c0_88, %c4032], %167 {strides = array<i32>} : memref<8x4096xf32, #tpu.memory_space<vmem>>, vector<8x64xf32>,
    %c0_89 = arith.constant 0 : index
    %c0_90 = arith.constant 0 : index
    %169 = vector.load %arg13[%c0_89, %c0_90] : memref<8x4096xf32, #tpu.memory_space<vmem>>, vector<8x4096xf32>
    %170 = arith.truncf %169 : vector<8x4096xf32> to vector<8x4096xbf16>
    %c0_91 = arith.constant 0 : index
    %c0_92 = arith.constant 0 : index
    %171 = vector.load %arg8[%c0_91, %c0_92] : memref<4096x128xbf16, #tpu.memory_space<vmem>>, vector<4096x128xbf16>
    %cst_93 = arith.constant dense<0.000000e+00> : vector<8x128xf32>
    %172 = tpu.matmul %170, %171, %cst_93 {dimension_numbers = #tpu.dot_dimension_numbers<[1], [0], [0], [1], [0, 0, 1, 1], [], []>} : vector<8x4096xbf16>, vector<4096x128xbf16>, vector<8x128xf32> -> vector<8x128xf32>
    %c0_94 = arith.constant 0 : index
    %c0_95 = arith.constant 0 : index
    %173 = vector.load %arg9[%c0_94, %c0_95] : memref<1x128xf32, #tpu.memory_space<vmem>>, vector<1x128xf32>
    %174 = vector.broadcast %173 : vector<1x128xf32> to vector<8x128xf32>
    %175 = arith.addf %172, %174 : vector<8x128xf32>
    %cst_96 = arith.constant 0.000000e+00 : f32
    %176 = vector.broadcast %cst_96 : f32 to vector<8x128xf32>
    %177 = arith.maximumf %175, %176 : vector<8x128xf32>
    %178 = arith.truncf %177 : vector<8x128xf32> to vector<8x128xbf16>
    %c0_97 = arith.constant 0 : index
    %c0_98 = arith.constant 0 : index
    %179 = vector.load %arg10[%c0_97, %c0_98] : memref<128x128xbf16, #tpu.memory_space<vmem>>, vector<128x128xbf16>
    %cst_99 = arith.constant dense<0.000000e+00> : vector<8x128xf32>
    %180 = tpu.matmul %178, %179, %cst_99 {dimension_numbers = #tpu.dot_dimension_numbers<[1], [0], [0], [1], [0, 0, 1, 1], [], []>} : vector<8x128xbf16>, vector<128x128xbf16>, vector<8x128xf32> -> vector<8x128xf32>
    %c0_100 = arith.constant 0 : index
    %c0_101 = arith.constant 0 : index
    %181 = vector.load %arg11[%c0_100, %c0_101] : memref<1x128xf32, #tpu.memory_space<vmem>>, vector<1x128xf32>
    %182 = vector.broadcast %181 : vector<1x128xf32> to vector<8x128xf32>
    %183 = arith.addf %180, %182 : vector<8x128xf32>
    %c0_102 = arith.constant 0 : index
    %c0_103 = arith.constant 0 : index
    %184 = vector.load %arg12[%c0_102, %c0_103] : memref<8x128xf32, #tpu.memory_space<vmem>>, vector<8x128xf32>
    tpu.vector_store %arg12[%c0_102, %c0_103], %183 {strides = array<i32>} : memref<8x128xf32, #tpu.memory_space<vmem>>, vector<8x128xf32>,
    return
  }
  func.func @transform_0(%arg0: i32) -> (i32, i32) {
    %c0_i32 = arith.constant 0 : i32
    %c0_i32_0 = arith.constant 0 : i32
    return %arg0, %c0_i32 : i32, i32
  }
  func.func @transform_1(%arg0: i32) -> (i32, i32) {
    %c0_i32 = arith.constant 0 : i32
    %c0_i32_0 = arith.constant 0 : i32
    %c0_i32_1 = arith.constant 0 : i32
    return %c0_i32, %c0_i32_0 : i32, i32
  }
  func.func @transform_2(%arg0: i32) -> (i32, i32) {
    %c0_i32 = arith.constant 0 : i32
    %c0_i32_0 = arith.constant 0 : i32
    %c0_i32_1 = arith.constant 0 : i32
    return %c0_i32, %c0_i32_0 : i32, i32
  }
  func.func @transform_3(%arg0: i32) -> (i32, i32) {
    %c0_i32 = arith.constant 0 : i32
    %c0_i32_0 = arith.constant 0 : i32
    %c0_i32_1 = arith.constant 0 : i32
    return %c0_i32, %c0_i32_0 : i32, i32
  }
  func.func @transform_4(%arg0: i32) -> (i32, i32, i32) {
    %c0_i32 = arith.constant 0 : i32
    %c0_i32_0 = arith.constant 0 : i32
    %c0_i32_1 = arith.constant 0 : i32
    %c0_i32_2 = arith.constant 0 : i32
    return %c0_i32, %c0_i32_0, %c0_i32_1 : i32, i32, i32
  }
  func.func @transform_5(%arg0: i32) -> (i32, i32) {
    %c0_i32 = arith.constant 0 : i32
    %c0_i32_0 = arith.constant 0 : i32
    %c0_i32_1 = arith.constant 0 : i32
    return %c0_i32, %c0_i32_0 : i32, i32
  }
  func.func @transform_6(%arg0: i32) -> (i32, i32) {
    %c0_i32 = arith.constant 0 : i32
    %c0_i32_0 = arith.constant 0 : i32
    %c0_i32_1 = arith.constant 0 : i32
    return %c0_i32, %c0_i32_0 : i32, i32
  }
  func.func @transform_7(%arg0: i32) -> (i32, i32) {
    %c0_i32 = arith.constant 0 : i32
    %c0_i32_0 = arith.constant 0 : i32
    %c0_i32_1 = arith.constant 0 : i32
    return %c0_i32, %c0_i32_0 : i32, i32
  }
  func.func @transform_8(%arg0: i32) -> (i32, i32) {
    %c0_i32 = arith.constant 0 : i32
    %c0_i32_0 = arith.constant 0 : i32
    %c0_i32_1 = arith.constant 0 : i32
    return %c0_i32, %c0_i32_0 : i32, i32
  }
  func.func @transform_9(%arg0: i32) -> (i32, i32) {
    %c0_i32 = arith.constant 0 : i32
    %c0_i32_0 = arith.constant 0 : i32
    %c0_i32_1 = arith.constant 0 : i32
    return %c0_i32, %c0_i32_0 : i32, i32
  }
  func.func @transform_10(%arg0: i32) -> (i32, i32) {
    %c0_i32 = arith.constant 0 : i32
    %c0_i32_0 = arith.constant 0 : i32
    %c0_i32_1 = arith.constant 0 : i32
    return %c0_i32, %c0_i32_0 : i32, i32
  }
  func.func @transform_11(%arg0: i32) -> (i32, i32) {
    %c0_i32 = arith.constant 0 : i32
    %c0_i32_0 = arith.constant 0 : i32
    return %arg0, %c0_i32 : i32, i32
  }
}

</mosaic_0001>

<bundles_post_ra>
// kernel: tpu_custom_call.1
= control target key start
LH: loop header
LB: loop body
LE: loop exit
PB: predicated region body
PF: predicated region fallthrough
CT: control target
= control target key end

     0   :  { %16 = vsyncpa [#allocation4], 0  ;;  %s8706_s0 = inlined_call_operand.vmem [shape: bf16[1024,24], index: 0, kind: input, shape index: {}]   ;;  %s8707_s1 = inlined_call_operand.vmem [shape: bf16[24,64], index: 1, kind: input, shape index: {}]   ;;  %s8708_s2 = inlined_call_operand.vmem [shape: f32[1,64], index: 2, kind: input, shape index: {}]   ;;  %s8709_s3 = inlined_call_operand.vmem [shape: f32[1,64], index: 3, kind: input, shape index: {}]   ;;  %s8710_s4 = inlined_call_operand.vmem [shape: bf16[3,64,64], index: 4, kind: input, shape index: {}]   ;;  %s8711_s5 = inlined_call_operand.vmem [shape: f32[1,64], index: 5, kind: input, shape index: {}]   ;;  %s8712_s6 = inlined_call_operand.vmem [shape: f32[1,64], index: 6, kind: input, shape index: {}]   ;;  %s8713_s7 = inlined_call_operand.hbm [shape: bf16[4096,128], index: 7, kind: input, shape index: {}]   ;;  %s8714_s8 = inlined_call_operand.vmem [shape: f32[1,128], index: 8, kind: input, shape index: {}]   ;;  %s8715_s9 = inlined_call_operand.vmem [shape: bf16[128,128], index: 9, kind: input, shape index: {}]   ;;  %s8716_s10 = inlined_call_operand.vmem [shape: f32[1,128], index: 10, kind: input, shape index: {}]   ;;  %s8717_s11 = inlined_call_operand.hbm [shape: f32[8,128], index: 11, kind: output, shape index: {}]  }
   0x1   :  { %17 = vsyncpa [#allocation5], 0  ;;  %s36_s19 = sshll.u32 %s8713_s7, 4  ;;  %s7411_s20 = smov [#allocation3]   ;;  %s37_s19 = int_to_ptr.hbm [resolvable:$true] %s36_s19 }
   0x2   :  { %s38_s21 = sshll.u32 %s7411_s20, 4  ;;  %s7412_s22 = smov 64   ;;  %s39_s21 = int_to_ptr.vmem [resolvable:$true] %s38_s21 }
   0x3   :  { %s7413_s23 = smov 4  }
   0x4   :  { %44 = dma.hbm_to_vmem [thread:$0]  %s37_s19, 32768, %s39_s21, [#allocation4], %s7412_s22, %s7412_s22, %s7413_s23  }
   0x5   :  { %7407 = dma.done.wait [#allocation4], 32768  }
   0x6   :  { %7408 = vsyncadd [#allocation4], 4294934528  ;;  %v186_v0 = vld [vmem:[%s8707_s1 + $0x8] sm:$0xf]  ;;  %vm709_vm0 = vcmask 1043456   ;;  %v7058_v4 = vld [vmem:[%s8707_s1] sm:$0xff] }
   0x7   :  { %v512_v1 = vunpack.c.l.b16 %v186_v0  ;;  %v6994_v5 = vld [vmem:[%s8706_s0] sm:$0xff]  ;;  %vm516_vm1 = vcmask 195584   ;;  %v6995_v6 = vld [vmem:[%s8706_s0 + $0x8] sm:$0xff]  ;;  %v6996_v7 = vld [vmem:[%s8706_s0 + $0x10] sm:$0xff]  ;;  %vm1603_vm2 = vcmask 523264   ;;  %vm2633_vm3 = vcmask 1048064  }
   0x8   :  { %v6997_v8 = vld [vmem:[%s8706_s0 + $0x18] sm:$0xff]  ;;  %v6998_v9 = vld [vmem:[%s8706_s0 + $0x20] sm:$0xff]  ;;  %v6999_v10 = vld [vmem:[%s8706_s0 + $0x28] sm:$0xff]  ;;  %s7415_s28 = smov [#allocation6]   ;;  %s5444_s1 = sshll.u32 %s8717_s11, 4  ;;  %s5445_s1 = int_to_ptr.hbm [resolvable:$true] %s5444_s1 }
   0x9   :  { %v514_v2 = vpack.c.b16 %v512_v1, %v512_v1  ;;  %v7000_v11 = vld [vmem:[%s8706_s0 + $0x30] sm:$0xff]  ;;  %v7001_v12 = vld [vmem:[%s8706_s0 + $0x38] sm:$0xff]  ;;  %v7002_v13 = vld [vmem:[%s8706_s0 + $0x40] sm:$0xff]  ;;  %s5442_s29 = sshll.u32 %s7415_s28, 4  ;;  %s5443_s29 = int_to_ptr.vmem [resolvable:$true] %s5442_s29 }
   0xa   :  { %v7003_v16 = vld [vmem:[%s8706_s0 + $0x48] sm:$0xff]  ;;  %v7004_v19 = vld [vmem:[%s8706_s0 + $0x50] sm:$0xff]  ;;  %v7005_v22 = vld [vmem:[%s8706_s0 + $0x58] sm:$0xff] }
   0xb   :  { %v711_v3 = vsel %vm709_vm0, %v514_v2, 0  ;;  %v7006_v25 = vld [vmem:[%s8706_s0 + $0x60] sm:$0xff]  ;;  %v7007_v28 = vld [vmem:[%s8706_s0 + $0x68] sm:$0xff]  ;;  %v7008_v31 = vld [vmem:[%s8706_s0 + $0x70] sm:$0xff] }
   0xc   :  { %719 = vmatpush.bf16.msra.mxu0 %v711_v3  ;;  %7335 = vmatpush.bf16.msra.mxu1 %v711_v3  ;;  %v7009_v34 = vld [vmem:[%s8706_s0 + $0x78] sm:$0xff]  ;;  %v7010_v37 = vld [vmem:[%s8706_s0 + $0x80] sm:$0xff]  ;;  %v7011_v40 = vld [vmem:[%s8706_s0 + $0x88] sm:$0xff] }
   0xd   :  { %7336 = vmatpush.bf16.msra.mxu2 %v711_v3  ;;  %7337 = vmatpush.bf16.msra.mxu3 %v711_v3  ;;  %v7012_v43 = vld [vmem:[%s8706_s0 + $0x90] sm:$0xff]  ;;  %v7013_v46 = vld [vmem:[%s8706_s0 + $0x98] sm:$0xff]  ;;  %v7014_v49 = vld [vmem:[%s8706_s0 + $0xa0] sm:$0xff] }
   0xe   :  { %v7015_v52 = vld [vmem:[%s8706_s0 + $0xa8] sm:$0xff]  ;;  %v7016_v55 = vld [vmem:[%s8706_s0 + $0xb0] sm:$0xff]  ;;  %v7050_v57 = vld [vmem:[%s8706_s0 + $0x1c0] sm:$0xff] }
   0xf   :  { %v7017_v59 = vld [vmem:[%s8706_s0 + $0xb8] sm:$0xff]  ;;  %v7051_v61 = vld [vmem:[%s8706_s0 + $0x1c8] sm:$0xff]  ;;  %v7018_v63 = vld [vmem:[%s8706_s0 + $0xc0] sm:$0xff] }
  0x10   :  { %720 = vmatpush.bf16.msra.mxu0 %v7058_v4  ;;  %7338 = vmatpush.bf16.msra.mxu1 %v7058_v4  ;;  %v7052_v1 = vld [vmem:[%s8706_s0 + $0x1d0] sm:$0xff]  ;;  %v7053_v3 = vld [vmem:[%s8706_s0 + $0x1d8] sm:$0xff] }
  0x11   :  { %7339 = vmatpush.bf16.msra.mxu2 %v7058_v4  ;;  %7340 = vmatpush.bf16.msra.mxu3 %v7058_v4  ;;  %v7019_v4 = vld [vmem:[%s8706_s0 + $0xc8] sm:$0xff] }
  0x13   :  { %5714 = vmatmul.msk.bf16.vlgmr.msra.gmra.mxu0 %vm516_vm1, %v6994_v5  ;;  %5770 = vmatmul.msk.bf16.vlgmr.msra.gmra.mxu1 %vm516_vm1, %v7050_v57 }
  0x14   :  { %5773 = vmatmul.msk.bf16.vlgmr.msra.gmra.mxu2 %vm516_vm1, %v7053_v3  ;;  %v7752_v3 = vld [vmem:[%s8709_s3] ss:$0 sm:$0xff] }
  0x23   :  { %5715 = vmatmul.msk.bf16.gmra.mxu0 %vm516_vm1, %v6995_v6  ;;  %5771 = vmatmul.msk.bf16.gmra.mxu1 %vm516_vm1, %v7051_v61 }
  0x33   :  { %5716 = vmatmul.msk.bf16.gmra.mxu0 %vm516_vm1, %v6996_v7  ;;  %5772 = vmatmul.msk.bf16.gmra.mxu1 %vm516_vm1, %v7052_v1  ;;  %v7054_v7 = vld [vmem:[%s8706_s0 + $0x1e0] sm:$0xff] }
  0x34   :  { %5774 = vmatmul.msk.bf16.gmra.mxu2 %vm516_vm1, %v7054_v7  ;;  %v7026_v7 = vld [vmem:[%s8706_s0 + $0x100] sm:$0xff] }
  0x43   :  { %5717 = vmatmul.msk.bf16.gmra.mxu0 %vm516_vm1, %v6997_v8  ;;  %v7020_v8 = vld [vmem:[%s8706_s0 + $0xd0] sm:$0xff] }
  0x53   :  { %5718 = vmatmul.msk.bf16.gmra.mxu0 %vm516_vm1, %v6998_v9 }
  0x63   :  { %5719 = vmatmul.msk.bf16.gmra.mxu0 %vm516_vm1, %v6999_v10 }
  0x73   :  { %5720 = vmatmul.msk.bf16.gmra.mxu0 %vm516_vm1, %v7000_v11  ;;  %v7055_v11 = vld [vmem:[%s8706_s0 + $0x1e8] sm:$0xff] }
  0x74   :  { %5775 = vmatmul.msk.bf16.gmra.mxu2 %vm516_vm1, %v7055_v11 }
  0x83   :  { %5721 = vmatmul.msk.bf16.gmra.mxu0 %vm516_vm1, %v7001_v12  ;;  %v7021_v12 = vld [vmem:[%s8706_s0 + $0xd8] sm:$0xff] }
  0x90   :  { %v7522_v14 = vpop.f32.mrf.mxu0 }
  0x93   :  { %5722 = vmatmul.msk.bf16.gmra.mxu0 %vm516_vm1, %v7002_v13 }
  0x98   :  { %v7525_v15 = vpop.f32.mrf.mxu0 }
  0xa0   :  { %v7530_v17 = vpop.f32.mrf.mxu0 }
  0xa3   :  { %5723 = vmatmul.msk.bf16.gmra.mxu0 %vm516_vm1, %v7003_v16 }
  0xa8   :  { %v7533_v18 = vpop.f32.mrf.mxu0 }
  0xb0   :  { %v7538_v20 = vpop.f32.mrf.mxu0 }
  0xb3   :  { %5724 = vmatmul.msk.bf16.gmra.mxu0 %vm516_vm1, %v7004_v19  ;;  %v7056_v19 = vld [vmem:[%s8706_s0 + $0x1f0] sm:$0xff] }
  0xb4   :  { %5776 = vmatmul.msk.bf16.vlgmr.msra.gmra.mxu3 %vm516_vm1, %v7056_v19 }
  0xb8   :  { %v7541_v21 = vpop.f32.mrf.mxu0 }
  0xc0   :  { %v7546_v23 = vpop.f32.mrf.mxu0 }
  0xc3   :  { %5725 = vmatmul.msk.bf16.gmra.mxu0 %vm516_vm1, %v7005_v22  ;;  %v7022_v22 = vld [vmem:[%s8706_s0 + $0xe0] sm:$0xff] }
  0xc8   :  { %v7549_v24 = vpop.f32.mrf.mxu0 }
  0xd0   :  { %v7554_v26 = vpop.f32.mrf.mxu0 }
  0xd3   :  { %5726 = vmatmul.msk.bf16.gmra.mxu0 %vm516_vm1, %v7006_v25 }
  0xd8   :  { %v7557_v27 = vpop.f32.mrf.mxu0 }
  0xe0   :  { %v7562_v29 = vpop.f32.mrf.mxu0 }
  0xe3   :  { %5727 = vmatmul.msk.bf16.gmra.mxu0 %vm516_vm1, %v7007_v28 }
  0xe8   :  { %v7565_v30 = vpop.f32.mrf.mxu0 }
  0xf0   :  { %v7570_v32 = vpop.f32.mrf.mxu0 }
  0xf3   :  { %5728 = vmatmul.msk.bf16.gmra.mxu0 %vm516_vm1, %v7008_v31  ;;  %v7057_v31 = vld [vmem:[%s8706_s0 + $0x1f8] sm:$0xff] }
  0xf4   :  { %5777 = vmatmul.msk.bf16.gmra.mxu3 %vm516_vm1, %v7057_v31 }
  0xf8   :  { %v7573_v33 = vpop.f32.mrf.mxu0 }
 0x100   :  { %v7578_v35 = vpop.f32.mrf.mxu0 }
 0x103   :  { %5729 = vmatmul.msk.bf16.gmra.mxu0 %vm516_vm1, %v7009_v34  ;;  %v7023_v34 = vld [vmem:[%s8706_s0 + $0xe8] sm:$0xff] }
 0x108   :  { %v7581_v36 = vpop.f32.mrf.mxu0 }
 0x110   :  { %v7586_v38 = vpop.f32.mrf.mxu0 }
 0x113   :  { %5730 = vmatmul.msk.bf16.gmra.mxu0 %vm516_vm1, %v7010_v37 }
 0x118   :  { %v7589_v39 = vpop.f32.mrf.mxu0 }
 0x120   :  { %v7594_v41 = vpop.f32.mrf.mxu0 }
 0x123   :  { %5731 = vmatmul.msk.bf16.gmra.mxu0 %vm516_vm1, %v7011_v40 }
 0x128   :  { %v7597_v42 = vpop.f32.mrf.mxu0 }
 0x130   :  { %v7602_v44 = vpop.f32.mrf.mxu0 }
 0x133   :  { %5732 = vmatmul.msk.bf16.gmra.mxu0 %vm516_vm1, %v7012_v43  ;;  %v7024_v43 = vld [vmem:[%s8706_s0 + $0xf0] sm:$0xff] }
 0x138   :  { %v7605_v45 = vpop.f32.mrf.mxu0 }
 0x140   :  { %v7610_v47 = vpop.f32.mrf.mxu0 }
 0x143   :  { %5733 = vmatmul.msk.bf16.gmra.mxu0 %vm516_vm1, %v7013_v46 }
 0x148   :  { %v7613_v48 = vpop.f32.mrf.mxu0 }
 0x150   :  { %v7618_v50 = vpop.f32.mrf.mxu0 }
 0x153   :  { %5734 = vmatmul.msk.bf16.gmra.mxu0 %vm516_vm1, %v7014_v49 }
 0x158   :  { %v7621_v51 = vpop.f32.mrf.mxu0 }
 0x160   :  { %v7626_v53 = vpop.f32.mrf.mxu0 }
 0x163   :  { %5735 = vmatmul.msk.bf16.gmra.mxu0 %vm516_vm1, %v7015_v52  ;;  %v1002_v52 = vpop.f32.mrf.mxu1 }
 0x168   :  { %v7629_v54 = vpop.f32.mrf.mxu0 }
 0x16b   :  { %v1004_v61 = vpop.f32.mrf.mxu1 }
 0x170   :  { %v7634_v56 = vpop.f32.mrf.mxu0 }
 0x173   :  { %5736 = vmatmul.msk.bf16.gmra.mxu0 %vm516_vm1, %v7016_v55  ;;  %v7025_v55 = vld [vmem:[%s8706_s0 + $0xf8] sm:$0xff] }
 0x178   :  { %v7641_v58 = vpop.f32.mrf.mxu0 }
 0x180   :  { %v7646_v60 = vpop.f32.mrf.mxu0 }
 0x183   :  { %5737 = vmatmul.msk.bf16.gmra.mxu0 %vm516_vm1, %v7017_v59 }
 0x188   :  { %v7653_v62 = vpop.f32.mrf.mxu0 }
 0x190   :  { %v7658_v0 = vpop.f32.mrf.mxu0 }
 0x193   :  { %5738 = vmatmul.msk.bf16.gmra.mxu0 %vm516_vm1, %v7018_v63  ;;  %v7746_v63 = vld [vmem:[%s8708_s2] ss:$0 sm:$0xff] }
 0x194   :  { %v1158_v1 = vmul.f32 %v7746_v63, %v1002_v52  ;;  %v1159_v31 = vmul.f32 %v7746_v63, %v1004_v61  ;;  %v7027_v61 = vld [vmem:[%s8706_s0 + $0x108] sm:$0xff] }
 0x196   :  { %v1291_v52 = vadd.f32 %v7752_v3, %v1159_v31 }
 0x198   :  { %v7665_v2 = vpop.f32.mrf.mxu0 }
 0x1a0   :  { %v7674_v5 = vpop.f32.mrf.mxu0 }
 0x1a3   :  { %5739 = vmatmul.msk.bf16.gmra.mxu0 %vm516_vm1, %v7019_v4  ;;  %v1290_v4 = vadd.f32 %v7752_v3, %v1158_v1 }
 0x1a8   :  { %v7677_v6 = vpop.f32.mrf.mxu0 }
 0x1b0   :  { %v7686_v9 = vpop.f32.mrf.mxu0 }
 0x1b3   :  { %5740 = vmatmul.msk.bf16.gmra.mxu0 %vm516_vm1, %v7020_v8 }
 0x1b8   :  { %v7689_v10 = vpop.f32.mrf.mxu0 }
 0x1c0   :  { %v7698_v13 = vpop.f32.mrf.mxu0 }
 0x1c3   :  { %5741 = vmatmul.msk.bf16.gmra.mxu0 %vm516_vm1, %v7021_v12  ;;  %v1007_v12 = vpop.f32.mrf.mxu1 }
 0x1c8   :  { %v7701_v16 = vpop.f32.mrf.mxu0 }
 0x1d0   :  { %v7710_v25 = vpop.f32.mrf.mxu0 }
 0x1d3   :  { %5742 = vmatmul.msk.bf16.gmra.mxu0 %vm516_vm1, %v7022_v22  ;;  %v1418_v22 = vmax.f32 %v1290_v4, 0.0 }
 0x1d8   :  { %v7713_v28 = vpop.f32.mrf.mxu0 }
 0x1e0   :  { %v7722_v37 = vpop.f32.mrf.mxu0 }
 0x1e3   :  { %5743 = vmatmul.msk.bf16.gmra.mxu0 %vm516_vm1, %v7023_v34 }
 0x1e8   :  { %v7725_v40 = vpop.f32.mrf.mxu0 }
 0x1f0   :  { %v7730_v46 = vpop.f32.mrf.mxu0 }
 0x1f1   :  { %8737 = vst [vmem:[#allocation9_spill] sm:$0xff] %v7730_v46 }
 0x1f3   :  { %5744 = vmatmul.msk.bf16.gmra.mxu0 %vm516_vm1, %v7024_v43 }
 0x1f8   :  { %v7733_v49 = vpop.f32.mrf.mxu0 }
 0x1f9   :  { %8738 = vst [vmem:[#allocation10_spill] sm:$0xff] %v7733_v49  ;;  %v1009_v49 = vpop.f32.mrf.mxu1 }
 0x200   :  { %v7738_v57 = vpop.f32.mrf.mxu0 }
 0x201   :  { %8739 = vst [vmem:[#allocation11_spill] sm:$0xff] %v7738_v57  ;;  %v1419_v57 = vmax.f32 %v1291_v52, 0.0 }
 0x203   :  { %5745 = vmatmul.msk.bf16.gmra.mxu0 %vm516_vm1, %v7025_v55 }
 0x208   :  { %v7741_v59 = vpop.f32.mrf.mxu0 }
 0x209   :  { %8740 = vst [vmem:[#allocation12_spill] sm:$0xff] %v7741_v59 }
 0x210   :  { %v842_v8 = vpop.f32.mrf.mxu0 }
 0x211   :  { %v1094_v11 = vmul.f32 %v7746_v63, %v842_v8  ;;  %v1160_v8 = vmul.f32 %v7746_v63, %v1007_v12  ;;  %v1012_v12 = vpop.f32.mrf.mxu1 }
 0x213   :  { %v1226_v19 = vadd.f32 %v7752_v3, %v1094_v11  ;;  %5746 = vmatmul.msk.bf16.gmra.mxu0 %vm516_vm1, %v7026_v7  ;;  %v1292_v7 = vadd.f32 %v7752_v3, %v1160_v8 }
 0x215   :  { %v1354_v34 = vmax.f32 %v1226_v19, 0.0  ;;  %v1420_v52 = vmax.f32 %v1292_v7, 0.0 }
 0x217   :  { %v7762_v43 = vmax.f32 %v1354_v34, %v1418_v22 }
 0x218   :  { %v844_v55 = vpop.f32.mrf.mxu0 }
 0x219   :  { %8741 = vst [vmem:[#allocation13_spill] sm:$0xff] %v7762_v43  ;;  %v1095_v1 = vmul.f32 %v7746_v63, %v844_v55 }
 0x21b   :  { %v1227_v59 = vadd.f32 %v7752_v3, %v1095_v1 }
 0x21d   :  { %v1355_v11 = vmax.f32 %v1227_v59, 0.0 }
 0x21f   :  { %v7768_v4 = vmax.f32 %v1355_v11, %v1419_v57  ;;  %v1161_v57 = vmul.f32 %v7746_v63, %v1009_v49  ;;  %v1017_v49 = vpop.f32.mrf.mxu2 }
 0x220   :  { %v847_v19 = vpop.f32.mrf.mxu0 }
 0x221   :  { %8742 = vst [vmem:[#allocation14_spill] sm:$0xff] %v7768_v4  ;;  %v1096_v22 = vmul.f32 %v7746_v63, %v847_v19  ;;  %v1293_v1 = vadd.f32 %v7752_v3, %v1161_v57  ;;  %v7028_v57 = vld [vmem:[%s8706_s0 + $0x110] sm:$0xff] }
 0x223   :  { %v1228_v34 = vadd.f32 %v7752_v3, %v1096_v22  ;;  %5747 = vmatmul.msk.bf16.gmra.mxu0 %vm516_vm1, %v7027_v61  ;;  %v1421_v7 = vmax.f32 %v1293_v1, 0.0  ;;  %v1162_v61 = vmul.f32 %v7746_v63, %v1012_v12 }
 0x225   :  { %v1356_v59 = vmax.f32 %v1228_v34, 0.0 }
 0x227   :  { %v7780_v55 = vmax.f32 %v1356_v59, %v1420_v52  ;;  %v1294_v52 = vadd.f32 %v7752_v3, %v1162_v61  ;;  %v1019_v43 = vpop.f32.mrf.mxu2 }
 0x228   :  { %v849_v8 = vpop.f32.mrf.mxu0 }
 0x229   :  { %8743 = vst [vmem:[#allocation15_spill] sm:$0xff] %v7780_v55  ;;  %v7785_v11 = vpack.c.bf16 %v7780_v55, %v7768_v4  ;;  %v1097_v19 = vmul.f32 %v7746_v63, %v849_v8  ;;  %v1014_v4 = vpop.f32.mrf.mxu1  ;;  %v1422_v12 = vmax.f32 %v1294_v52, 0.0 }
 0x22b   :  { %8744 = vst [vmem:[#allocation16_spill] sm:$0xff] %v7785_v11  ;;  %v1229_v22 = vadd.f32 %v7752_v3, %v1097_v19 }
 0x22d   :  { %v1357_v31 = vmax.f32 %v1229_v22, 0.0 }
 0x22f   :  { %v7790_v34 = vmax.f32 %v1357_v31, %v1421_v7  ;;  %v1163_v31 = vmul.f32 %v7746_v63, %v1014_v4 }
 0x230   :  { %v852_v59 = vpop.f32.mrf.mxu0 }
 0x231   :  { %8745 = vst [vmem:[#allocation17_spill] sm:$0xff] %v7790_v34  ;;  %v1098_v11 = vmul.f32 %v7746_v63, %v852_v59  ;;  %v1295_v7 = vadd.f32 %v7752_v3, %v1163_v31 }
 0x233   :  { %v1230_v1 = vadd.f32 %v7752_v3, %v1098_v11  ;;  %5748 = vmatmul.msk.bf16.gmra.mxu0 %vm516_vm1, %v7028_v57  ;;  %v1423_v52 = vmax.f32 %v1295_v7, 0.0  ;;  %v1164_v57 = vmul.f32 %v7746_v63, %v1017_v49 }
 0x235   :  { %v1358_v19 = vmax.f32 %v1230_v1, 0.0  ;;  %v1296_v1 = vadd.f32 %v7752_v3, %v1164_v57 }
 0x237   :  { %v7802_v22 = vmax.f32 %v1358_v19, %v1422_v12  ;;  %v7029_v12 = vld [vmem:[%s8706_s0 + $0x118] sm:$0xff]  ;;  %v1424_v7 = vmax.f32 %v1296_v1, 0.0 }
 0x238   :  { %v854_v61 = vpop.f32.mrf.mxu0 }
 0x239   :  { %8746 = vst [vmem:[#allocation18_spill] sm:$0xff] %v7802_v22  ;;  %v7807_v59 = vpack.c.bf16 %v7802_v22, %v7790_v34  ;;  %v1099_v8 = vmul.f32 %v7746_v63, %v854_v61 }
 0x23b   :  { %8747 = vst [vmem:[#allocation19_spill] sm:$0xff] %v7807_v59  ;;  %v1231_v11 = vadd.f32 %v7752_v3, %v1099_v8  ;;  %v1022_v59 = vpop.f32.mrf.mxu2 }
 0x23c   :  { %v1166_v1 = vmul.f32 %v7746_v63, %v1022_v59 }
 0x23d   :  { %v1359_v55 = vmax.f32 %v1231_v11, 0.0 }
 0x23f   :  { %v7812_v4 = vmax.f32 %v1359_v55, %v1423_v52  ;;  %v1165_v55 = vmul.f32 %v7746_v63, %v1019_v43 }
 0x240   :  { %v857_v31 = vpop.f32.mrf.mxu0 }
 0x241   :  { %8748 = vst [vmem:[#allocation20_spill] sm:$0xff] %v7812_v4  ;;  %v1100_v19 = vmul.f32 %v7746_v63, %v857_v31  ;;  %v1297_v52 = vadd.f32 %v7752_v3, %v1165_v55 }
 0x243   :  { %v1232_v8 = vadd.f32 %v7752_v3, %v1100_v19  ;;  %5749 = vmatmul.msk.bf16.gmra.mxu0 %vm516_vm1, %v7029_v12  ;;  %v1425_v19 = vmax.f32 %v1297_v52, 0.0  ;;  %v1024_v12 = vpop.f32.mrf.mxu2 }
 0x245   :  { %v1360_v49 = vmax.f32 %v1232_v8, 0.0  ;;  %v1298_v8 = vadd.f32 %v7752_v3, %v1166_v1 }
 0x247   :  { %v7824_v11 = vmax.f32 %v1360_v49, %v1424_v7  ;;  %v7030_v7 = vld [vmem:[%s8706_s0 + $0x120] sm:$0xff]  ;;  %v1426_v52 = vmax.f32 %v1298_v8, 0.0 }
 0x248   :  { %v859_v57 = vpop.f32.mrf.mxu0 }
 0x249   :  { %8749 = vst [vmem:[#allocation21_spill] sm:$0xff] %v7824_v11  ;;  %v7829_v31 = vpack.c.bf16 %v7824_v11, %v7812_v4  ;;  %v1101_v61 = vmul.f32 %v7746_v63, %v859_v57 }
 0x24b   :  { %8750 = vst [vmem:[#allocation22_spill] sm:$0xff] %v7829_v31  ;;  %v1233_v22 = vadd.f32 %v7752_v3, %v1101_v61  ;;  %v1027_v59 = vpop.f32.mrf.mxu2 }
 0x24d   :  { %v1361_v34 = vmax.f32 %v1233_v22, 0.0 }
 0x24f   :  { %v7834_v43 = vmax.f32 %v1361_v34, %v1425_v19  ;;  %v1167_v34 = vmul.f32 %v7746_v63, %v1024_v12 }
 0x250   :  { %v862_v55 = vpop.f32.mrf.mxu0 }
 0x251   :  { %8751 = vst [vmem:[#allocation23_spill] sm:$0xff] %v7834_v43  ;;  %v1102_v49 = vmul.f32 %v7746_v63, %v862_v55  ;;  %v1299_v1 = vadd.f32 %v7752_v3, %v1167_v34  ;;  %v7062_v34 = vld [vmem:[%s8710_s4 + $0x18] sm:$0xff] }
 0x252   :  { %1993 = vmatpush.bf16.msrb.mxu2 %v7062_v34 }
 0x253   :  { %v1234_v61 = vadd.f32 %v7752_v3, %v1102_v49  ;;  %5750 = vmatmul.msk.bf16.gmra.mxu0 %vm516_vm1, %v7030_v7  ;;  %v1427_v8 = vmax.f32 %v1299_v1, 0.0  ;;  %v1168_v7 = vmul.f32 %v7746_v63, %v1027_v59  ;;  %v1032_v1 = vpop.f32.mrf.mxu3 }
 0x255   :  { %v1362_v22 = vmax.f32 %v1234_v61, 0.0  ;;  %v1300_v61 = vadd.f32 %v7752_v3, %v1168_v7 }
 0x257   :  { %v7846_v19 = vmax.f32 %v1362_v22, %v1426_v52  ;;  %v7031_v52 = vld [vmem:[%s8706_s0 + $0x128] sm:$0xff]  ;;  %v1029_v22 = vpop.f32.mrf.mxu2 }
 0x258   :  { %v864_v31 = vpop.f32.mrf.mxu0  ;;  %v1169_v7 = vmul.f32 %v7746_v63, %v1029_v22  ;;  %v1170_v22 = vmul.f32 %v7746_v63, %v1032_v1 }
 0x259   :  { %v7851_v55 = vpack.c.bf16 %v7846_v19, %v7834_v43  ;;  %v1103_v57 = vmul.f32 %v7746_v63, %v864_v31  ;;  %v7066_v31 = vld [vmem:[%s8710_s4 + $0x38] sm:$0xff] }
 0x25a   :  { %1704 = vmatpush.bf16.msrb.mxu1 %v7066_v31  ;;  %v1301_v4 = vadd.f32 %v7752_v3, %v1169_v7  ;;  %v7065_v7 = vld [vmem:[%s8710_s4 + $0x30] sm:$0xff] }
 0x25b   :  { %8752 = vst [vmem:[#allocation24_spill] sm:$0xff] %v7851_v55  ;;  %v1235_v49 = vadd.f32 %v7752_v3, %v1103_v57 }
 0x25d   :  { %v1363_v11 = vmax.f32 %v1235_v49, 0.0 }
 0x25e   :  { %1705 = vmatpush.bf16.msrb.mxu1 %v7065_v7  ;;  %v7059_v7 = vld [vmem:[%s8710_s4] sm:$0xff] }
 0x25f   :  { %v7856_v12 = vmax.f32 %v1363_v11, %v1427_v8  ;;  %v1428_v8 = vmax.f32 %v1300_v61, 0.0  ;;  %v7061_v61 = vld [vmem:[%s8710_s4 + $0x10] sm:$0xff] }
 0x260   :  { %v867_v57 = vpop.f32.mrf.mxu0  ;;  %1994 = vmatpush.bf16.msrb.mxu2 %v7061_v61 }
 0x261   :  { %v1104_v59 = vmul.f32 %v7746_v63, %v867_v57  ;;  %v1429_v57 = vmax.f32 %v1301_v4, 0.0  ;;  %v7070_v4 = vld [vmem:[%s8710_s4 + $0x58] sm:$0xff] }
 0x262   :  { %2199 = vmatpush.bf16.msrb.mxu3 %v7070_v4 }
 0x263   :  { %v1236_v49 = vadd.f32 %v7752_v3, %v1104_v59  ;;  %5751 = vmatmul.msk.bf16.gmra.mxu0 %vm516_vm1, %v7031_v52 }
 0x265   :  { %v1364_v55 = vmax.f32 %v1236_v49, 0.0 }
 0x267   :  { %v7874_v43 = vmax.f32 %v1364_v55, %v1428_v8  ;;  %v1034_v55 = vpop.f32.mrf.mxu3  ;;  %v1302_v8 = vadd.f32 %v7752_v3, %v1170_v22 }
 0x268   :  { %v869_v46 = vpop.f32.mrf.mxu0 }
 0x269   :  { %8753 = vst [vmem:[#allocation25_spill] sm:$0xff] %v7874_v43  ;;  %v7879_v34 = vpack.c.bf16 %v7874_v43, %v7856_v12  ;;  %v1105_v31 = vmul.f32 %v7746_v63, %v869_v46  ;;  %v7032_v46 = vld [vmem:[%s8706_s0 + $0x130] sm:$0xff]  ;;  %v1430_v22 = vmax.f32 %v1302_v8, 0.0  ;;  %v7067_v43 = vld [vmem:[%s8710_s4 + $0x40] sm:$0xff] }
 0x26b   :  { %8754 = vst [vmem:[#allocation26_spill] sm:$0xff] %v7879_v34  ;;  %v1237_v52 = vadd.f32 %v7752_v3, %v1105_v31 }
 0x26d   :  { %v1365_v59 = vmax.f32 %v1237_v52, 0.0  ;;  %v7060_v52 = vld [vmem:[%s8710_s4 + $0x8] sm:$0xff] }
 0x26e   :  { %1995 = vmatpush.bf16.msrb.mxu2 %v7060_v52 }
 0x26f   :  { %v7887_v49 = vmax.f32 %v1365_v59, %v1429_v57  ;;  %v1171_v59 = vmul.f32 %v7746_v63, %v1034_v55  ;;  %v1037_v34 = vpop.f32.mrf.mxu3  ;;  %v7069_v55 = vld [vmem:[%s8710_s4 + $0x50] sm:$0xff] }
 0x270   :  { %v872_v1 = vpop.f32.mrf.mxu0  ;;  %2200 = vmatpush.bf16.msrb.mxu3 %v7069_v55 }
 0x271   :  { %8755 = vst [vmem:[#allocation27_spill] sm:$0xff] %v7887_v49  ;;  %v1106_v31 = vmul.f32 %v7746_v63, %v872_v1  ;;  %v1303_v1 = vadd.f32 %v7752_v3, %v1171_v59 }
 0x272   :  { %1996 = vmatpush.bf16.msrb.mxu2 %v7059_v7 }
 0x273   :  { %v1238_v57 = vadd.f32 %v7752_v3, %v1106_v31  ;;  %5752 = vmatmul.msk.bf16.gmra.mxu0 %vm516_vm1, %v7032_v46  ;;  %v7064_v31 = vld [vmem:[%s8710_s4 + $0x28] sm:$0xff]  ;;  %v1431_v52 = vmax.f32 %v1303_v1, 0.0 }
 0x274   :  { %1706 = vmatpush.bf16.msrb.mxu1 %v7064_v31  ;;  %v7068_v1 = vld [vmem:[%s8710_s4 + $0x48] sm:$0xff] }
 0x275   :  { %v1366_v11 = vmax.f32 %v1238_v57, 0.0  ;;  %v1172_v57 = vmul.f32 %v7746_v63, %v1037_v34  ;;  %2201 = vmatpush.bf16.msrb.mxu3 %v7068_v1 }
 0x277   :  { %v7911_v4 = vmax.f32 %v1366_v11, %v1430_v22  ;;  %v1304_v7 = vadd.f32 %v7752_v3, %v1172_v57 }
 0x278   :  { %v874_v61 = vpop.f32.mrf.mxu0 }
 0x279   :  { %8756 = vst [vmem:[#allocation28_spill] sm:$0xff] %v7911_v4  ;;  %v7916_v8 = vpack.c.bf16 %v7911_v4, %v7887_v49  ;;  %v1107_v46 = vmul.f32 %v7746_v63, %v874_v61  ;;  %v7063_v61 = vld [vmem:[%s8710_s4 + $0x20] sm:$0xff]  ;;  %2202 = vmatpush.bf16.msrb.mxu3 %v7067_v43 }
 0x27a   :  { %1707 = vmatpush.bf16.msrb.mxu1 %v7063_v61 }
 0x27b   :  { %8757 = vst [vmem:[#allocation29_spill] sm:$0xff] %v7916_v8  ;;  %v1239_v11 = vadd.f32 %v7752_v3, %v1107_v46  ;;  %v7033_v8 = vld [vmem:[%s8706_s0 + $0x138] sm:$0xff]  ;;  %v1039_v46 = vpop.f32.mrf.mxu3 }
 0x27c   :  { %v1173_v57 = vmul.f32 %v7746_v63, %v1039_v46 }
 0x27d   :  { %v1367_v22 = vmax.f32 %v1239_v11, 0.0 }
 0x27e   :  { %v1305_v61 = vadd.f32 %v7752_v3, %v1173_v57 }
 0x27f   :  { %v7930_v59 = vmax.f32 %v1367_v22, %v1431_v52  ;;  %v1432_v52 = vmax.f32 %v1304_v7, 0.0 }
 0x280   :  { %v877_v34 = vpop.f32.mrf.mxu0  ;;  %v1433_v46 = vmax.f32 %v1305_v61, 0.0 }
 0x281   :  { %v1108_v55 = vmul.f32 %v7746_v63, %v877_v34 }
 0x283   :  { %v1240_v11 = vadd.f32 %v7752_v3, %v1108_v55  ;;  %5753 = vmatmul.msk.bf16.gmra.mxu0 %vm516_vm1, %v7033_v8  ;;  %v1046_v55 = vmul.f32 %v7746_v63, %v7522_v14 }
 0x285   :  { %v1368_v22 = vmax.f32 %v1240_v11, 0.0  ;;  %v1178_v57 = vadd.f32 %v7752_v3, %v1046_v55  ;;  %v7414_v55 = vmov 0.0  }
 0x287   :  { %v7948_v49 = vmax.f32 %v1368_v22, %v1432_v52  ;;  %v7034_v52 = vld [vmem:[%s8706_s0 + $0x140] sm:$0xff]  ;;  %v1306_v14 = vmax.f32 %v1178_v57, 0.0 }
 0x288   :  { %v879_v1 = vpop.f32.mrf.mxu0 }
 0x289   :  { %v7953_v34 = vpack.c.bf16 %v7948_v49, %v7930_v59  ;;  %v1109_v7 = vmul.f32 %v7746_v63, %v879_v1 }
 0x28b   :  { %8758 = vst [vmem:[#allocation30_spill] sm:$0xff] %v7953_v34  ;;  %v1241_v8 = vadd.f32 %v7752_v3, %v1109_v7  ;;  %v1047_v7 = vmul.f32 %v7746_v63, %v7525_v15 }
 0x28d   :  { %v1369_v11 = vmax.f32 %v1241_v8, 0.0  ;;  %v1179_v34 = vadd.f32 %v7752_v3, %v1047_v7 }
 0x28f   :  { %v7959_v31 = vmax.f32 %v1369_v11, %v1433_v46 }
 0x290   :  { %v882_v43 = vpop.f32.mrf.mxu0 }
 0x291   :  { %v1110_v22 = vmul.f32 %v7746_v63, %v882_v43 }
 0x293   :  { %v1242_v61 = vadd.f32 %v7752_v3, %v1110_v22  ;;  %5754 = vmatmul.msk.bf16.gmra.mxu0 %vm516_vm1, %v7034_v52  ;;  %v1307_v22 = vmax.f32 %v1179_v34, 0.0  ;;  %v1048_v52 = vmul.f32 %v7746_v63, %v7530_v17  ;;  %v1049_v17 = vmul.f32 %v7746_v63, %v7533_v18  ;;  %v7036_v18 = vld [vmem:[%s8706_s0 + $0x150] sm:$0xff] }
 0x295   :  { %v1370_v8 = vmax.f32 %v1242_v61, 0.0  ;;  %v7035_v61 = vld [vmem:[%s8706_s0 + $0x148] sm:$0xff]  ;;  %v1180_v7 = vadd.f32 %v7752_v3, %v1048_v52 }
 0x297   :  { %v1434_v46 = vmax.f32 %v1306_v14, %v1370_v8 }
 0x298   :  { %v884_v11 = vpop.f32.mrf.mxu0 }
 0x299   :  { %v1498_v4 = vpack.c.bf16 %v1434_v46, %v7414_v55  ;;  %v1111_v43 = vmul.f32 %v7746_v63, %v884_v11 }
 0x29b   :  { %v1243_v1 = vadd.f32 %v7752_v3, %v1111_v43  ;;  %5850 = vmatmul.msk.bf16.vlgmr.msrb.gmra.mxu2 %vm1603_vm2, %v1498_v4  ;;  %v1308_v4 = vmax.f32 %v1180_v7, 0.0 }
 0x29d   :  { %v1371_v57 = vmax.f32 %v1243_v1, 0.0 }
 0x29f   :  { %v1435_v15 = vmax.f32 %v1307_v22, %v1371_v57  ;;  %v1181_v22 = vadd.f32 %v7752_v3, %v1049_v17 }
 0x2a0   :  { %v887_v14 = vpop.f32.mrf.mxu0 }
 0x2a1   :  { %v1112_v8 = vmul.f32 %v7746_v63, %v887_v14  ;;  %v1538_v11 = vpack.c.bf16 %v1435_v15, %v1434_v46  ;;  %v1050_v14 = vmul.f32 %v7746_v63, %v7538_v20  ;;  %v1051_v20 = vmul.f32 %v7746_v63, %v7541_v21  ;;  %v7037_v21 = vld [vmem:[%s8706_s0 + $0x158] sm:$0xff] }
 0x2a3   :  { %v1244_v55 = vadd.f32 %v7752_v3, %v1112_v8  ;;  %5755 = vmatmul.msk.bf16.gmra.mxu0 %vm516_vm1, %v7035_v61  ;;  %5802 = vmatmul.msk.bf16.vlgmr.msrb.gmra.mxu1 %vm1603_vm2, %v1538_v11  ;;  %v1309_v61 = vmax.f32 %v1181_v22, 0.0 }
 0x2a5   :  { %v1372_v34 = vmax.f32 %v1244_v55, 0.0  ;;  %v1182_v55 = vadd.f32 %v7752_v3, %v1050_v14 }
 0x2a7   :  { %v1436_v1 = vmax.f32 %v1308_v4, %v1372_v34  ;;  %v1310_v34 = vmax.f32 %v1182_v55, 0.0 }
 0x2a8   :  { %v889_v43 = vpop.f32.mrf.mxu0 }
 0x2a9   :  { %v1113_v52 = vmul.f32 %v7746_v63, %v889_v43  ;;  %v1499_v57 = vpack.c.bf16 %v1436_v1, %v1435_v15 }
 0x2ab   :  { %v1245_v46 = vadd.f32 %v7752_v3, %v1113_v52  ;;  %5851 = vmatmul.msk.bf16.gmra.mxu2 %vm1603_vm2, %v1499_v57  ;;  %5906 = vmatmul.msk.bf16.vlgmr.msrb.gmra.mxu3 %vm1603_vm2, %v1499_v57  ;;  %v1183_v57 = vadd.f32 %v7752_v3, %v1051_v20 }
 0x2ad   :  { %v1373_v7 = vmax.f32 %v1245_v46, 0.0  ;;  %v1311_v14 = vmax.f32 %v1183_v57, 0.0 }
 0x2af   :  { %v1437_v8 = vmax.f32 %v1309_v61, %v1373_v7  ;;  %v1052_v7 = vmul.f32 %v7746_v63, %v7546_v23  ;;  %v1053_v23 = vmul.f32 %v7746_v63, %v7549_v24  ;;  %v7038_v24 = vld [vmem:[%s8706_s0 + $0x160] sm:$0xff] }
 0x2b0   :  { %v892_v11 = vpop.f32.mrf.mxu0 }
 0x2b1   :  { %v1114_v15 = vmul.f32 %v7746_v63, %v892_v11  ;;  %v1539_v4 = vpack.c.bf16 %v1437_v8, %v1436_v1  ;;  %v1185_v57 = vadd.f32 %v7752_v3, %v1053_v23 }
 0x2b3   :  { %v1246_v17 = vadd.f32 %v7752_v3, %v1114_v15  ;;  %5756 = vmatmul.msk.bf16.gmra.mxu0 %vm516_vm1, %v7036_v18  ;;  %5803 = vmatmul.msk.bf16.gmra.mxu1 %vm1603_vm2, %v1539_v4  ;;  %v1184_v15 = vadd.f32 %v7752_v3, %v1052_v7 }
 0x2b5   :  { %v1374_v43 = vmax.f32 %v1246_v17, 0.0 }
 0x2b7   :  { %v1438_v22 = vmax.f32 %v1310_v34, %v1374_v43  ;;  %v1312_v34 = vmax.f32 %v1184_v15, 0.0 }
 0x2b8   :  { %v894_v52 = vpop.f32.mrf.mxu0 }
 0x2b9   :  { %v1115_v46 = vmul.f32 %v7746_v63, %v894_v52  ;;  %v1500_v61 = vpack.c.bf16 %v1438_v22, %v1437_v8 }
 0x2bb   :  { %v1247_v1 = vadd.f32 %v7752_v3, %v1115_v46  ;;  %5852 = vmatmul.msk.bf16.gmra.mxu2 %vm1603_vm2, %v1500_v61  ;;  %5907 = vmatmul.msk.bf16.gmra.mxu3 %vm1603_vm2, %v1500_v61 }
 0x2bd   :  { %v1375_v18 = vmax.f32 %v1247_v1, 0.0  ;;  %v1313_v1 = vmax.f32 %v1185_v57, 0.0 }
 0x2bf   :  { %v1439_v11 = vmax.f32 %v1311_v14, %v1375_v18  ;;  %v1054_v14 = vmul.f32 %v7746_v63, %v7554_v26  ;;  %v1055_v26 = vmul.f32 %v7746_v63, %v7557_v27  ;;  %v7039_v27 = vld [vmem:[%s8706_s0 + $0x168] sm:$0xff] }
 0x2c0   :  { %v897_v55 = vpop.f32.mrf.mxu0 }
 0x2c1   :  { %v1116_v8 = vmul.f32 %v7746_v63, %v897_v55  ;;  %v1540_v4 = vpack.c.bf16 %v1439_v11, %v1438_v22  ;;  %v1186_v55 = vadd.f32 %v7752_v3, %v1054_v14 }
 0x2c3   :  { %v1248_v17 = vadd.f32 %v7752_v3, %v1116_v8  ;;  %5757 = vmatmul.msk.bf16.gmra.mxu0 %vm516_vm1, %v7037_v21  ;;  %5804 = vmatmul.msk.bf16.gmra.mxu1 %vm1603_vm2, %v1540_v4  ;;  %v1314_v4 = vmax.f32 %v1186_v55, 0.0 }
 0x2c5   :  { %v1376_v20 = vmax.f32 %v1248_v17, 0.0 }
 0x2c7   :  { %v1440_v43 = vmax.f32 %v1312_v34, %v1376_v20  ;;  %v1187_v20 = vadd.f32 %v7752_v3, %v1055_v26 }
 0x2c8   :  { %v899_v52 = vpop.f32.mrf.mxu0 }
 0x2c9   :  { %v1117_v46 = vmul.f32 %v7746_v63, %v899_v52  ;;  %v1501_v61 = vpack.c.bf16 %v1440_v43, %v1439_v11 }
 0x2cb   :  { %v1249_v22 = vadd.f32 %v7752_v3, %v1117_v46  ;;  %5853 = vmatmul.msk.bf16.gmra.mxu2 %vm1603_vm2, %v1501_v61  ;;  %5908 = vmatmul.msk.bf16.gmra.mxu3 %vm1603_vm2, %v1501_v61  ;;  %v1315_v46 = vmax.f32 %v1187_v20, 0.0  ;;  %v1056_v61 = vmul.f32 %v7746_v63, %v7562_v29  ;;  %v1057_v29 = vmul.f32 %v7746_v63, %v7565_v30  ;;  %v7086_v30 = vld [vmem:[#allocation3 + $0x78] sm:$0xff] }
 0x2cc   :  { %v1058_v20 = vmul.f32 %v7746_v63, %v7570_v32  ;;  %4950 = vmatpush.bf16.msra.mxu2 %v7086_v30 }
 0x2cd   :  { %v1377_v7 = vmax.f32 %v1249_v22, 0.0 }
 0x2cf   :  { %v1441_v18 = vmax.f32 %v1313_v1, %v1377_v7  ;;  %v1188_v7 = vadd.f32 %v7752_v3, %v1056_v61  ;;  %v1190_v61 = vadd.f32 %v7752_v3, %v1058_v20 }
 0x2d0   :  { %v902_v21 = vpop.f32.mrf.mxu0 }
 0x2d1   :  { %v1118_v11 = vmul.f32 %v7746_v63, %v902_v21  ;;  %v1541_v15 = vpack.c.bf16 %v1441_v18, %v1440_v43  ;;  %v1316_v55 = vmax.f32 %v1188_v7, 0.0  ;;  %v1318_v32 = vmax.f32 %v1190_v61, 0.0 }
 0x2d3   :  { %v1250_v8 = vadd.f32 %v7752_v3, %v1118_v11  ;;  %5758 = vmatmul.msk.bf16.gmra.mxu0 %vm516_vm1, %v7038_v24  ;;  %5805 = vmatmul.msk.bf16.gmra.mxu1 %vm1603_vm2, %v1541_v15 }
 0x2d5   :  { %v1378_v17 = vmax.f32 %v1250_v8, 0.0 }
 0x2d7   :  { %v1442_v34 = vmax.f32 %v1314_v4, %v1378_v17  ;;  %v1189_v4 = vadd.f32 %v7752_v3, %v1057_v29 }
 0x2d8   :  { %v904_v23 = vpop.f32.mrf.mxu0 }
 0x2d9   :  { %v1119_v52 = vmul.f32 %v7746_v63, %v904_v23  ;;  %v1502_v57 = vpack.c.bf16 %v1442_v34, %v1441_v18  ;;  %v1317_v23 = vmax.f32 %v1189_v4, 0.0 }
 0x2db   :  { %v1251_v43 = vadd.f32 %v7752_v3, %v1119_v52  ;;  %5854 = vmatmul.msk.bf16.gmra.mxu2 %vm1603_vm2, %v1502_v57  ;;  %5909 = vmatmul.msk.bf16.gmra.mxu3 %vm1603_vm2, %v1502_v57  ;;  %v7040_v57 = vld [vmem:[%s8706_s0 + $0x170] sm:$0xff] }
 0x2dd   :  { %v1379_v22 = vmax.f32 %v1251_v43, 0.0 }
 0x2df   :  { %v1443_v1 = vmax.f32 %v1315_v46, %v1379_v22 }
 0x2e0   :  { %v907_v14 = vpop.f32.mrf.mxu0 }
 0x2e1   :  { %v1120_v24 = vmul.f32 %v7746_v63, %v907_v14  ;;  %v1542_v18 = vpack.c.bf16 %v1443_v1, %v1442_v34  ;;  %v1059_v14 = vmul.f32 %v7746_v63, %v7573_v33  ;;  %v1060_v33 = vmul.f32 %v7746_v63, %v7578_v35 }
 0x2e3   :  { %v1252_v21 = vadd.f32 %v7752_v3, %v1120_v24  ;;  %5759 = vmatmul.msk.bf16.gmra.mxu0 %vm516_vm1, %v7039_v27  ;;  %5806 = vmatmul.msk.bf16.gmra.mxu1 %vm1603_vm2, %v1542_v18  ;;  %v7078_v18 = vld [vmem:[#allocation3 + $0x38] sm:$0xff]  ;;  %v1192_v20 = vadd.f32 %v7752_v3, %v1060_v33 }
 0x2e4   :  { %4937 = vmatpush.bf16.msra.mxu1 %v7078_v18 }
 0x2e5   :  { %v1380_v11 = vmax.f32 %v1252_v21, 0.0  ;;  %v1320_v35 = vmax.f32 %v1192_v20, 0.0 }
 0x2e7   :  { %v1444_v15 = vmax.f32 %v1316_v55, %v1380_v11  ;;  %v1191_v55 = vadd.f32 %v7752_v3, %v1059_v14 }
 0x2e8   :  { %v909_v8 = vpop.f32.mrf.mxu0 }
 0x2e9   :  { %v1121_v26 = vmul.f32 %v7746_v63, %v909_v8  ;;  %v1503_v17 = vpack.c.bf16 %v1444_v15, %v1443_v1  ;;  %v1319_v8 = vmax.f32 %v1191_v55, 0.0 }
 0x2eb   :  { %v1253_v34 = vadd.f32 %v7752_v3, %v1121_v26  ;;  %5855 = vmatmul.msk.bf16.gmra.mxu2 %vm1603_vm2, %v1503_v17  ;;  %5910 = vmatmul.msk.bf16.gmra.mxu3 %vm1603_vm2, %v1503_v17  ;;  %v7094_v26 = vld [vmem:[#allocation3 + $0xb8] sm:$0xff] }
 0x2ec   :  { %v7041_v17 = vld [vmem:[%s8706_s0 + $0x178] sm:$0xff]  ;;  %4963 = vmatpush.bf16.msra.mxu3 %v7094_v26 }
 0x2ed   :  { %v1381_v52 = vmax.f32 %v1253_v34, 0.0 }
 0x2ef   :  { %v1445_v43 = vmax.f32 %v1317_v23, %v1381_v52 }
 0x2f0   :  { %v912_v46 = vpop.f32.mrf.mxu0 }
 0x2f1   :  { %v1122_v22 = vmul.f32 %v7746_v63, %v912_v46  ;;  %v1543_v27 = vpack.c.bf16 %v1445_v43, %v1444_v15 }
 0x2f3   :  { %v1254_v1 = vadd.f32 %v7752_v3, %v1122_v22  ;;  %5760 = vmatmul.msk.bf16.gmra.mxu0 %vm516_vm1, %v7040_v57  ;;  %5807 = vmatmul.msk.bf16.gmra.mxu1 %vm1603_vm2, %v1543_v27 }
 0x2f5   :  { %v1382_v7 = vmax.f32 %v1254_v1, 0.0 }
 0x2f7   :  { %v1446_v24 = vmax.f32 %v1318_v32, %v1382_v7 }
 0x2f8   :  { %v914_v21 = vpop.f32.mrf.mxu0 }
 0x2f9   :  { %v1123_v29 = vmul.f32 %v7746_v63, %v914_v21  ;;  %v1504_v11 = vpack.c.bf16 %v1446_v24, %v1445_v43  ;;  %v1061_v43 = vmul.f32 %v7746_v63, %v7581_v36  ;;  %v7042_v36 = vld [vmem:[%s8706_s0 + $0x180] sm:$0xff] }
 0x2fb   :  { %v1255_v15 = vadd.f32 %v7752_v3, %v1123_v29  ;;  %5856 = vmatmul.msk.bf16.gmra.mxu2 %vm1603_vm2, %v1504_v11  ;;  %5911 = vmatmul.msk.bf16.gmra.mxu3 %vm1603_vm2, %v1504_v11  ;;  %v1193_v27 = vadd.f32 %v7752_v3, %v1061_v43  ;;  %v7043_v43 = vld [vmem:[%s8706_s0 + $0x188] sm:$0xff] }
 0x2fd   :  { %v1383_v4 = vmax.f32 %v1255_v15, 0.0  ;;  %v1321_v7 = vmax.f32 %v1193_v27, 0.0 }
 0x2ff   :  { %v1447_v34 = vmax.f32 %v1319_v8, %v1383_v4 }
 0x300   :  { %v917_v23 = vpop.f32.mrf.mxu0 }
 0x301   :  { %v1124_v52 = vmul.f32 %v7746_v63, %v917_v23  ;;  %v1544_v30 = vpack.c.bf16 %v1447_v34, %v1446_v24  ;;  %v1062_v24 = vmul.f32 %v7746_v63, %v7586_v38  ;;  %v1063_v38 = vmul.f32 %v7746_v63, %v7589_v39 }
 0x303   :  { %v1256_v57 = vadd.f32 %v7752_v3, %v1124_v52  ;;  %5761 = vmatmul.msk.bf16.gmra.mxu0 %vm516_vm1, %v7041_v17  ;;  %5808 = vmatmul.msk.bf16.gmra.mxu1 %vm1603_vm2, %v1544_v30  ;;  %v1194_v29 = vadd.f32 %v7752_v3, %v1062_v24 }
 0x305   :  { %v1384_v46 = vmax.f32 %v1256_v57, 0.0  ;;  %v1322_v33 = vmax.f32 %v1194_v29, 0.0  ;;  %v1064_v57 = vmul.f32 %v7746_v63, %v7594_v41 }
 0x307   :  { %v1448_v61 = vmax.f32 %v1320_v35, %v1384_v46  ;;  %v1196_v27 = vadd.f32 %v7752_v3, %v1064_v57 }
 0x308   :  { %v919_v22 = vpop.f32.mrf.mxu0 }
 0x309   :  { %v1125_v1 = vmul.f32 %v7746_v63, %v919_v22  ;;  %v1505_v32 = vpack.c.bf16 %v1448_v61, %v1447_v34  ;;  %v1195_v34 = vadd.f32 %v7752_v3, %v1063_v38  ;;  %v1324_v41 = vmax.f32 %v1196_v27, 0.0 }
 0x30b   :  { %v1257_v14 = vadd.f32 %v7752_v3, %v1125_v1  ;;  %5857 = vmatmul.msk.bf16.gmra.mxu2 %vm1603_vm2, %v1505_v32  ;;  %5912 = vmatmul.msk.bf16.gmra.mxu3 %vm1603_vm2, %v1505_v32  ;;  %v1323_v30 = vmax.f32 %v1195_v34, 0.0 }
 0x30d   :  { %v1385_v18 = vmax.f32 %v1257_v14, 0.0 }
 0x30f   :  { %v1449_v21 = vmax.f32 %v1321_v7, %v1385_v18  ;;  %v1065_v7 = vmul.f32 %v7746_v63, %v7597_v42  ;;  %v1066_v42 = vmul.f32 %v7746_v63, %v7602_v44  ;;  %v7044_v44 = vld [vmem:[%s8706_s0 + $0x190] sm:$0xff] }
 0x310   :  { %v922_v55 = vpop.f32.mrf.mxu0 }
 0x311   :  { %v1126_v11 = vmul.f32 %v7746_v63, %v922_v55  ;;  %v1545_v15 = vpack.c.bf16 %v1449_v21, %v1448_v61  ;;  %v1197_v29 = vadd.f32 %v7752_v3, %v1065_v7 }
 0x313   :  { %v1258_v8 = vadd.f32 %v7752_v3, %v1126_v11  ;;  %5762 = vmatmul.msk.bf16.gmra.mxu0 %vm516_vm1, %v7042_v36  ;;  %5809 = vmatmul.msk.bf16.gmra.mxu1 %vm1603_vm2, %v1545_v15 }
 0x315   :  { %v1386_v4 = vmax.f32 %v1258_v8, 0.0 }
 0x317   :  { %v1450_v26 = vmax.f32 %v1322_v33, %v1386_v4  ;;  %v1325_v33 = vmax.f32 %v1197_v29, 0.0 }
 0x318   :  { %v924_v17 = vpop.f32.mrf.mxu0 }
 0x319   :  { %v1127_v23 = vmul.f32 %v7746_v63, %v924_v17  ;;  %v1506_v20 = vpack.c.bf16 %v1450_v26, %v1449_v21 }
 0x31b   :  { %v1259_v52 = vadd.f32 %v7752_v3, %v1127_v23  ;;  %5858 = vmatmul.msk.bf16.gmra.mxu2 %vm1603_vm2, %v1506_v20  ;;  %5913 = vmatmul.msk.bf16.gmra.mxu3 %vm1603_vm2, %v1506_v20 }
 0x31d   :  { %v1387_v35 = vmax.f32 %v1259_v52, 0.0  ;;  %v8143_v52 = vld [vmem:[%s8712_s6] ss:$0 sm:$0xff] }
 0x31e   :  { %v1998_v39 = vpop.f32.mrf.mxu2 }
 0x31f   :  { %v1451_v46 = vmax.f32 %v1323_v30, %v1387_v35  ;;  %v7085_v30 = vld [vmem:[#allocation3 + $0x70] sm:$0xff] }
 0x320   :  { %v927_v61 = vpop.f32.mrf.mxu0  ;;  %v1709_v22 = vpop.f32.mrf.mxu1  ;;  %4951 = vmatpush.bf16.msra.mxu2 %v7085_v30 }
 0x321   :  { %v1128_v1 = vmul.f32 %v7746_v63, %v927_v61  ;;  %v1546_v32 = vpack.c.bf16 %v1451_v46, %v1450_v26  ;;  %v1999_v38 = vadd.f32 %v1998_v39, %v1709_v22  ;;  %v8138_v26 = vld [vmem:[%s8711_s5] ss:$0 sm:$0xff]  ;;  %v1198_v39 = vadd.f32 %v7752_v3, %v1066_v42 }
 0x323   :  { %v1260_v14 = vadd.f32 %v7752_v3, %v1128_v1  ;;  %5763 = vmatmul.msk.bf16.gmra.mxu0 %vm516_vm1, %v7043_v43  ;;  %5810 = vmatmul.msk.bf16.gmra.mxu1 %vm1603_vm2, %v1546_v32  ;;  %v1326_v1 = vmax.f32 %v1198_v39, 0.0  ;;  %v1067_v32 = vmul.f32 %v7746_v63, %v7605_v45 }
 0x325   :  { %v1388_v24 = vmax.f32 %v1260_v14, 0.0 }
 0x326   :  { %v8124_v18 = vpop.f32.mrf.mxu2 }
 0x327   :  { %v1452_v36 = vmax.f32 %v1324_v41, %v1388_v24 }
 0x328   :  { %v929_v21 = vpop.f32.mrf.mxu0  ;;  %v8126_v55 = vpop.f32.mrf.mxu1 }
 0x329   :  { %v1129_v11 = vmul.f32 %v7746_v63, %v929_v21  ;;  %v1507_v15 = vpack.c.bf16 %v1452_v36, %v1451_v46 }
 0x32b   :  { %v1261_v8 = vadd.f32 %v7752_v3, %v1129_v11  ;;  %5859 = vmatmul.msk.bf16.gmra.mxu2 %vm1603_vm2, %v1507_v15  ;;  %5914 = vmatmul.msk.bf16.gmra.mxu3 %vm1603_vm2, %v1507_v15  ;;  %v1199_v11 = vadd.f32 %v7752_v3, %v1067_v32 }
 0x32d   :  { %v1389_v4 = vmax.f32 %v1261_v8, 0.0  ;;  %v1327_v45 = vmax.f32 %v1199_v11, 0.0 }
 0x32e   :  { %v2003_v17 = vpop.f32.mrf.mxu2  ;;  %v2204_v34 = vpop.f32.mrf.mxu3 }
 0x32f   :  { %v1453_v23 = vmax.f32 %v1325_v33, %v1389_v4  ;;  %v2364_v20 = vadd.f32 %v2204_v34, %v1999_v38  ;;  %v7077_v33 = vld [vmem:[#allocation3 + $0x30] sm:$0xff]  ;;  %v1068_v38 = vmul.f32 %v7746_v63, %v7610_v47 }
 0x330   :  { %v932_v57 = vpop.f32.mrf.mxu0  ;;  %v1714_v35 = vpop.f32.mrf.mxu1  ;;  %4938 = vmatpush.bf16.msra.mxu1 %v7077_v33  ;;  %v7093_v47 = vld [vmem:[#allocation3 + $0xb0] sm:$0xff] }
 0x331   :  { %v2432_v43 = vmul.f32 %v8138_v26, %v2364_v20  ;;  %v1130_v46 = vmul.f32 %v7746_v63, %v932_v57  ;;  %v1547_v61 = vpack.c.bf16 %v1453_v23, %v1452_v36  ;;  %v2004_v4 = vadd.f32 %v2003_v17, %v1714_v35  ;;  %v7045_v57 = vld [vmem:[%s8706_s0 + $0x198] sm:$0xff]  ;;  %4964 = vmatpush.bf16.msra.mxu3 %v7093_v47 }
 0x333   :  { %v2500_v22 = vadd.f32 %v8143_v52, %v2432_v43  ;;  %v1262_v27 = vadd.f32 %v7752_v3, %v1130_v46  ;;  %5764 = vmatmul.msk.bf16.gmra.mxu0 %vm516_vm1, %v7044_v44  ;;  %5811 = vmatmul.msk.bf16.gmra.mxu1 %vm1603_vm2, %v1547_v61  ;;  %v1200_v46 = vadd.f32 %v7752_v3, %v1068_v38 }
 0x335   :  { %v2564_v14 = vmax.f32 %v2500_v22, 0.0  ;;  %v1390_v41 = vmax.f32 %v1262_v27, 0.0  ;;  %v1328_v32 = vmax.f32 %v1200_v46, 0.0 }
 0x336   :  { %v2005_v7 = vpop.f32.mrf.mxu2  ;;  %v2206_v24 = vpop.f32.mrf.mxu3 }
 0x337   :  { %2628 = vst.msk [vmem:[#allocation2] sm:$0xff] %vm1603_vm2, %v2564_v14  ;;  %v1454_v36 = vmax.f32 %v1326_v1, %v1390_v41  ;;  %v1069_v1 = vmul.f32 %v7746_v63, %v7613_v48 }
 0x338   :  { %v934_v21 = vpop.f32.mrf.mxu0  ;;  %v1716_v29 = vpop.f32.mrf.mxu1 }
 0x339   :  { %v1508_v15 = vpack.c.bf16 %v1454_v36, %v1453_v23  ;;  %v1131_v8 = vmul.f32 %v7746_v63, %v934_v21  ;;  %v2006_v14 = vadd.f32 %v2005_v7, %v1716_v29 }
 0x33b   :  { %v1263_v42 = vadd.f32 %v7752_v3, %v1131_v8  ;;  %5860 = vmatmul.msk.bf16.gmra.mxu2 %vm1603_vm2, %v1508_v15  ;;  %5915 = vmatmul.msk.bf16.gmra.mxu3 %vm1603_vm2, %v1508_v15 }
 0x33d   :  { %v1391_v34 = vmax.f32 %v1263_v42, 0.0  ;;  %v1201_v42 = vadd.f32 %v7752_v3, %v1069_v1 }
 0x33e   :  { %v2008_v20 = vpop.f32.mrf.mxu2  ;;  %v2209_v44 = vpop.f32.mrf.mxu3 }
 0x33f   :  { %v1455_v30 = vmax.f32 %v1327_v45, %v1391_v34  ;;  %v2366_v23 = vadd.f32 %v2209_v44, %v2004_v4 }
 0x340   :  { %v937_v39 = vpop.f32.mrf.mxu0  ;;  %v1719_v43 = vpop.f32.mrf.mxu1 }
 0x341   :  { %v2434_v61 = vmul.f32 %v8138_v26, %v2366_v23  ;;  %v1132_v22 = vmul.f32 %v7746_v63, %v937_v39  ;;  %v1548_v27 = vpack.c.bf16 %v1455_v30, %v1454_v36  ;;  %v2001_v36 = vadd.f32 %v8124_v18, %v8126_v55  ;;  %v8184_v63 = vld [vmem:[%s8708_s2] ss:$0 sm:$0xff] }
 0x342   :  { %v8191_v18 = vld [vmem:[%s8709_s3] ss:$0 sm:$0xff]  ;;  %v1070_v34 = vmul.f32 %v8184_v63, %v7618_v50 }
 0x343   :  { %v2502_v17 = vadd.f32 %v8143_v52, %v2434_v61  ;;  %v1264_v35 = vadd.f32 %v7752_v3, %v1132_v22  ;;  %5765 = vmatmul.msk.bf16.gmra.mxu0 %vm516_vm1, %v7045_v57  ;;  %5812 = vmatmul.msk.bf16.gmra.mxu1 %vm1603_vm2, %v1548_v27  ;;  %v2365_v4 = vadd.f32 %v2206_v24, %v2001_v36  ;;  %v1329_v24 = vmax.f32 %v1201_v42, 0.0  ;;  %v7046_v27 = vld [vmem:[%s8706_s0 + $0x1a0] sm:$0xff] }
 0x344   :  { %v1202_v47 = vadd.f32 %v8191_v18, %v1070_v34  ;;  %v1072_v34 = vmul.f32 %v8184_v63, %v7626_v53 }
 0x345   :  { %v2566_v41 = vmax.f32 %v2502_v17, 0.0  ;;  %v1392_v21 = vmax.f32 %v1264_v35, 0.0  ;;  %v2433_v44 = vmul.f32 %v8138_v26, %v2365_v4 }
 0x346   :  { %v2010_v11 = vpop.f32.mrf.mxu2  ;;  %v2211_v15 = vpop.f32.mrf.mxu3 }
 0x347   :  { %2635 = vst.msk [vmem:[#allocation2 + $0x8] sm:$0xff] %vm1603_vm2, %v2566_v41  ;;  %v1456_v8 = vmax.f32 %v1328_v32, %v1392_v21  ;;  %v2367_v33 = vadd.f32 %v2211_v15, %v2006_v14  ;;  %v2501_v1 = vadd.f32 %v8143_v52, %v2433_v44  ;;  %v1330_v41 = vmax.f32 %v1202_v47, 0.0  ;;  %v7047_v47 = vld [vmem:[%s8706_s0 + $0x1a8] sm:$0xff] }
 0x348   :  { %v939_v45 = vpop.f32.mrf.mxu0  ;;  %v1721_v38 = vpop.f32.mrf.mxu1  ;;  %v1071_v21 = vmul.f32 %v8184_v63, %v7621_v51 }
 0x349   :  { %v1509_v48 = vpack.c.bf16 %v1456_v8, %v1455_v30  ;;  %v1133_v7 = vmul.f32 %v8184_v63, %v939_v45  ;;  %v2435_v29 = vmul.f32 %v8138_v26, %v2367_v33  ;;  %v2009_v30 = vadd.f32 %v2008_v20, %v1719_v43 }
 0x34a   :  { %v2011_v15 = vadd.f32 %v2010_v11, %v1721_v38  ;;  %v2565_v42 = vmax.f32 %v2501_v1, 0.0 }
 0x34b   :  { %v1265_v3 = vadd.f32 %v8191_v18, %v1133_v7  ;;  %5861 = vmatmul.msk.bf16.gmra.mxu2 %vm1603_vm2, %v1509_v48  ;;  %5916 = vmatmul.msk.bf16.gmra.mxu3 %vm1603_vm2, %v1509_v48  ;;  %v2503_v55 = vadd.f32 %v8143_v52, %v2435_v29 }
 0x34d   :  { %v1393_v23 = vmax.f32 %v1265_v3, 0.0  ;;  %v2567_v57 = vmax.f32 %v2503_v55, 0.0  ;;  %v1203_v3 = vadd.f32 %v8191_v18, %v1071_v21 }
 0x34e   :  { %v2013_v39 = vpop.f32.mrf.mxu2  ;;  %v2214_v46 = vpop.f32.mrf.mxu3 }
 0x34f   :  { %v1457_v61 = vmax.f32 %v1329_v24, %v1393_v23  ;;  %v2368_v22 = vadd.f32 %v2214_v46, %v2009_v30  ;;  %2637 = vrot.lane.b32.xlu0 %v2567_v57, %s7412_s22  ;;  %v1331_v44 = vmax.f32 %v1203_v3, 0.0 }
 0x350   :  { %v942_v17 = vpop.f32.mrf.mxu0  ;;  %v1724_v35 = vpop.f32.mrf.mxu1 }
 0x351   :  { %v2436_v50 = vmul.f32 %v8138_v26, %v2368_v22  ;;  %v1134_v20 = vmul.f32 %v8184_v63, %v942_v17  ;;  %v1549_v43 = vpack.c.bf16 %v1457_v61, %v1456_v8  ;;  %v2014_v30 = vadd.f32 %v2013_v39, %v1724_v35 }
 0x352   :  { %v1204_v17 = vadd.f32 %v8191_v18, %v1072_v34 }
 0x353   :  { %v2504_v32 = vadd.f32 %v8143_v52, %v2436_v50  ;;  %v1266_v14 = vadd.f32 %v8191_v18, %v1134_v20  ;;  %5766 = vmatmul.msk.bf16.gmra.mxu0 %vm516_vm1, %v7046_v27  ;;  %5813 = vmatmul.msk.bf16.gmra.mxu1 %vm1603_vm2, %v1549_v43 }
 0x355   :  { %v2568_v36 = vmax.f32 %v2504_v32, 0.0  ;;  %v1394_v33 = vmax.f32 %v1266_v14, 0.0  ;;  %v1332_v32 = vmax.f32 %v1204_v17, 0.0  ;;  %v1073_v14 = vmul.f32 %v8184_v63, %v7629_v54 }
 0x356   :  { %v2015_v45 = vpop.f32.mrf.mxu2  ;;  %v2216_v8 = vpop.f32.mrf.mxu3 }
 0x357   :  { %2641 = vst.msk [vmem:[#allocation2 + $0x10] sm:$0xff] %vm1603_vm2, %v2568_v36  ;;  %v1458_v4 = vmax.f32 %v1330_v41, %v1394_v33  ;;  %v2369_v48 = vadd.f32 %v2216_v8, %v2011_v15  ;;  %2630 = vrot.lane.b32.xlu0 %v2565_v42, %s7412_s22 }
 0x358   :  { %v944_v7 = vpop.f32.mrf.mxu0  ;;  %v1726_v29 = vpop.f32.mrf.mxu1 }
 0x359   :  { %v1510_v55 = vpack.c.bf16 %v1458_v4, %v1457_v61  ;;  %v1135_v24 = vmul.f32 %v8184_v63, %v944_v7  ;;  %v2437_v51 = vmul.f32 %v8138_v26, %v2369_v48  ;;  %v2016_v41 = vadd.f32 %v2015_v45, %v1726_v29 }
 0x35a   :  { %v1205_v7 = vadd.f32 %v8191_v18, %v1073_v14  ;;  %v1074_v29 = vmul.f32 %v8184_v63, %v7634_v56 }
 0x35b   :  { %v1267_v11 = vadd.f32 %v8191_v18, %v1135_v24  ;;  %5862 = vmatmul.msk.bf16.gmra.mxu2 %vm1603_vm2, %v1510_v55  ;;  %5917 = vmatmul.msk.bf16.gmra.mxu3 %vm1603_vm2, %v1510_v55  ;;  %v2505_v38 = vadd.f32 %v8143_v52, %v2437_v51 }
 0x35c   :  { %v1333_v51 = vmax.f32 %v1205_v7, 0.0 }
 0x35d   :  { %v1395_v23 = vmax.f32 %v1267_v11, 0.0  ;;  %v2569_v57 = vmax.f32 %v2505_v38, 0.0 }
 0x35e   :  { %v2018_v46 = vpop.f32.mrf.mxu2  ;;  %v2219_v61 = vpop.f32.mrf.mxu3 }
 0x35f   :  { %v1459_v22 = vmax.f32 %v1331_v44, %v1395_v23  ;;  %v2370_v27 = vadd.f32 %v2219_v61, %v2014_v30  ;;  %2643 = vrot.lane.b32.xlu1 %v2569_v57, %s7412_s22  ;;  %v7048_v61 = vld [vmem:[%s8706_s0 + $0x1b0] sm:$0xff] }
 0x360   :  { %v947_v50 = vpop.f32.mrf.mxu0  ;;  %v1729_v20 = vpop.f32.mrf.mxu1 }
 0x361   :  { %v1550_v43 = vpack.c.bf16 %v1459_v22, %v1458_v4  ;;  %v2438_v53 = vmul.f32 %v8138_v26, %v2370_v27  ;;  %v1136_v39 = vmul.f32 %v8184_v63, %v947_v50  ;;  %v2019_v11 = vadd.f32 %v2018_v46, %v1729_v20  ;;  %v7084_v50 = vld [vmem:[#allocation3 + $0x68] sm:$0xff] }
 0x362   :  { %4952 = vmatpush.bf16.msra.mxu2 %v7084_v50 }
 0x363   :  { %v2506_v35 = vadd.f32 %v8143_v52, %v2438_v53  ;;  %v1268_v1 = vadd.f32 %v8191_v18, %v1136_v39  ;;  %5767 = vmatmul.msk.bf16.gmra.mxu0 %vm516_vm1, %v7047_v47  ;;  %5814 = vmatmul.msk.bf16.gmra.mxu1 %vm1603_vm2, %v1550_v43  ;;  %v1075_v39 = vmul.f32 %v8184_v63, %v7641_v58 }
 0x365   :  { %v2570_v21 = vmax.f32 %v2506_v35, 0.0  ;;  %v1396_v15 = vmax.f32 %v1268_v1, 0.0 }
 0x366   :  { %v2020_v36 = vpop.f32.mrf.mxu2  ;;  %v2221_v33 = vpop.f32.mrf.mxu3 }
 0x367   :  { %2647 = vst.msk [vmem:[#allocation2 + $0x18] sm:$0xff] %vm1603_vm2, %v2570_v21  ;;  %v1460_v42 = vmax.f32 %v1332_v32, %v1396_v15  ;;  %v2371_v8 = vadd.f32 %v2221_v33, %v2016_v41 }
 0x368   :  { %v949_v4 = vpop.f32.mrf.mxu0  ;;  %v1731_v48 = vpop.f32.mrf.mxu1 }
 0x369   :  { %v1511_v3 = vpack.c.bf16 %v1460_v42, %v1459_v22  ;;  %v1137_v55 = vmul.f32 %v8184_v63, %v949_v4  ;;  %v2439_v24 = vmul.f32 %v8138_v26, %v2371_v8  ;;  %v1206_v22 = vadd.f32 %v8191_v18, %v1074_v29 }
 0x36a   :  { %v2021_v35 = vadd.f32 %v2020_v36, %v1731_v48  ;;  %v1207_v8 = vadd.f32 %v8191_v18, %v1075_v39  ;;  %v1076_v48 = vmul.f32 %v8184_v63, %v7646_v60 }
 0x36b   :  { %v1269_v54 = vadd.f32 %v8191_v18, %v1137_v55  ;;  %5863 = vmatmul.msk.bf16.gmra.mxu2 %vm1603_vm2, %v1511_v3  ;;  %5918 = vmatmul.msk.bf16.gmra.mxu3 %vm1603_vm2, %v1511_v3  ;;  %v2507_v45 = vadd.f32 %v8143_v52, %v2439_v24  ;;  %v1334_v53 = vmax.f32 %v1206_v22, 0.0  ;;  %v7076_v55 = vld [vmem:[#allocation3 + $0x28] sm:$0xff] }
 0x36c   :  { %4939 = vmatpush.bf16.msra.mxu1 %v7076_v55  ;;  %v1335_v24 = vmax.f32 %v1207_v8, 0.0 }
 0x36d   :  { %v1397_v38 = vmax.f32 %v1269_v54, 0.0  ;;  %v2571_v34 = vmax.f32 %v2507_v45, 0.0 }
 0x36e   :  { %v2023_v44 = vpop.f32.mrf.mxu2  ;;  %v2224_v30 = vpop.f32.mrf.mxu3 }
 0x36f   :  { %v1461_v23 = vmax.f32 %v1333_v51, %v1397_v38  ;;  %v2372_v57 = vadd.f32 %v2224_v30, %v2019_v11  ;;  %2649 = vrot.lane.b32.xlu2 %v2571_v34, %s7412_s22  ;;  %v7049_v30 = vld [vmem:[%s8706_s0 + $0x1b8] sm:$0xff] }
 0x370   :  { %v952_v27 = vpop.f32.mrf.mxu0  ;;  %v1734_v47 = vpop.f32.mrf.mxu1 }
 0x371   :  { %v1551_v17 = vpack.c.bf16 %v1461_v23, %v1460_v42  ;;  %v2440_v56 = vmul.f32 %v8138_v26, %v2372_v57  ;;  %v1138_v46 = vmul.f32 %v8184_v63, %v952_v27  ;;  %v2024_v54 = vadd.f32 %v2023_v44, %v1734_v47  ;;  %v7092_v27 = vld [vmem:[#allocation3 + $0xa8] sm:$0xff] }
 0x372   :  { %4965 = vmatpush.bf16.msra.mxu3 %v7092_v27 }
 0x373   :  { %v2508_v20 = vadd.f32 %v8143_v52, %v2440_v56  ;;  %v1270_v43 = vadd.f32 %v8191_v18, %v1138_v46  ;;  %5768 = vmatmul.msk.bf16.gmra.mxu0 %vm516_vm1, %v7048_v61  ;;  %5815 = vmatmul.msk.bf16.gmra.mxu1 %vm1603_vm2, %v1551_v17  ;;  %v1077_v46 = vmul.f32 %v8184_v63, %v7653_v62 }
 0x375   :  { %v2572_v1 = vmax.f32 %v2508_v20, 0.0  ;;  %v1398_v32 = vmax.f32 %v1270_v43, 0.0 }
 0x376   :  { %v2025_v14 = vpop.f32.mrf.mxu2  ;;  %v2226_v41 = vpop.f32.mrf.mxu3 }
 0x377   :  { %2653 = vst.msk [vmem:[#allocation2 + $0x20] sm:$0xff] %vm1603_vm2, %v2572_v1  ;;  %v1462_v21 = vmax.f32 %v1334_v53, %v1398_v32  ;;  %v2373_v15 = vadd.f32 %v2226_v41, %v2021_v35 }
 0x378   :  { %v954_v33 = vpop.f32.mrf.mxu0  ;;  %v1736_v42 = vpop.f32.mrf.mxu1 }
 0x379   :  { %v1512_v4 = vpack.c.bf16 %v1462_v21, %v1461_v23  ;;  %v2441_v7 = vmul.f32 %v8138_v26, %v2373_v15  ;;  %v1139_v3 = vmul.f32 %v8184_v63, %v954_v33  ;;  %v1208_v23 = vadd.f32 %v8191_v18, %v1076_v48 }
 0x37a   :  { %v2026_v50 = vadd.f32 %v2025_v14, %v1736_v42  ;;  %v1078_v42 = vmul.f32 %v8184_v63, %v7658_v0 }
 0x37b   :  { %v1271_v58 = vadd.f32 %v8191_v18, %v1139_v3  ;;  %5864 = vmatmul.msk.bf16.gmra.mxu2 %vm1603_vm2, %v1512_v4  ;;  %5919 = vmatmul.msk.bf16.gmra.mxu3 %vm1603_vm2, %v1512_v4  ;;  %v2509_v36 = vadd.f32 %v8143_v52, %v2441_v7  ;;  %v1336_v56 = vmax.f32 %v1208_v23, 0.0  ;;  %v1079_v23 = vmul.f32 %v8184_v63, %v7665_v2 }
 0x37d   :  { %v1399_v45 = vmax.f32 %v1271_v58, 0.0  ;;  %v2573_v29 = vmax.f32 %v2509_v36, 0.0 }
 0x37e   :  { %v2028_v51 = vpop.f32.mrf.mxu2  ;;  %v2229_v11 = vpop.f32.mrf.mxu3 }
 0x37f   :  { %v1463_v38 = vmax.f32 %v1335_v24, %v1399_v45  ;;  %v2374_v34 = vadd.f32 %v2229_v11, %v2024_v54  ;;  %2655 = vrot.lane.b32.xlu1 %v2573_v29, %s7412_s22  ;;  %v1210_v54 = vadd.f32 %v8191_v18, %v1078_v42 }
 0x380   :  { %v957_v57 = vpop.f32.mrf.mxu0  ;;  %v1739_v61 = vpop.f32.mrf.mxu1 }
 0x381   :  { %v1552_v60 = vpack.c.bf16 %v1463_v38, %v1462_v21  ;;  %v2442_v22 = vmul.f32 %v8138_v26, %v2374_v34  ;;  %v1140_v44 = vmul.f32 %v8184_v63, %v957_v57  ;;  %v1209_v21 = vadd.f32 %v8191_v18, %v1077_v46 }
 0x382   :  { %v2029_v7 = vadd.f32 %v2028_v51, %v1739_v61  ;;  %v1211_v46 = vadd.f32 %v8191_v18, %v1079_v23 }
 0x383   :  { %v2510_v47 = vadd.f32 %v8143_v52, %v2442_v22  ;;  %v1272_v17 = vadd.f32 %v8191_v18, %v1140_v44  ;;  %5769 = vmatmul.msk.bf16.gmra.mxu0 %vm516_vm1, %v7049_v30  ;;  %5816 = vmatmul.msk.bf16.gmra.mxu1 %vm1603_vm2, %v1552_v60  ;;  %v1337_v4 = vmax.f32 %v1209_v21, 0.0  ;;  %v1338_v30 = vmax.f32 %v1210_v54, 0.0 }
 0x385   :  { %v2574_v20 = vmax.f32 %v2510_v47, 0.0  ;;  %v1400_v43 = vmax.f32 %v1272_v17, 0.0 }
 0x386   :  { %v2030_v53 = vpop.f32.mrf.mxu2  ;;  %v2231_v39 = vpop.f32.mrf.mxu3 }
 0x387   :  { %2659 = vst.msk [vmem:[#allocation2 + $0x28] sm:$0xff] %vm1603_vm2, %v2574_v20  ;;  %v1464_v35 = vmax.f32 %v1336_v56, %v1400_v43  ;;  %v2375_v1 = vadd.f32 %v2231_v39, %v2026_v50  ;;  %v1080_v39 = vmul.f32 %v8184_v63, %v7674_v5 }
 0x388   :  { %v959_v32 = vpop.f32.mrf.mxu0  ;;  %v1741_v41 = vpop.f32.mrf.mxu1 }
 0x389   :  { %v1513_v15 = vpack.c.bf16 %v1464_v35, %v1463_v38  ;;  %v2443_v33 = vmul.f32 %v8138_v26, %v2375_v1  ;;  %v1141_v8 = vmul.f32 %v8184_v63, %v959_v32  ;;  %v2031_v57 = vadd.f32 %v2030_v53, %v1741_v41 }
 0x38b   :  { %v1273_v62 = vadd.f32 %v8191_v18, %v1141_v8  ;;  %5865 = vmatmul.msk.bf16.gmra.mxu2 %vm1603_vm2, %v1513_v15  ;;  %5920 = vmatmul.msk.bf16.gmra.mxu3 %vm1603_vm2, %v1513_v15  ;;  %v2511_v14 = vadd.f32 %v8143_v52, %v2443_v33 }
 0x38d   :  { %v1401_v3 = vmax.f32 %v1273_v62, 0.0  ;;  %v2575_v55 = vmax.f32 %v2511_v14, 0.0  ;;  %v1212_v62 = vadd.f32 %v8191_v18, %v1080_v39 }
 0x38e   :  { %v2033_v58 = vpop.f32.mrf.mxu2  ;;  %v2234_v36 = vpop.f32.mrf.mxu3 }
 0x38f   :  { %v1465_v48 = vmax.f32 %v1337_v4, %v1401_v3  ;;  %v2376_v24 = vadd.f32 %v2234_v36, %v2029_v7  ;;  %2661 = vrot.lane.b32.xlu2 %v2575_v55, %s7412_s22  ;;  %v1081_v36 = vmul.f32 %v8184_v63, %v7677_v6 }
 0x390   :  { %v962_v45 = vpop.f32.mrf.mxu0  ;;  %v1744_v29 = vpop.f32.mrf.mxu1 }
 0x391   :  { %v1553_v11 = vpack.c.bf16 %v1465_v48, %v1464_v35  ;;  %v2444_v38 = vmul.f32 %v8138_v26, %v2376_v24  ;;  %v1142_v34 = vmul.f32 %v8184_v63, %v962_v45  ;;  %v1339_v35 = vmax.f32 %v1211_v46, 0.0 }
 0x392   :  { %v2034_v1 = vadd.f32 %v2033_v58, %v1744_v29  ;;  %v1340_v58 = vmax.f32 %v1212_v62, 0.0 }
 0x393   :  { %v2512_v0 = vadd.f32 %v8143_v52, %v2444_v38  ;;  %v1274_v51 = vadd.f32 %v8191_v18, %v1142_v34  ;;  %5817 = vmatmul.msk.bf16.gmra.mxu1 %vm1603_vm2, %v1553_v11 }
 0x395   :  { %v2576_v61 = vmax.f32 %v2512_v0, 0.0  ;;  %v1402_v60 = vmax.f32 %v1274_v51, 0.0  ;;  %v1213_v51 = vadd.f32 %v8191_v18, %v1081_v36 }
 0x396   :  { %v2035_v22 = vpop.f32.mrf.mxu2  ;;  %v2236_v44 = vpop.f32.mrf.mxu3 }
 0x397   :  { %2665 = vst.msk [vmem:[#allocation2 + $0x30] sm:$0xff] %vm1603_vm2, %v2576_v61  ;;  %v1466_v27 = vmax.f32 %v1338_v30, %v1402_v60  ;;  %v2377_v47 = vadd.f32 %v2236_v44, %v2031_v57  ;;  %v1082_v60 = vmul.f32 %v8184_v63, %v7686_v9  ;;  %v7083_v9 = vld [vmem:[#allocation3 + $0x60] sm:$0xff] }
 0x398   :  { %v964_v17 = vpop.f32.mrf.mxu0  ;;  %v1746_v56 = vpop.f32.mrf.mxu1  ;;  %4953 = vmatpush.bf16.msra.mxu2 %v7083_v9 }
 0x399   :  { %v1514_v50 = vpack.c.bf16 %v1466_v27, %v1465_v48  ;;  %v2445_v20 = vmul.f32 %v8138_v26, %v2377_v47  ;;  %v1143_v43 = vmul.f32 %v8184_v63, %v964_v17  ;;  %v2036_v48 = vadd.f32 %v2035_v22, %v1746_v56 }
 0x39a   :  { %v1341_v22 = vmax.f32 %v1213_v51, 0.0 }
 0x39b   :  { %v1275_v2 = vadd.f32 %v8191_v18, %v1143_v43  ;;  %5866 = vmatmul.msk.bf16.gmra.mxu2 %vm1603_vm2, %v1514_v50  ;;  %5921 = vmatmul.msk.bf16.gmra.mxu3 %vm1603_vm2, %v1514_v50  ;;  %v2513_v53 = vadd.f32 %v8143_v52, %v2445_v20  ;;  %v1214_v20 = vadd.f32 %v8191_v18, %v1082_v60 }
 0x39d   :  { %v1403_v32 = vmax.f32 %v1275_v2, 0.0  ;;  %v2577_v41 = vmax.f32 %v2513_v53, 0.0 }
 0x39e   :  { %v2038_v21 = vpop.f32.mrf.mxu2  ;;  %v2239_v15 = vpop.f32.mrf.mxu3 }
 0x39f   :  { %v1467_v33 = vmax.f32 %v1339_v35, %v1403_v32  ;;  %v2378_v8 = vadd.f32 %v2239_v15, %v2034_v1  ;;  %2667 = vrot.lane.b32.xlu1 %v2577_v41, %s7412_s22  ;;  %v1342_v41 = vmax.f32 %v1214_v20, 0.0 }
 0x3a0   :  { %v967_v14 = vpop.f32.mrf.mxu0  ;;  %v1749_v42 = vpop.f32.mrf.mxu1 }
 0x3a1   :  { %v1554_v4 = vpack.c.bf16 %v1467_v33, %v1466_v27  ;;  %v2446_v7 = vmul.f32 %v8138_v26, %v2378_v8  ;;  %v1144_v3 = vmul.f32 %v8184_v63, %v967_v14  ;;  %v2039_v44 = vadd.f32 %v2038_v21, %v1749_v42 }
 0x3a2   :  { %v1083_v21 = vmul.f32 %v8184_v63, %v7689_v10 }
 0x3a3   :  { %v2514_v5 = vadd.f32 %v8143_v52, %v2446_v7  ;;  %v1276_v55 = vadd.f32 %v8191_v18, %v1144_v3  ;;  %5818 = vmatmul.msk.bf16.gmra.mxu1 %vm1603_vm2, %v1554_v4 }
 0x3a5   :  { %v2578_v24 = vmax.f32 %v2514_v5, 0.0  ;;  %v1404_v54 = vmax.f32 %v1276_v55, 0.0  ;;  %v1215_v5 = vadd.f32 %v8191_v18, %v1083_v21 }
 0x3a6   :  { %v2040_v45 = vpop.f32.mrf.mxu2  ;;  %v2241_v29 = vpop.f32.mrf.mxu3 }
 0x3a7   :  { %2671 = vst.msk [vmem:[#allocation2 + $0x38] sm:$0xff] %vm1603_vm2, %v2578_v24  ;;  %v1468_v11 = vmax.f32 %v1340_v58, %v1404_v54  ;;  %v2379_v38 = vadd.f32 %v2241_v29, %v2036_v48  ;;  %v7075_v48 = vld [vmem:[#allocation3 + $0x20] sm:$0xff]  ;;  %v1084_v54 = vmul.f32 %v8184_v63, %v7698_v13 }
 0x3a8   :  { %v969_v34 = vpop.f32.mrf.mxu0  ;;  %v1751_v0 = vpop.f32.mrf.mxu1  ;;  %4940 = vmatpush.bf16.msra.mxu1 %v7075_v48 }
 0x3a9   :  { %v1515_v30 = vpack.c.bf16 %v1468_v11, %v1467_v33  ;;  %v2447_v23 = vmul.f32 %v8138_v26, %v2379_v38  ;;  %v1145_v57 = vmul.f32 %v8184_v63, %v969_v34  ;;  %v2041_v15 = vadd.f32 %v2040_v45, %v1751_v0 }
 0x3aa   :  { %v1343_v45 = vmax.f32 %v1215_v5, 0.0 }
 0x3ab   :  { %v1277_v6 = vadd.f32 %v8191_v18, %v1145_v57  ;;  %5867 = vmatmul.msk.bf16.gmra.mxu2 %vm1603_vm2, %v1515_v30  ;;  %5922 = vmatmul.msk.bf16.gmra.mxu3 %vm1603_vm2, %v1515_v30  ;;  %v2515_v61 = vadd.f32 %v8143_v52, %v2447_v23  ;;  %v1216_v23 = vadd.f32 %v8191_v18, %v1084_v54 }
 0x3ad   :  { %v1405_v27 = vmax.f32 %v1277_v6, 0.0  ;;  %v2579_v47 = vmax.f32 %v2515_v61, 0.0 }
 0x3ae   :  { %v2043_v17 = vpop.f32.mrf.mxu2  ;;  %v2244_v56 = vpop.f32.mrf.mxu3 }
 0x3af   :  { %v1469_v46 = vmax.f32 %v1341_v22, %v1405_v27  ;;  %v2380_v50 = vadd.f32 %v2244_v56, %v2039_v44  ;;  %2673 = vrot.lane.b32.xlu0 %v2579_v47, %s7412_s22  ;;  %v7091_v44 = vld [vmem:[#allocation3 + $0xa0] sm:$0xff]  ;;  %v1085_v56 = vmul.f32 %v8184_v63, %v7701_v16 }
 0x3b0   :  { %v972_v43 = vpop.f32.mrf.mxu0  ;;  %v1754_v2 = vpop.f32.mrf.mxu1  ;;  %4966 = vmatpush.bf16.msra.mxu3 %v7091_v44 }
 0x3b1   :  { %v1555_v53 = vpack.c.bf16 %v1469_v46, %v1468_v11  ;;  %v2448_v39 = vmul.f32 %v8138_v26, %v2380_v50  ;;  %v1146_v35 = vmul.f32 %v8184_v63, %v972_v43  ;;  %v2044_v29 = vadd.f32 %v2043_v17, %v1754_v2 }
 0x3b2   :  { %v1344_v17 = vmax.f32 %v1216_v23, 0.0 }
 0x3b3   :  { %v2516_v1 = vadd.f32 %v8143_v52, %v2448_v39  ;;  %v1278_v32 = vadd.f32 %v8191_v18, %v1146_v35  ;;  %5819 = vmatmul.msk.bf16.gmra.mxu1 %vm1603_vm2, %v1555_v53 }
 0x3b5   :  { %v2580_v33 = vmax.f32 %v2516_v1, 0.0  ;;  %v1406_v8 = vmax.f32 %v1278_v32, 0.0  ;;  %v1217_v1 = vadd.f32 %v8191_v18, %v1085_v56  ;;  %v1088_v56 = vmul.f32 %v8184_v63, %v7722_v37 }
 0x3b6   :  { %v2045_v62 = vpop.f32.mrf.mxu2  ;;  %v2246_v14 = vpop.f32.mrf.mxu3 }
 0x3b7   :  { %2677 = vst.msk [vmem:[#allocation2 + $0x40] sm:$0xff] %vm1603_vm2, %v2580_v33  ;;  %v1470_v42 = vmax.f32 %v1342_v41, %v1406_v8  ;;  %v2381_v4 = vadd.f32 %v2246_v14, %v2041_v15  ;;  %v1345_v14 = vmax.f32 %v1217_v1, 0.0 }
 0x3b8   :  { %v974_v7 = vpop.f32.mrf.mxu0  ;;  %v1756_v3 = vpop.f32.mrf.mxu1 }
 0x3b9   :  { %v1516_v55 = vpack.c.bf16 %v1470_v42, %v1469_v46  ;;  %v2449_v58 = vmul.f32 %v8138_v26, %v2381_v4  ;;  %v1147_v36 = vmul.f32 %v8184_v63, %v974_v7  ;;  %v2046_v46 = vadd.f32 %v2045_v62, %v1756_v3 }
 0x3ba   :  { %v1086_v62 = vmul.f32 %v8184_v63, %v7710_v25 }
 0x3bb   :  { %v1279_v10 = vadd.f32 %v8191_v18, %v1147_v36  ;;  %5868 = vmatmul.msk.bf16.gmra.mxu2 %vm1603_vm2, %v1516_v55  ;;  %5923 = vmatmul.msk.bf16.gmra.mxu3 %vm1603_vm2, %v1516_v55  ;;  %v2517_v24 = vadd.f32 %v8143_v52, %v2449_v58 }
 0x3bc   :  { %v1218_v36 = vadd.f32 %v8191_v18, %v1086_v62 }
 0x3bd   :  { %v1407_v11 = vmax.f32 %v1279_v10, 0.0  ;;  %v2581_v38 = vmax.f32 %v2517_v24, 0.0 }
 0x3be   :  { %v2048_v34 = vpop.f32.mrf.mxu2  ;;  %v2249_v0 = vpop.f32.mrf.mxu3 }
 0x3bf   :  { %v1471_v51 = vmax.f32 %v1343_v45, %v1407_v11  ;;  %v2382_v30 = vadd.f32 %v2249_v0, %v2044_v29  ;;  %2679 = vrot.lane.b32.xlu2 %v2581_v38, %s7412_s22  ;;  %v1346_v38 = vmax.f32 %v1218_v36, 0.0 }
 0x3c0   :  { %v977_v57 = vpop.f32.mrf.mxu0  ;;  %v1759_v6 = vpop.f32.mrf.mxu1 }
 0x3c1   :  { %v1556_v61 = vpack.c.bf16 %v1471_v51, %v1470_v42  ;;  %v2450_v60 = vmul.f32 %v8138_v26, %v2382_v30  ;;  %v1148_v13 = vmul.f32 %v8184_v63, %v977_v57  ;;  %v2638_v22 = vpop.permute.xlu0 %2637  ;;  %v2049_v42 = vadd.f32 %v2048_v34, %v1759_v6 }
 0x3c2   :  { %2640 = vst.msk [vmem:[#allocation2 + $0x8] sm:$0xff] %vm2633_vm3, %v2638_v22  ;;  %v1087_v34 = vmul.f32 %v8184_v63, %v7713_v28 }
 0x3c3   :  { %v2518_v27 = vadd.f32 %v8143_v52, %v2450_v60  ;;  %v1280_v47 = vadd.f32 %v8191_v18, %v1148_v13  ;;  %5820 = vmatmul.msk.bf16.gmra.mxu1 %vm1603_vm2, %v1556_v61 }
 0x3c4   :  { %v1219_v22 = vadd.f32 %v8191_v18, %v1087_v34 }
 0x3c5   :  { %v2582_v50 = vmax.f32 %v2518_v27, 0.0  ;;  %v1408_v20 = vmax.f32 %v1280_v47, 0.0 }
 0x3c6   :  { %v2050_v43 = vpop.f32.mrf.mxu2  ;;  %v2251_v2 = vpop.f32.mrf.mxu3 }
 0x3c7   :  { %2683 = vst.msk [vmem:[#allocation2 + $0x48] sm:$0xff] %vm1603_vm2, %v2582_v50  ;;  %v1472_v53 = vmax.f32 %v1344_v17, %v1408_v20  ;;  %v2383_v39 = vadd.f32 %v2251_v2, %v2046_v46  ;;  %v1347_v46 = vmax.f32 %v1219_v22, 0.0 }
 0x3c8   :  { %v979_v35 = vpop.f32.mrf.mxu0  ;;  %v1761_v9 = vpop.f32.mrf.mxu1 }
 0x3c9   :  { %v1517_v32 = vpack.c.bf16 %v1472_v53, %v1471_v51  ;;  %v2451_v41 = vmul.f32 %v8138_v26, %v2383_v39  ;;  %v1149_v21 = vmul.f32 %v8184_v63, %v979_v35  ;;  %v2631_v15 = vpop.permute.xlu0 %2630  ;;  %v2650_v16 = vpop.permute.xlu2 %2649  ;;  %v2051_v0 = vadd.f32 %v2050_v43, %v1761_v9 }
 0x3ca   :  { %2634 = vst.msk [vmem:[#allocation2] sm:$0xff] %vm2633_vm3, %v2631_v15  ;;  %v1220_v9 = vadd.f32 %v8191_v18, %v1088_v56 }
 0x3cb   :  { %v1281_v33 = vadd.f32 %v8191_v18, %v1149_v21  ;;  %2652 = vst.msk [vmem:[#allocation2 + $0x18] sm:$0xff] %vm2633_vm3, %v2650_v16  ;;  %5869 = vmatmul.msk.bf16.gmra.mxu2 %vm1603_vm2, %v1517_v32  ;;  %5924 = vmatmul.msk.bf16.gmra.mxu3 %vm1603_vm2, %v1517_v32  ;;  %v2519_v8 = vadd.f32 %v8143_v52, %v2451_v41 }
 0x3cd   :  { %v1409_v4 = vmax.f32 %v1281_v33, 0.0  ;;  %v2583_v7 = vmax.f32 %v2519_v8, 0.0  ;;  %v1348_v33 = vmax.f32 %v1220_v9, 0.0  ;;  %v1089_v8 = vmul.f32 %v8184_v63, %v7725_v40 }
 0x3ce   :  { %v2053_v3 = vpop.f32.mrf.mxu2  ;;  %v2254_v5 = vpop.f32.mrf.mxu3 }
 0x3cf   :  { %v1473_v55 = vmax.f32 %v1345_v14, %v1409_v4  ;;  %v2384_v58 = vadd.f32 %v2254_v5, %v2049_v42  ;;  %2685 = vrot.lane.b32.xlu1 %v2583_v7, %s7412_s22  ;;  %v1221_v36 = vadd.f32 %v8191_v18, %v1089_v8 }
 0x3d0   :  { %v982_v48 = vpop.f32.mrf.mxu0  ;;  %v1764_v10 = vpop.f32.mrf.mxu1 }
 0x3d1   :  { %v1557_v24 = vpack.c.bf16 %v1473_v55, %v1472_v53  ;;  %v2452_v54 = vmul.f32 %v8138_v26, %v2384_v58  ;;  %v1150_v45 = vmul.f32 %v8184_v63, %v982_v48  ;;  %v2644_v25 = vpop.permute.xlu1 %2643  ;;  %v2054_v50 = vadd.f32 %v2053_v3, %v1764_v10 }
 0x3d2   :  { %2646 = vst.msk [vmem:[#allocation2 + $0x10] sm:$0xff] %vm2633_vm3, %v2644_v25  ;;  %v8759_v25 = vld [vmem:[#allocation9_spill] sm:$0xff] }
 0x3d3   :  { %v2520_v29 = vadd.f32 %v8143_v52, %v2452_v54  ;;  %v1282_v11 = vadd.f32 %v8191_v18, %v1150_v45  ;;  %5821 = vmatmul.msk.bf16.gmra.mxu1 %vm1603_vm2, %v1557_v24 }
 0x3d5   :  { %v2584_v51 = vmax.f32 %v2520_v29, 0.0  ;;  %v1410_v30 = vmax.f32 %v1282_v11, 0.0  ;;  %v1090_v29 = vmul.f32 %v8184_v63, %v8759_v25  ;;  %v1349_v11 = vmax.f32 %v1221_v36, 0.0 }
 0x3d6   :  { %v2055_v23 = vpop.f32.mrf.mxu2  ;;  %v2256_v57 = vpop.f32.mrf.mxu3 }
 0x3d7   :  { %2689 = vst.msk [vmem:[#allocation2 + $0x50] sm:$0xff] %vm1603_vm2, %v2584_v51  ;;  %v1474_v6 = vmax.f32 %v1346_v38, %v1410_v30  ;;  %v2385_v61 = vadd.f32 %v2256_v57, %v2051_v0  ;;  %v1222_v57 = vadd.f32 %v8191_v18, %v1090_v29 }
 0x3d8   :  { %v984_v60 = vpop.f32.mrf.mxu0  ;;  %v1766_v13 = vpop.f32.mrf.mxu1 }
 0x3d9   :  { %v1518_v44 = vpack.c.bf16 %v1474_v6, %v1473_v55  ;;  %v2453_v27 = vmul.f32 %v8138_v26, %v2385_v61  ;;  %v1151_v47 = vmul.f32 %v8184_v63, %v984_v60  ;;  %v2056_v62 = vadd.f32 %v2055_v23, %v1766_v13 }
 0x3da   :  { %v1350_v56 = vmax.f32 %v1222_v57, 0.0 }
 0x3db   :  { %v1283_v28 = vadd.f32 %v8191_v18, %v1151_v47  ;;  %5870 = vmatmul.msk.bf16.gmra.mxu2 %vm1603_vm2, %v1518_v44  ;;  %5925 = vmatmul.msk.bf16.gmra.mxu3 %vm1603_vm2, %v1518_v44  ;;  %v2521_v17 = vadd.f32 %v8143_v52, %v2453_v27  ;;  %v7082_v27 = vld [vmem:[#allocation3 + $0x58] sm:$0xff]  ;;  %v8426_v47 = vld [vmem:[%s8712_s6] ss:$0 sm:$0xff] }
 0x3dc   :  { %4954 = vmatpush.bf16.msra.mxu2 %v7082_v27 }
 0x3dd   :  { %v1411_v20 = vmax.f32 %v1283_v28, 0.0  ;;  %v2585_v43 = vmax.f32 %v2521_v17, 0.0 }
 0x3de   :  { %v2058_v2 = vpop.f32.mrf.mxu2  ;;  %v2259_v53 = vpop.f32.mrf.mxu3 }
 0x3df   :  { %v1475_v39 = vmax.f32 %v1347_v46, %v1411_v20  ;;  %v2386_v35 = vadd.f32 %v2259_v53, %v2054_v50  ;;  %2691 = vrot.lane.b32.xlu0 %v2585_v43, %s7412_s22  ;;  %v8760_v46 = vld [vmem:[#allocation10_spill] sm:$0xff] }
 0x3e0   :  { %v987_v1 = vpop.f32.mrf.mxu0  ;;  %v1769_v32 = vpop.f32.mrf.mxu1  ;;  %v1091_v50 = vmul.f32 %v8184_v63, %v8760_v46 }
 0x3e1   :  { %v1558_v41 = vpack.c.bf16 %v1475_v39, %v1474_v6  ;;  %v2454_v21 = vmul.f32 %v8138_v26, %v2386_v35  ;;  %v1152_v15 = vmul.f32 %v8184_v63, %v987_v1  ;;  %v2059_v38 = vadd.f32 %v2058_v2, %v1769_v32  ;;  %v7074_v1 = vld [vmem:[#allocation3 + $0x18] sm:$0xff] }
 0x3e2   :  { %4941 = vmatpush.bf16.msra.mxu1 %v7074_v1  ;;  %v8763_v1 = vld [vmem:[#allocation13_spill] sm:$0xff] }
 0x3e3   :  { %v2522_v37 = vadd.f32 %v8143_v52, %v2454_v21  ;;  %v1284_v16 = vadd.f32 %v8191_v18, %v1152_v15  ;;  %5822 = vmatmul.msk.bf16.gmra.mxu1 %vm1603_vm2, %v1558_v41  ;;  %v1223_v21 = vadd.f32 %v8191_v18, %v1091_v50 }
 0x3e5   :  { %v2586_v14 = vmax.f32 %v2522_v37, 0.0  ;;  %v1412_v42 = vmax.f32 %v1284_v16, 0.0 }
 0x3e6   :  { %v2060_v4 = vpop.f32.mrf.mxu2  ;;  %v2261_v7 = vpop.f32.mrf.mxu3 }
 0x3e7   :  { %2695 = vst.msk [vmem:[#allocation2 + $0x58] sm:$0xff] %vm1603_vm2, %v2586_v14  ;;  %v1476_v3 = vmax.f32 %v1348_v33, %v1412_v42  ;;  %v2387_v5 = vadd.f32 %v2261_v7, %v2056_v62  ;;  %v7090_v33 = vld [vmem:[#allocation3 + $0x98] sm:$0xff] }
 0x3e8   :  { %v989_v55 = vpop.f32.mrf.mxu0  ;;  %v1771_v58 = vpop.f32.mrf.mxu1  ;;  %v8761_v14 = vld [vmem:[#allocation11_spill] sm:$0xff]  ;;  %4967 = vmatpush.bf16.msra.mxu3 %v7090_v33 }
 0x3e9   :  { %v1519_v48 = vpack.c.bf16 %v1476_v3, %v1475_v39  ;;  %v2455_v10 = vmul.f32 %v8138_v26, %v2387_v5  ;;  %v1153_v24 = vmul.f32 %v8184_v63, %v989_v55  ;;  %v2662_v54 = vpop.permute.xlu2 %2661  ;;  %v2061_v20 = vadd.f32 %v2060_v4, %v1771_v58 }
 0x3ea   :  { %2664 = vst.msk [vmem:[#allocation2 + $0x28] sm:$0xff] %vm2633_vm3, %v2662_v54  ;;  %v1092_v42 = vmul.f32 %v8184_v63, %v8761_v14  ;;  %v1351_v4 = vmax.f32 %v1223_v21, 0.0 }
 0x3eb   :  { %v1285_v40 = vadd.f32 %v8191_v18, %v1153_v24  ;;  %5871 = vmatmul.msk.bf16.gmra.mxu2 %vm1603_vm2, %v1519_v48  ;;  %5926 = vmatmul.msk.bf16.gmra.mxu3 %vm1603_vm2, %v1519_v48  ;;  %v2523_v45 = vadd.f32 %v8143_v52, %v2455_v10  ;;  %v8418_v52 = vld [vmem:[%s8711_s5] ss:$0 sm:$0xff] }
 0x3ec   :  { %v1224_v10 = vadd.f32 %v8191_v18, %v1092_v42 }
 0x3ed   :  { %v1413_v34 = vmax.f32 %v1285_v40, 0.0  ;;  %v2587_v26 = vmax.f32 %v2523_v45, 0.0 }
 0x3ee   :  { %v2063_v0 = vpop.f32.mrf.mxu2  ;;  %v2264_v51 = vpop.f32.mrf.mxu3 }
 0x3ef   :  { %v1477_v30 = vmax.f32 %v1349_v11, %v1413_v34  ;;  %v2388_v23 = vadd.f32 %v2264_v51, %v2059_v38  ;;  %2697 = vrot.lane.b32.xlu2 %v2587_v26, %s7412_s22  ;;  %v1352_v38 = vmax.f32 %v1224_v10, 0.0  ;;  %v8762_v34 = vld [vmem:[#allocation12_spill] sm:$0xff] }
 0x3f0   :  { %v992_v6 = vpop.f32.mrf.mxu0  ;;  %v1774_v61 = vpop.f32.mrf.mxu1  ;;  %v1093_v26 = vmul.f32 %v8184_v63, %v8762_v34 }
 0x3f1   :  { %v1559_v60 = vpack.c.bf16 %v1477_v30, %v1476_v3  ;;  %v2456_v13 = vmul.f32 %v8418_v52, %v2388_v23  ;;  %v1154_v22 = vmul.f32 %v8184_v63, %v992_v6  ;;  %v2656_v44 = vpop.permute.xlu1 %2655  ;;  %v2064_v7 = vadd.f32 %v2063_v0, %v1774_v61 }
 0x3f2   :  { %2658 = vst.msk [vmem:[#allocation2 + $0x20] sm:$0xff] %vm2633_vm3, %v2656_v44 }
 0x3f3   :  { %v2524_v28 = vadd.f32 %v8426_v47, %v2456_v13  ;;  %v1286_v17 = vadd.f32 %v8191_v18, %v1154_v22  ;;  %5823 = vmatmul.msk.bf16.gmra.mxu1 %vm1603_vm2, %v1559_v60  ;;  %v1225_v22 = vadd.f32 %v8191_v18, %v1093_v26 }
 0x3f5   :  { %v2588_v43 = vmax.f32 %v2524_v28, 0.0  ;;  %v1414_v2 = vmax.f32 %v1286_v17, 0.0  ;;  %v1353_v46 = vmax.f32 %v1225_v22, 0.0 }
 0x3f6   :  { %v2065_v53 = vpop.f32.mrf.mxu2  ;;  %v2266_v39 = vpop.f32.mrf.mxu3 }
 0x3f7   :  { %2701 = vst.msk [vmem:[#allocation2 + $0x60] sm:$0xff] %vm1603_vm2, %v2588_v43  ;;  %v1478_v35 = vmax.f32 %v1350_v56, %v1414_v2  ;;  %v2389_v9 = vadd.f32 %v2266_v39, %v2061_v20 }
 0x3f8   :  { %v994_v32 = vpop.f32.mrf.mxu0  ;;  %v1776_v41 = vpop.f32.mrf.mxu1 }
 0x3f9   :  { %v1520_v15 = vpack.c.bf16 %v1478_v35, %v1477_v30  ;;  %v2457_v37 = vmul.f32 %v8418_v52, %v2389_v9  ;;  %v1155_v16 = vmul.f32 %v8184_v63, %v994_v32  ;;  %v2066_v0 = vadd.f32 %v2065_v53, %v1776_v41 }
 0x3fb   :  { %v1287_v8 = vadd.f32 %v8191_v18, %v1155_v16  ;;  %5872 = vmatmul.msk.bf16.gmra.mxu2 %vm1603_vm2, %v1520_v15  ;;  %5927 = vmatmul.msk.bf16.gmra.mxu3 %vm1603_vm2, %v1520_v15  ;;  %v2525_v62 = vadd.f32 %v8426_v47, %v2457_v37 }
 0x3fd   :  { %v1415_v3 = vmax.f32 %v1287_v8, 0.0  ;;  %v2589_v5 = vmax.f32 %v2525_v62, 0.0 }
 0x3fe   :  { %v2068_v55 = vpop.f32.mrf.mxu2  ;;  %v2269_v58 = vpop.f32.mrf.mxu3 }
 0x3ff   :  { %v1479_v36 = vmax.f32 %v1351_v4, %v1415_v3  ;;  %v2390_v48 = vadd.f32 %v2269_v58, %v2064_v7  ;;  %2703 = vrot.lane.b32.xlu1 %v2589_v5, %s7412_s22 }
 0x400   :  { %v997_v24 = vpop.f32.mrf.mxu0  ;;  %v1779_v54 = vpop.f32.mrf.mxu1 }
 0x401   :  { %v1560_v40 = vpack.c.bf16 %v1479_v36, %v1478_v35  ;;  %v2458_v45 = vmul.f32 %v8418_v52, %v2390_v48  ;;  %v1156_v25 = vmul.f32 %v8184_v63, %v997_v24  ;;  %v7356_v63 = vld [vmem:[%s8708_s2] ss:$0 sm:$0xff]  ;;  %v2069_v50 = vadd.f32 %v2068_v55, %v1779_v54 }
 0x403   :  { %v2526_v29 = vadd.f32 %v8426_v47, %v2458_v45  ;;  %v1288_v11 = vadd.f32 %v8191_v18, %v1156_v25  ;;  %5824 = vmatmul.msk.bf16.gmra.mxu1 %vm1603_vm2, %v1560_v40  ;;  %v8764_v40 = vld [vmem:[#allocation14_spill] sm:$0xff] }
 0x404   :  { %v8765_v45 = vpack.c.bf16 %v8764_v40, %v8763_v1 }
 0x405   :  { %v2590_v51 = vmax.f32 %v2526_v29, 0.0  ;;  %v1416_v30 = vmax.f32 %v1288_v11, 0.0 }
 0x406   :  { %v2070_v23 = vpop.f32.mrf.mxu2  ;;  %v2271_v57 = vpop.f32.mrf.mxu3 }
 0x407   :  { %2707 = vst.msk [vmem:[#allocation2 + $0x68] sm:$0xff] %vm1603_vm2, %v2590_v51  ;;  %v1480_v6 = vmax.f32 %v1352_v38, %v1416_v30  ;;  %v2391_v61 = vadd.f32 %v2271_v57, %v2066_v0  ;;  %v8766_v51 = vld [vmem:[#allocation16_spill] sm:$0xff] }
 0x408   :  { %v999_v60 = vpop.f32.mrf.mxu0  ;;  %v1781_v13 = vpop.f32.mrf.mxu1 }
 0x409   :  { %v1521_v44 = vpack.c.bf16 %v1480_v6, %v1479_v36  ;;  %v2459_v27 = vmul.f32 %v8418_v52, %v2391_v61  ;;  %v1157_v28 = vmul.f32 %v7356_v63, %v999_v60  ;;  %v2071_v37 = vadd.f32 %v2070_v23, %v1781_v13  ;;  %v7081_v23 = vld [vmem:[#allocation3 + $0x50] sm:$0xff]  ;;  %v8767_v63 = vld [vmem:[#allocation17_spill] sm:$0xff] }
 0x40a   :  { %4955 = vmatpush.bf16.msra.mxu2 %v7081_v23 }
 0x40b   :  { %v1289_v17 = vadd.f32 %v8191_v18, %v1157_v28  ;;  %5873 = vmatmul.msk.bf16.gmra.mxu2 %vm1603_vm2, %v1521_v44  ;;  %5928 = vmatmul.msk.bf16.gmra.mxu3 %vm1603_vm2, %v1521_v44  ;;  %v2527_v56 = vadd.f32 %v8426_v47, %v2459_v27  ;;  %v8768_v28 = vld [vmem:[#allocation15_spill] sm:$0xff] }
 0x40d   :  { %v1417_v20 = vmax.f32 %v1289_v17, 0.0  ;;  %v2591_v43 = vmax.f32 %v2527_v56, 0.0  ;;  %v8769_v17 = vpack.c.bf16 %v8767_v63, %v8768_v28  ;;  %v7079_v28 = vld [vmem:[#allocation3 + $0x40] sm:$0xff] }
 0x40e   :  { %v2073_v2 = vpop.f32.mrf.mxu2  ;;  %v2274_v53 = vpop.f32.mrf.mxu3 }
 0x40f   :  { %v1481_v39 = vmax.f32 %v1353_v46, %v1417_v20  ;;  %v2392_v35 = vadd.f32 %v2274_v53, %v2069_v50  ;;  %2709 = vrot.lane.b32.xlu0 %v2591_v43, %s7412_s22 }
 0x410   :  { %v1784_v9 = vpop.f32.mrf.mxu1 }
 0x411   :  { %v1522_v32 = vpack.c.bf16 %v8763_v1, %v1481_v39  ;;  %v1561_v18 = vpack.c.bf16 %v1481_v39, %v1480_v6  ;;  %v2460_v41 = vmul.f32 %v8418_v52, %v2392_v35  ;;  %v2668_v21 = vpop.permute.xlu1 %2667  ;;  %v2074_v3 = vadd.f32 %v2073_v2, %v1784_v9  ;;  %v7073_v2 = vld [vmem:[#allocation3 + $0x10] sm:$0xff]  ;;  %v8770_v9 = vld [vmem:[#allocation19_spill] sm:$0xff] }
 0x412   :  { %2670 = vst.msk [vmem:[#allocation2 + $0x30] sm:$0xff] %vm2633_vm3, %v2668_v21  ;;  %4942 = vmatpush.bf16.msra.mxu1 %v7073_v2  ;;  %v7089_v35 = vld [vmem:[#allocation3 + $0x90] sm:$0xff] }
 0x413   :  { %v2528_v15 = vadd.f32 %v8426_v47, %v2460_v41  ;;  %5825 = vmatmul.msk.bf16.gmra.mxu1 %vm1603_vm2, %v1561_v18  ;;  %4968 = vmatpush.bf16.msra.mxu3 %v7089_v35  ;;  %v7109_v35 = vld [vmem:[#allocation3 + $0x130] sm:$0xff] }
 0x415   :  { %v2592_v16 = vmax.f32 %v2528_v15, 0.0 }
 0x416   :  { %v2075_v33 = vpop.f32.mrf.mxu2  ;;  %v2276_v8 = vpop.f32.mrf.mxu3 }
 0x417   :  { %2713 = vst.msk [vmem:[#allocation2 + $0x70] sm:$0xff] %vm1603_vm2, %v2592_v16  ;;  %v2393_v62 = vadd.f32 %v2276_v8, %v2071_v37 }
 0x418   :  { %v1786_v14 = vpop.f32.mrf.mxu1 }
 0x419   :  { %v2461_v42 = vmul.f32 %v8418_v52, %v2393_v62  ;;  %v2680_v4 = vpop.permute.xlu2 %2679  ;;  %v2076_v25 = vadd.f32 %v2075_v33, %v1786_v14  ;;  %v8771_v62 = vld [vmem:[#allocation20_spill] sm:$0xff]  ;;  %v8772_v14 = vld [vmem:[#allocation18_spill] sm:$0xff] }
 0x41a   :  { %2682 = vst.msk [vmem:[#allocation2 + $0x40] sm:$0xff] %vm2633_vm3, %v2680_v4 }
 0x41b   :  { %5874 = vmatmul.msk.bf16.gmra.mxu2 %vm1603_vm2, %v1522_v32  ;;  %5929 = vmatmul.msk.bf16.gmra.mxu3 %vm1603_vm2, %v1522_v32  ;;  %v2529_v7 = vadd.f32 %v8426_v47, %v2461_v42  ;;  %v8773_v42 = vpack.c.bf16 %v8771_v62, %v8772_v14  ;;  %v7088_v62 = vld [vmem:[#allocation3 + $0x88] sm:$0xff]  ;;  %v7107_v14 = vld [vmem:[#allocation3 + $0x120] sm:$0xff] }
 0x41c   :  { %4969 = vmatpush.bf16.msra.mxu3 %v7088_v62 }
 0x41d   :  { %v2593_v5 = vmax.f32 %v2529_v7, 0.0 }
 0x41e   :  { %v2078_v55 = vpop.f32.mrf.mxu2  ;;  %v2279_v58 = vpop.f32.mrf.mxu3 }
 0x41f   :  { %v2394_v36 = vadd.f32 %v2279_v58, %v2074_v3  ;;  %2715 = vrot.lane.b32.xlu2 %v2593_v5, %s7412_s22 }
 0x420   :  { %v1789_v48 = vpop.f32.mrf.mxu1 }
 0x421   :  { %v2462_v10 = vmul.f32 %v8418_v52, %v2394_v36  ;;  %v2674_v24 = vpop.permute.xlu0 %2673  ;;  %v2079_v57 = vadd.f32 %v2078_v55, %v1789_v48 }
 0x422   :  { %2676 = vst.msk [vmem:[#allocation2 + $0x38] sm:$0xff] %vm2633_vm3, %v2674_v24 }
 0x423   :  { %v2530_v54 = vadd.f32 %v8426_v47, %v2462_v10  ;;  %5826 = vmatmul.msk.bf16.gmra.mxu1 %vm1603_vm2, %v8765_v45  ;;  %v8774_v10 = vld [vmem:[#allocation22_spill] sm:$0xff] }
 0x425   :  { %v2594_v29 = vmax.f32 %v2530_v54, 0.0 }
 0x426   :  { %v2080_v11 = vpop.f32.mrf.mxu2  ;;  %v2281_v38 = vpop.f32.mrf.mxu3 }
 0x427   :  { %2719 = vst.msk [vmem:[#allocation2 + $0x78] sm:$0xff] %vm1603_vm2, %v2594_v29  ;;  %v2395_v34 = vadd.f32 %v2281_v38, %v2076_v25 }
 0x428   :  { %v1791_v26 = vpop.f32.mrf.mxu1 }
 0x429   :  { %v2463_v0 = vmul.f32 %v8418_v52, %v2395_v34  ;;  %v2081_v56 = vadd.f32 %v2080_v11, %v1791_v26 }
 0x42b   :  { %5875 = vmatmul.msk.bf16.gmra.mxu2 %vm1603_vm2, %v8766_v51  ;;  %5930 = vmatmul.msk.bf16.gmra.mxu3 %vm1603_vm2, %v8766_v51  ;;  %v2531_v30 = vadd.f32 %v8426_v47, %v2463_v0  ;;  %v8775_v0 = vld [vmem:[#allocation23_spill] sm:$0xff]  ;;  %v8776_v51 = vld [vmem:[#allocation21_spill] sm:$0xff] }
 0x42d   :  { %v2595_v6 = vmax.f32 %v2531_v30, 0.0  ;;  %v8777_v30 = vpack.c.bf16 %v8775_v0, %v8776_v51 }
 0x42e   :  { %v2083_v61 = vpop.f32.mrf.mxu2  ;;  %v2284_v60 = vpop.f32.mrf.mxu3 }
 0x42f   :  { %v2396_v13 = vadd.f32 %v2284_v60, %v2079_v57  ;;  %2721 = vrot.lane.b32.xlu1 %v2595_v6, %s7412_s22 }
 0x430   :  { %v1794_v22 = vpop.f32.mrf.mxu1 }
 0x431   :  { %v2464_v44 = vmul.f32 %v8418_v52, %v2396_v13  ;;  %v2084_v32 = vadd.f32 %v2083_v61, %v1794_v22  ;;  %v7080_v22 = vld [vmem:[#allocation3 + $0x48] sm:$0xff] }
 0x432   :  { %4956 = vmatpush.bf16.msra.mxu2 %v7080_v22 }
 0x433   :  { %v2532_v27 = vadd.f32 %v8426_v47, %v2464_v44  ;;  %5827 = vmatmul.msk.bf16.gmra.mxu1 %vm1603_vm2, %v8769_v17 }
 0x435   :  { %v2596_v46 = vmax.f32 %v2532_v27, 0.0  ;;  %v8778_v27 = vld [vmem:[#allocation24_spill] sm:$0xff] }
 0x436   :  { %v2085_v50 = vpop.f32.mrf.mxu2  ;;  %v2286_v20 = vpop.f32.mrf.mxu3  ;;  %4957 = vmatpush.bf16.msra.mxu2 %v7079_v28  ;;  %v7103_v28 = vld [vmem:[#allocation3 + $0x100] sm:$0xff] }
 0x437   :  { %2725 = vst.msk [vmem:[#allocation2 + $0x80] sm:$0xff] %vm1603_vm2, %v2596_v46  ;;  %v2397_v43 = vadd.f32 %v2286_v20, %v2081_v56  ;;  %v7110_v46 = vld [vmem:[#allocation3 + $0x138] sm:$0xff] }
 0x438   :  { %v1796_v53 = vpop.f32.mrf.mxu1 }
 0x439   :  { %v2465_v39 = vmul.f32 %v8418_v52, %v2397_v43  ;;  %v2086_v4 = vadd.f32 %v2085_v50, %v1796_v53  ;;  %v7072_v53 = vld [vmem:[#allocation3 + $0x8] sm:$0xff] }
 0x43a   :  { %4989 = vmatpush.bf16.msrb.mxu2 %v7110_v46  ;;  %4943 = vmatpush.bf16.msra.mxu1 %v7072_v53 }
 0x43b   :  { %5876 = vmatmul.msk.bf16.gmra.mxu2 %vm1603_vm2, %v8770_v9  ;;  %5931 = vmatmul.msk.bf16.gmra.mxu3 %vm1603_vm2, %v8770_v9  ;;  %v2533_v1 = vadd.f32 %v8426_v47, %v2465_v39 }
 0x43d   :  { %v2597_v18 = vmax.f32 %v2533_v1, 0.0  ;;  %v8779_v1 = vpack.c.bf16 %v7856_v12, %v7846_v19  ;;  %v7101_v12 = vld [vmem:[#allocation3 + $0xf0] sm:$0xff] }
 0x43e   :  { %v2088_v41 = vpop.f32.mrf.mxu2  ;;  %v2289_v21 = vpop.f32.mrf.mxu3  ;;  %4990 = vmatpush.bf16.msrb.mxu2 %v7109_v35 }
 0x43f   :  { %v2398_v15 = vadd.f32 %v2289_v21, %v2084_v32  ;;  %2727 = vrot.lane.b32.xlu0 %v2597_v18, %s7412_s22  ;;  %v7071_v32 = vld [vmem:[#allocation3] sm:$0xff]  ;;  %v7102_v21 = vld [vmem:[#allocation3 + $0xf8] sm:$0xff] }
 0x440   :  { %v1799_v37 = vpop.f32.mrf.mxu1  ;;  %4944 = vmatpush.bf16.msra.mxu1 %v7071_v32 }
 0x441   :  { %v2466_v16 = vmul.f32 %v8418_v52, %v2398_v15  ;;  %v2686_v33 = vpop.permute.xlu1 %2685  ;;  %v2089_v54 = vadd.f32 %v2088_v41, %v1799_v37  ;;  %v7108_v15 = vld [vmem:[#allocation3 + $0x128] sm:$0xff] }
 0x442   :  { %2688 = vst.msk [vmem:[#allocation2 + $0x48] sm:$0xff] %vm2633_vm3, %v2686_v33  ;;  %4991 = vmatpush.bf16.msrb.mxu2 %v7108_v15  ;;  %v8785_v15 = vld [vmem:[#allocation28_spill] sm:$0xff] }
 0x443   :  { %v2534_v8 = vadd.f32 %v8426_v47, %v2466_v16  ;;  %5828 = vmatmul.msk.bf16.gmra.mxu1 %vm1603_vm2, %v8773_v42  ;;  %v8780_v42 = vld [vmem:[#allocation26_spill] sm:$0xff] }
 0x444   :  { %4976 = vmatpush.bf16.msrb.mxu1 %v7102_v21 }
 0x445   :  { %v2598_v7 = vmax.f32 %v2534_v8, 0.0 }
 0x446   :  { %v2090_v3 = vpop.f32.mrf.mxu2  ;;  %v2291_v5 = vpop.f32.mrf.mxu3  ;;  %4992 = vmatpush.bf16.msrb.mxu2 %v7107_v14 }
 0x447   :  { %2731 = vst.msk [vmem:[#allocation2 + $0x88] sm:$0xff] %vm1603_vm2, %v2598_v7  ;;  %v2399_v55 = vadd.f32 %v2291_v5, %v2086_v4  ;;  %v7087_v7 = vld [vmem:[#allocation3 + $0x80] sm:$0xff] }
 0x448   :  { %v1801_v58 = vpop.f32.mrf.mxu1  ;;  %4977 = vmatpush.bf16.msrb.mxu1 %v7101_v12  ;;  %4970 = vmatpush.bf16.msra.mxu3 %v7087_v7  ;;  %v8787_v7 = vld [vmem:[#allocation30_spill] sm:$0xff] }
 0x449   :  { %v2467_v36 = vmul.f32 %v8418_v52, %v2399_v55  ;;  %v2698_v48 = vpop.permute.xlu2 %2697  ;;  %v2091_v23 = vadd.f32 %v2090_v3, %v1801_v58  ;;  %v7100_v55 = vld [vmem:[#allocation3 + $0xe8] sm:$0xff]  ;;  %v7106_v58 = vld [vmem:[#allocation3 + $0x118] sm:$0xff] }
 0x44a   :  { %2700 = vst.msk [vmem:[#allocation2 + $0x58] sm:$0xff] %vm2633_vm3, %v2698_v48  ;;  %4993 = vmatpush.bf16.msrb.mxu2 %v7106_v58 }
 0x44b   :  { %5877 = vmatmul.msk.bf16.gmra.mxu2 %vm1603_vm2, %v8774_v10  ;;  %5932 = vmatmul.msk.bf16.gmra.mxu3 %vm1603_vm2, %v8774_v10  ;;  %v2535_v24 = vadd.f32 %v8426_v47, %v2467_v36  ;;  %v7118_v36 = vld [vmem:[#allocation3 + $0x178] sm:$0xff] }
 0x44c   :  { %5002 = vmatpush.bf16.msrb.mxu3 %v7118_v36  ;;  %4978 = vmatpush.bf16.msrb.mxu1 %v7100_v55 }
 0x44d   :  { %v2599_v40 = vmax.f32 %v2535_v24, 0.0 }
 0x44e   :  { %v2093_v45 = vpop.f32.mrf.mxu2  ;;  %v2294_v25 = vpop.f32.mrf.mxu3 }
 0x44f   :  { %v2400_v29 = vadd.f32 %v2294_v25, %v2089_v54  ;;  %2733 = vrot.lane.b32.xlu2 %v2599_v40, %s7412_s22  ;;  %v7099_v25 = vld [vmem:[#allocation3 + $0xe0] sm:$0xff] }
 0x450   :  { %v1804_v11 = vpop.f32.mrf.mxu1  ;;  %4979 = vmatpush.bf16.msrb.mxu1 %v7099_v25 }
 0x451   :  { %v2468_v38 = vmul.f32 %v8418_v52, %v2400_v29  ;;  %v2692_v34 = vpop.permute.xlu0 %2691  ;;  %v2094_v17 = vadd.f32 %v2093_v45, %v1804_v11  ;;  %v7105_v29 = vld [vmem:[#allocation3 + $0x110] sm:$0xff] }
 0x452   :  { %2694 = vst.msk [vmem:[#allocation2 + $0x50] sm:$0xff] %vm2633_vm3, %v2692_v34  ;;  %v7117_v11 = vld [vmem:[#allocation3 + $0x170] sm:$0xff]  ;;  %v8781_v34 = vld [vmem:[#allocation27_spill] sm:$0xff]  ;;  %4994 = vmatpush.bf16.msrb.mxu2 %v7105_v29 }
 0x453   :  { %v2536_v26 = vadd.f32 %v8426_v47, %v2468_v38  ;;  %5829 = vmatmul.msk.bf16.gmra.mxu1 %vm1603_vm2, %v8777_v30  ;;  %5003 = vmatpush.bf16.msrb.mxu3 %v7117_v11  ;;  %v2822_v11 = vld [vmem:[#allocation2 + $0x8] sm:$0xff] }
 0x455   :  { %v2600_v57 = vmax.f32 %v2536_v26, 0.0  ;;  %v8782_v26 = vld [vmem:[#allocation25_spill] sm:$0xff] }
 0x456   :  { %v2095_v6 = vpop.f32.mrf.mxu2  ;;  %v2296_v61 = vpop.f32.mrf.mxu3  ;;  %v8783_v0 = vpack.c.bf16 %v8781_v34, %v8782_v26  ;;  %v7134_v26 = vld [vmem:[#allocation3 + $0x1f8] sm:$0xff] }
 0x457   :  { %2737 = vst.msk [vmem:[#allocation2 + $0x90] sm:$0xff] %vm1603_vm2, %v2600_v57  ;;  %v2401_v60 = vadd.f32 %v2296_v61, %v2091_v23  ;;  %v7098_v23 = vld [vmem:[#allocation3 + $0xd8] sm:$0xff]  ;;  %v7104_v57 = vld [vmem:[#allocation3 + $0x108] sm:$0xff] }
 0x458   :  { %v1806_v13 = vpop.f32.mrf.mxu1  ;;  %4980 = vmatpush.bf16.msrb.mxu1 %v7098_v23  ;;  %4995 = vmatpush.bf16.msrb.mxu2 %v7104_v57  ;;  %v7133_v23 = vld [vmem:[#allocation3 + $0x1f0] sm:$0xff] }
 0x459   :  { %v2469_v44 = vmul.f32 %v8418_v52, %v2401_v60  ;;  %v2096_v18 = vadd.f32 %v2095_v6, %v1806_v13  ;;  %v7116_v6 = vld [vmem:[#allocation3 + $0x168] sm:$0xff] }
 0x45a   :  { %5004 = vmatpush.bf16.msrb.mxu3 %v7116_v6 }
 0x45b   :  { %5878 = vmatmul.msk.bf16.gmra.mxu2 %vm1603_vm2, %v8778_v27  ;;  %5933 = vmatmul.msk.bf16.gmra.mxu3 %vm1603_vm2, %v8778_v27  ;;  %v2537_v63 = vadd.f32 %v8426_v47, %v2469_v44 }
 0x45c   :  { %4996 = vmatpush.bf16.msrb.mxu2 %v7103_v28 }
 0x45d   :  { %v2601_v56 = vmax.f32 %v2537_v63, 0.0  ;;  %v7097_v63 = vld [vmem:[#allocation3 + $0xd0] sm:$0xff] }
 0x45e   :  { %v2098_v50 = vpop.f32.mrf.mxu2  ;;  %v2299_v20 = vpop.f32.mrf.mxu3  ;;  %4981 = vmatpush.bf16.msrb.mxu1 %v7097_v63 }
 0x45f   :  { %v2402_v43 = vadd.f32 %v2299_v20, %v2094_v17  ;;  %2739 = vrot.lane.b32.xlu1 %v2601_v56, %s7412_s22  ;;  %v7115_v17 = vld [vmem:[#allocation3 + $0x160] sm:$0xff]  ;;  %v8784_v56 = vld [vmem:[#allocation29_spill] sm:$0xff] }
 0x460   :  { %v1809_v2 = vpop.f32.mrf.mxu1  ;;  %5005 = vmatpush.bf16.msrb.mxu3 %v7115_v17 }
 0x461   :  { %v2470_v39 = vmul.f32 %v8418_v52, %v2402_v43  ;;  %v2099_v3 = vadd.f32 %v2098_v50, %v1809_v2  ;;  %v7096_v43 = vld [vmem:[#allocation3 + $0xc8] sm:$0xff]  ;;  %v7114_v2 = vld [vmem:[#allocation3 + $0x158] sm:$0xff] }
 0x462   :  { %4982 = vmatpush.bf16.msrb.mxu1 %v7096_v43 }
 0x463   :  { %v2538_v9 = vadd.f32 %v8426_v47, %v2470_v39  ;;  %5830 = vmatmul.msk.bf16.gmra.mxu1 %vm1603_vm2, %v8779_v1 }
 0x464   :  { %5006 = vmatpush.bf16.msrb.mxu3 %v7114_v2 }
 0x465   :  { %v2602_v41 = vmax.f32 %v2538_v9, 0.0 }
 0x466   :  { %v2100_v37 = vpop.f32.mrf.mxu2  ;;  %v2301_v16 = vpop.f32.mrf.mxu3 }
 0x467   :  { %2743 = vst.msk [vmem:[#allocation2 + $0x98] sm:$0xff] %vm1603_vm2, %v2602_v41  ;;  %v2403_v33 = vadd.f32 %v2301_v16, %v2096_v18  ;;  %v7095_v18 = vld [vmem:[#allocation3 + $0xc0] sm:$0xff]  ;;  %v7113_v41 = vld [vmem:[#allocation3 + $0x150] sm:$0xff] }
 0x468   :  { %v1811_v8 = vpop.f32.mrf.mxu1  ;;  %4983 = vmatpush.bf16.msrb.mxu1 %v7095_v18  ;;  %5007 = vmatpush.bf16.msrb.mxu3 %v7113_v41  ;;  %v7130_v18 = vld [vmem:[#allocation3 + $0x1d8] sm:$0xff] }
 0x469   :  { %v2471_v19 = vmul.f32 %v8418_v52, %v2403_v33  ;;  %v2101_v51 = vadd.f32 %v2100_v37, %v1811_v8  ;;  %v8786_v37 = vpack.c.bf16 %v7930_v59, %v8785_v15  ;;  %v7112_v8 = vld [vmem:[#allocation3 + $0x148] sm:$0xff] }
 0x46b   :  { %5879 = vmatmul.msk.bf16.gmra.mxu2 %vm1603_vm2, %v8780_v42  ;;  %5934 = vmatmul.msk.bf16.gmra.mxu3 %vm1603_vm2, %v8780_v42  ;;  %v2539_v4 = vadd.f32 %v8426_v47, %v2471_v19 }
 0x46c   :  { %5008 = vmatpush.bf16.msrb.mxu3 %v7112_v8  ;;  %v7123_v8 = vld [vmem:[#allocation3 + $0x1a0] sm:$0xff] }
 0x46d   :  { %v2603_v5 = vmax.f32 %v2539_v4, 0.0  ;;  %v7111_v4 = vld [vmem:[#allocation3 + $0x140] sm:$0xff] }
 0x46e   :  { %v2103_v48 = vpop.f32.mrf.mxu2  ;;  %v2304_v10 = vpop.f32.mrf.mxu3 }
 0x46f   :  { %v2404_v24 = vadd.f32 %v2304_v10, %v2099_v3  ;;  %2745 = vrot.lane.b32.xlu0 %v2603_v5, %s7412_s22 }
 0x470   :  { %v1814_v54 = vpop.f32.mrf.mxu1  ;;  %5009 = vmatpush.bf16.msrb.mxu3 %v7111_v4 }
 0x471   :  { %v2472_v40 = vmul.f32 %v8418_v52, %v2404_v24  ;;  %v2704_v45 = vpop.permute.xlu1 %2703  ;;  %v2104_v50 = vadd.f32 %v2103_v48, %v1814_v54  ;;  %v8788_v54 = vpack.c.bf16 %v7959_v31, %v7948_v49 }
 0x472   :  { %2706 = vst.msk [vmem:[#allocation2 + $0x60] sm:$0xff] %vm2633_vm3, %v2704_v45 }
 0x473   :  { %v2540_v38 = vadd.f32 %v8426_v47, %v2472_v40  ;;  %5831 = vmatmul.msk.bf16.gmra.mxu1 %vm1603_vm2, %v8783_v0 }
 0x475   :  { %v2604_v30 = vmax.f32 %v2540_v38, 0.0 }
 0x476   :  { %v2105_v61 = vpop.f32.mrf.mxu2  ;;  %v2306_v60 = vpop.f32.mrf.mxu3 }
 0x477   :  { %2749 = vst.msk [vmem:[#allocation2 + $0xa0] sm:$0xff] %vm1603_vm2, %v2604_v30  ;;  %v2405_v13 = vadd.f32 %v2306_v60, %v2101_v51  ;;  %v2158_v51 = vpack.c.bf16 0.0, %v7959_v31  ;;  %v2854_v30 = vpack.c.bf16 %v2822_v11, %v2822_v11  ;;  %v7132_v31 = vld [vmem:[#allocation3 + $0x1e8] sm:$0xff]  ;;  %v7158_v11 = vld [vmem:[#allocation3 + $0x2b8] sm:$0xff] }
 0x478   :  { %v1816_v22 = vpop.f32.mrf.mxu1 }
 0x479   :  { %v2473_v44 = vmul.f32 %v8418_v52, %v2405_v13  ;;  %v2716_v27 = vpop.permute.xlu2 %2715  ;;  %v2106_v16 = vadd.f32 %v2105_v61, %v1816_v22  ;;  %v2821_v13 = vld [vmem:[#allocation2] sm:$0xff] }
 0x47a   :  { %2718 = vst.msk [vmem:[#allocation2 + $0x70] sm:$0xff] %vm2633_vm3, %v2716_v27  ;;  %v7126_v27 = vld [vmem:[#allocation3 + $0x1b8] sm:$0xff]  ;;  %v2853_v17 = vpack.c.bf16 %v2821_v13, %v2821_v13 }
 0x47b   :  { %5880 = vmatmul.msk.bf16.gmra.mxu2 %vm1603_vm2, %v8784_v56  ;;  %5935 = vmatmul.msk.bf16.gmra.mxu3 %vm1603_vm2, %v8784_v56  ;;  %v2541_v46 = vadd.f32 %v8426_v47, %v2473_v44 }
 0x47d   :  { %v2605_v20 = vmax.f32 %v2541_v46, 0.0  ;;  %v7125_v46 = vld [vmem:[#allocation3 + $0x1b0] sm:$0xff] }
 0x47e   :  { %v2108_v53 = vpop.f32.mrf.mxu2  ;;  %v2309_v39 = vpop.f32.mrf.mxu3 }
 0x47f   :  { %v2406_v35 = vadd.f32 %v2309_v39, %v2104_v50  ;;  %2751 = vrot.lane.b32.xlu2 %v2605_v20, %s7412_s22  ;;  %v7131_v50 = vld [vmem:[#allocation3 + $0x1e0] sm:$0xff]  ;;  %v2823_v39 = vld [vmem:[#allocation2 + $0x10] sm:$0xff] }
 0x480   :  { %v1819_v9 = vpop.f32.mrf.mxu1  ;;  %v2855_v15 = vpack.c.bf16 %v2823_v39, %v2823_v39  ;;  %v7149_v39 = vld [vmem:[#allocation3 + $0x270] sm:$0xff] }
 0x481   :  { %v2474_v1 = vmul.f32 %v8418_v52, %v2406_v35  ;;  %v2710_v32 = vpop.permute.xlu0 %2709  ;;  %v2109_v3 = vadd.f32 %v2108_v53, %v1819_v9  ;;  %v2825_v35 = vld [vmem:[#allocation2 + $0x20] sm:$0xff] }
 0x482   :  { %2712 = vst.msk [vmem:[#allocation2 + $0x68] sm:$0xff] %vm2633_vm3, %v2710_v32  ;;  %v7124_v32 = vld [vmem:[#allocation3 + $0x1a8] sm:$0xff] }
 0x483   :  { %v2542_v21 = vadd.f32 %v8426_v47, %v2474_v1  ;;  %5832 = vmatmul.msk.bf16.gmra.mxu1 %vm1603_vm2, %v8786_v37  ;;  %v2857_v37 = vpack.c.bf16 %v2825_v35, %v2825_v35  ;;  %v7155_v35 = vld [vmem:[#allocation3 + $0x2a0] sm:$0xff] }
 0x485   :  { %v2606_v33 = vmax.f32 %v2542_v21, 0.0 }
 0x486   :  { %v2110_v62 = vpop.f32.mrf.mxu2  ;;  %v2311_v19 = vpop.f32.mrf.mxu3 }
 0x487   :  { %2755 = vst.msk [vmem:[#allocation2 + $0xa8] sm:$0xff] %vm1603_vm2, %v2606_v33  ;;  %v2407_v12 = vadd.f32 %v2311_v19, %v2106_v16  ;;  %v7142_v16 = vld [vmem:[#allocation3 + $0x238] sm:$0xff] }
 0x488   :  { %v1821_v14 = vpop.f32.mrf.mxu1 }
 0x489   :  { %v2475_v42 = vmul.f32 %v8418_v52, %v2407_v12  ;;  %v2111_v40 = vadd.f32 %v2110_v62, %v1821_v14  ;;  %v7129_v62 = vld [vmem:[#allocation3 + $0x1d0] sm:$0xff] }
 0x48a   :  { %v7141_v12 = vld [vmem:[#allocation3 + $0x230] sm:$0xff] }
 0x48b   :  { %5881 = vmatmul.msk.bf16.gmra.mxu2 %vm1603_vm2, %v8787_v7  ;;  %5936 = vmatmul.msk.bf16.gmra.mxu3 %vm1603_vm2, %v8787_v7  ;;  %v2543_v59 = vadd.f32 %v8426_v47, %v2475_v42  ;;  %v2824_v7 = vld [vmem:[#allocation2 + $0x18] sm:$0xff] }
 0x48d   :  { %v2607_v5 = vmax.f32 %v2543_v59, 0.0 }
 0x48e   :  { %v2113_v55 = vpop.f32.mrf.mxu2  ;;  %v2314_v58 = vpop.f32.mrf.mxu3 }
 0x48f   :  { %v2408_v36 = vadd.f32 %v2314_v58, %v2109_v3  ;;  %2757 = vrot.lane.b32.xlu1 %v2607_v5, %s7412_s22  ;;  %v7122_v5 = vld [vmem:[#allocation3 + $0x198] sm:$0xff] }
 0x490   :  { %v1824_v48 = vpop.f32.mrf.mxu1 }
 0x491   :  { %v2476_v10 = vmul.f32 %v8418_v52, %v2408_v36  ;;  %v2114_v57 = vadd.f32 %v2113_v55, %v1824_v48  ;;  %v7128_v55 = vld [vmem:[#allocation3 + $0x1c8] sm:$0xff]  ;;  %v2856_v48 = vpack.c.bf16 %v2824_v7, %v2824_v7 }
 0x493   :  { %v2544_v24 = vadd.f32 %v8426_v47, %v2476_v10  ;;  %5833 = vmatmul.msk.bf16.gmra.mxu1 %vm1603_vm2, %v8788_v54  ;;  %v7140_v10 = vld [vmem:[#allocation3 + $0x228] sm:$0xff]  ;;  %v7121_v54 = vld [vmem:[#allocation3 + $0x190] sm:$0xff] }
 0x495   :  { %v2608_v45 = vmax.f32 %v2544_v24, 0.0 }
 0x496   :  { %v2115_v25 = vpop.f32.mrf.mxu2  ;;  %v2316_v29 = vpop.f32.mrf.mxu3 }
 0x497   :  { %2761 = vst.msk [vmem:[#allocation2 + $0xb0] sm:$0xff] %vm1603_vm2, %v2608_v45  ;;  %v2409_v38 = vadd.f32 %v2316_v29, %v2111_v40  ;;  %v7127_v40 = vld [vmem:[#allocation3 + $0x1c0] sm:$0xff] }
 0x498   :  { %v1826_v34 = vpop.f32.mrf.mxu1  ;;  %v7139_v29 = vld [vmem:[#allocation3 + $0x220] sm:$0xff] }
 0x499   :  { %v2477_v0 = vmul.f32 %v8418_v52, %v2409_v38  ;;  %v2116_v20 = vadd.f32 %v2115_v25, %v1826_v34 }
 0x49b   :  { %5937 = vmatmul.msk.bf16.gmra.mxu3 %vm1603_vm2, %v2158_v51  ;;  %4958 = vmatmul.bf16.vlgmr.msra.gmra.mxu2 %v2854_v30  ;;  %v2545_v49 = vadd.f32 %v8426_v47, %v2477_v0  ;;  %v2828_v0 = vld [vmem:[#allocation2 + $0x38] sm:$0xff] }
 0x49c   :  { %5028 = vmatpush.bf16.msra.mxu2 %v7134_v26  ;;  %v2826_v26 = vld [vmem:[#allocation2 + $0x28] sm:$0xff] }
 0x49d   :  { %v2609_v6 = vmax.f32 %v2545_v49, 0.0  ;;  %v7120_v49 = vld [vmem:[#allocation3 + $0x188] sm:$0xff] }
 0x49e   :  { %v2118_v61 = vpop.f32.mrf.mxu2  ;;  %v2319_v60 = vpop.f32.mrf.mxu3 }
 0x49f   :  { %v2410_v22 = vadd.f32 %v2319_v60, %v2114_v57  ;;  %2763 = vrot.lane.b32.xlu0 %v2609_v6, %s7412_s22  ;;  %v2858_v57 = vpack.c.bf16 %v2826_v26, %v2826_v26  ;;  %v2860_v6 = vpack.c.bf16 %v2828_v0, %v2828_v0  ;;  %v7157_v60 = vld [vmem:[#allocation3 + $0x2b0] sm:$0xff] }
 0x4a0   :  { %5029 = vmatpush.bf16.msra.mxu2 %v7133_v23  ;;  %v1829_v44 = vpop.f32.mrf.mxu1 }
 0x4a1   :  { %v2478_v63 = vmul.f32 %v8418_v52, %v2410_v22  ;;  %v2722_v28 = vpop.permute.xlu1 %2721  ;;  %v2119_v19 = vadd.f32 %v2118_v61, %v1829_v44  ;;  %v7138_v61 = vld [vmem:[#allocation3 + $0x218] sm:$0xff]  ;;  %v7119_v22 = vld [vmem:[#allocation3 + $0x180] sm:$0xff] }
 0x4a2   :  { %2724 = vst.msk [vmem:[#allocation2 + $0x78] sm:$0xff] %vm2633_vm3, %v2722_v28 }
 0x4a3   :  { %v2546_v56 = vadd.f32 %v8426_v47, %v2478_v63  ;;  %4945 = vmatmul.bf16.vlgmr.msra.gmra.mxu1 %v2853_v17  ;;  %v7150_v63 = vld [vmem:[#allocation3 + $0x278] sm:$0xff] }
 0x4a4   :  { %5015 = vmatpush.bf16.msra.mxu1 %v7126_v27  ;;  %5030 = vmatpush.bf16.msra.mxu2 %v7132_v31  ;;  %v7137_v27 = vld [vmem:[#allocation3 + $0x210] sm:$0xff] }
 0x4a5   :  { %v2610_v43 = vmax.f32 %v2546_v56, 0.0  ;;  %v7156_v56 = vld [vmem:[#allocation3 + $0x2a8] sm:$0xff] }
 0x4a6   :  { %v2120_v2 = vpop.f32.mrf.mxu2  ;;  %v2321_v53 = vpop.f32.mrf.mxu3 }
 0x4a7   :  { %2767 = vst.msk [vmem:[#allocation2 + $0xb8] sm:$0xff] %vm1603_vm2, %v2610_v43  ;;  %v2411_v9 = vadd.f32 %v2321_v53, %v2116_v20  ;;  %v7136_v53 = vld [vmem:[#allocation3 + $0x208] sm:$0xff] }
 0x4a8   :  { %5016 = vmatpush.bf16.msra.mxu1 %v7125_v46  ;;  %5031 = vmatpush.bf16.msra.mxu2 %v7131_v50  ;;  %v1831_v1 = vpop.f32.mrf.mxu1  ;;  %v2827_v46 = vld [vmem:[#allocation2 + $0x30] sm:$0xff] }
 0x4a9   :  { %v2479_v41 = vmul.f32 %v8418_v52, %v2411_v9  ;;  %v2734_v21 = vpop.permute.xlu2 %2733  ;;  %v2121_v45 = vadd.f32 %v2120_v2, %v1831_v1  ;;  %v2859_v2 = vpack.c.bf16 %v2827_v46, %v2827_v46 }
 0x4aa   :  { %2736 = vst.msk [vmem:[#allocation2 + $0x88] sm:$0xff] %vm2633_vm3, %v2734_v21 }
 0x4ab   :  { %4971 = vmatmul.bf16.vlgmr.msra.gmra.mxu3 %v2855_v15  ;;  %4997 = vmatmul.bf16.vlgmr.msrb.gmra.mxu2 %v2857_v37  ;;  %v2547_v33 = vadd.f32 %v8426_v47, %v2479_v41  ;;  %v7148_v41 = vld [vmem:[#allocation3 + $0x268] sm:$0xff]  ;;  %v7154_v37 = vld [vmem:[#allocation3 + $0x298] sm:$0xff] }
 0x4ac   :  { %5017 = vmatpush.bf16.msra.mxu1 %v7124_v32  ;;  %5032 = vmatpush.bf16.msra.mxu2 %v7130_v18  ;;  %v7135_v18 = vld [vmem:[#allocation3 + $0x200] sm:$0xff] }
 0x4ad   :  { %5041 = vmatpush.bf16.msra.mxu3 %v7142_v16  ;;  %v2611_v14 = vmax.f32 %v2547_v33, 0.0  ;;  %v7166_v16 = vld [vmem:[#allocation3 + $0x2f8] sm:$0xff] }
 0x4ae   :  { %v2123_v42 = vpop.f32.mrf.mxu2  ;;  %v2324_v4 = vpop.f32.mrf.mxu3 }
 0x4af   :  { %v2412_v59 = vadd.f32 %v2324_v4, %v2119_v19  ;;  %2769 = vrot.lane.b32.xlu2 %v2611_v14, %s7412_s22  ;;  %v7165_v4 = vld [vmem:[#allocation3 + $0x2f0] sm:$0xff] }
 0x4b0   :  { %5018 = vmatpush.bf16.msra.mxu1 %v7123_v8  ;;  %5033 = vmatpush.bf16.msra.mxu2 %v7129_v62  ;;  %v1834_v3 = vpop.f32.mrf.mxu1  ;;  %v2829_v8 = vld [vmem:[#allocation2 + $0x40] sm:$0xff] }
 0x4b1   :  { %v2480_v58 = vmul.f32 %v8418_v52, %v2412_v59  ;;  %5042 = vmatpush.bf16.msra.mxu3 %v7141_v12  ;;  %v2728_v36 = vpop.permute.xlu0 %2727  ;;  %v2124_v44 = vadd.f32 %v2123_v42, %v1834_v3  ;;  %v7147_v12 = vld [vmem:[#allocation3 + $0x260] sm:$0xff]  ;;  %v2861_v14 = vpack.c.bf16 %v2829_v8, %v2829_v8  ;;  %v7153_v42 = vld [vmem:[#allocation3 + $0x290] sm:$0xff] }
 0x4b2   :  { %2730 = vst.msk [vmem:[#allocation2 + $0x80] sm:$0xff] %vm2633_vm3, %v2728_v36  ;;  %v7164_v36 = vld [vmem:[#allocation3 + $0x2e8] sm:$0xff] }
 0x4b3   :  { %v2548_v24 = vadd.f32 %v8426_v47, %v2480_v58  ;;  %4984 = vmatmul.bf16.vlgmr.msrb.gmra.mxu1 %v2856_v48 }
 0x4b4   :  { %5019 = vmatpush.bf16.msra.mxu1 %v7122_v5  ;;  %5034 = vmatpush.bf16.msra.mxu2 %v7128_v55  ;;  %v7146_v5 = vld [vmem:[#allocation3 + $0x258] sm:$0xff] }
 0x4b5   :  { %v2612_v25 = vmax.f32 %v2548_v24, 0.0  ;;  %5043 = vmatpush.bf16.msra.mxu3 %v7140_v10  ;;  %v8616_v24 = vld [vmem:[%s8711_s5] ss:$0 sm:$0xff] }
 0x4b6   :  { %v2125_v38 = vpop.f32.mrf.mxu2  ;;  %v2326_v34 = vpop.f32.mrf.mxu3 }
 0x4b7   :  { %2773 = vst.msk [vmem:[#allocation2 + $0xc0] sm:$0xff] %vm1603_vm2, %v2612_v25  ;;  %v2413_v51 = vadd.f32 %v2326_v34, %v2121_v45  ;;  %v7151_v45 = vld [vmem:[#allocation3 + $0x280] sm:$0xff]  ;;  %v2831_v34 = vld [vmem:[#allocation2 + $0x50] sm:$0xff] }
 0x4b8   :  { %5020 = vmatpush.bf16.msra.mxu1 %v7121_v54  ;;  %5035 = vmatpush.bf16.msra.mxu2 %v7127_v40  ;;  %v1836_v30 = vpop.f32.mrf.mxu1  ;;  %v7145_v40 = vld [vmem:[#allocation3 + $0x250] sm:$0xff]  ;;  %v7163_v25 = vld [vmem:[#allocation3 + $0x2e0] sm:$0xff] }
 0x4b9   :  { %v2481_v23 = vmul.f32 %v8418_v52, %v2413_v51  ;;  %5044 = vmatpush.bf16.msra.mxu3 %v7139_v29  ;;  %v2126_v1 = vadd.f32 %v2125_v38, %v1836_v30  ;;  %v8623_v29 = vld [vmem:[%s8712_s6] ss:$0 sm:$0xff]  ;;  %v7182_v38 = vld [vmem:[#allocation3 + $0x378] sm:$0xff]  ;;  %v7144_v51 = vld [vmem:[#allocation3 + $0x248] sm:$0xff] }
 0x4bb   :  { %5010 = vmatmul.bf16.vlgmr.msrb.gmra.mxu3 %v2858_v57  ;;  %5036 = vmatmul.bf16.vlgmr.msra.gmra.mxu2 %v2860_v6  ;;  %v2549_v13 = vadd.f32 %v8426_v47, %v2481_v23  ;;  %v7162_v23 = vld [vmem:[#allocation3 + $0x2d8] sm:$0xff]  ;;  %v2863_v6 = vpack.c.bf16 %v2831_v34, %v2831_v34 }
 0x4bc   :  { %5067 = vmatpush.bf16.msrb.mxu2 %v7158_v11  ;;  %5021 = vmatpush.bf16.msra.mxu1 %v7120_v49 }
 0x4bd   :  { %5045 = vmatpush.bf16.msra.mxu3 %v7138_v61  ;;  %v2613_v31 = vmax.f32 %v2549_v13, 0.0  ;;  %v7181_v61 = vld [vmem:[#allocation3 + $0x370] sm:$0xff] }
 0x4be   :  { %v2128_v28 = vpop.f32.mrf.mxu2  ;;  %v2329_v17 = vpop.f32.mrf.mxu3 }
 0x4bf   :  { %v2414_v50 = vadd.f32 %v2329_v17, %v2124_v44  ;;  %2775 = vrot.lane.b32.xlu1 %v2613_v31, %s7412_s22  ;;  %v7143_v44 = vld [vmem:[#allocation3 + $0x240] sm:$0xff]  ;;  %v7174_v31 = vld [vmem:[#allocation3 + $0x338] sm:$0xff] }
 0x4c0   :  { %5068 = vmatpush.bf16.msrb.mxu2 %v7157_v60  ;;  %5022 = vmatpush.bf16.msra.mxu1 %v7119_v22  ;;  %v1839_v20 = vpop.f32.mrf.mxu1 }
 0x4c1   :  { %v2482_v43 = vmul.f32 %v8418_v52, %v2414_v50  ;;  %5046 = vmatpush.bf16.msra.mxu3 %v7137_v27  ;;  %v2129_v59 = vadd.f32 %v2128_v28, %v1839_v20  ;;  %v7161_v27 = vld [vmem:[#allocation3 + $0x2d0] sm:$0xff]  ;;  %v2830_v28 = vld [vmem:[#allocation2 + $0x48] sm:$0xff] }
 0x4c3   :  { %v2550_v9 = vadd.f32 %v8426_v47, %v2482_v43  ;;  %5023 = vmatmul.bf16.vlgmr.msra.gmra.mxu1 %v2859_v2  ;;  %v2862_v43 = vpack.c.bf16 %v2830_v28, %v2830_v28  ;;  %v7160_v2 = vld [vmem:[#allocation3 + $0x2c8] sm:$0xff]  ;;  %v2833_v28 = vld [vmem:[#allocation2 + $0x60] sm:$0xff] }
 0x4c4   :  { %5054 = vmatpush.bf16.msrb.mxu1 %v7150_v63  ;;  %5069 = vmatpush.bf16.msrb.mxu2 %v7156_v56  ;;  %v7180_v63 = vld [vmem:[#allocation3 + $0x368] sm:$0xff] }
 0x4c5   :  { %v2614_v32 = vmax.f32 %v2550_v9, 0.0  ;;  %5047 = vmatpush.bf16.msra.mxu3 %v7136_v53  ;;  %v7173_v53 = vld [vmem:[#allocation3 + $0x330] sm:$0xff] }
 0x4c6   :  { %v2130_v21 = vpop.f32.mrf.mxu2  ;;  %v2331_v15 = vpop.f32.mrf.mxu3 }
 0x4c7   :  { %2779 = vst.msk [vmem:[#allocation2 + $0xc8] sm:$0xff] %vm1603_vm2, %v2614_v32  ;;  %v2415_v33 = vadd.f32 %v2331_v15, %v2126_v1  ;;  %v7178_v15 = vld [vmem:[#allocation3 + $0x358] sm:$0xff] }
 0x4c8   :  { %5055 = vmatpush.bf16.msrb.mxu1 %v7149_v39  ;;  %5070 = vmatpush.bf16.msrb.mxu2 %v7155_v35  ;;  %v1841_v62 = vpop.f32.mrf.mxu1  ;;  %v7179_v35 = vld [vmem:[#allocation3 + $0x360] sm:$0xff] }
 0x4c9   :  { %v2483_v19 = vmul.f32 %v8418_v52, %v2415_v33  ;;  %5048 = vmatpush.bf16.msra.mxu3 %v7135_v18  ;;  %v7152_v52 = vld [vmem:[#allocation3 + $0x288] sm:$0xff]  ;;  %v2131_v26 = vadd.f32 %v2130_v21, %v1841_v62  ;;  %v7159_v18 = vld [vmem:[#allocation3 + $0x2c0] sm:$0xff] }
 0x4cb   :  { %v2551_v7 = vadd.f32 %v8426_v47, %v2483_v19 }
 0x4cc   :  { %5056 = vmatpush.bf16.msrb.mxu1 %v7148_v41  ;;  %5071 = vmatpush.bf16.msrb.mxu2 %v7154_v37  ;;  %v7172_v41 = vld [vmem:[#allocation3 + $0x328] sm:$0xff]  ;;  %v7190_v37 = vld [vmem:[#allocation3 + $0x3b8] sm:$0xff] }
 0x4cd   :  { %5080 = vmatpush.bf16.msrb.mxu3 %v7166_v16  ;;  %v2615_v3 = vmax.f32 %v2551_v7, 0.0  ;;  %v2832_v16 = vld [vmem:[#allocation2 + $0x58] sm:$0xff]  ;;  %v7189_v7 = vld [vmem:[#allocation3 + $0x3b0] sm:$0xff] }
 0x4ce   :  { %5049 = vmatmul.bf16.vlgmr.msra.gmra.mxu3 %v2861_v14  ;;  %v2133_v55 = vpop.f32.mrf.mxu2  ;;  %v2334_v58 = vpop.f32.mrf.mxu3 }
 0x4cf   :  { %v2416_v48 = vadd.f32 %v2334_v58, %v2129_v59  ;;  %2781 = vrot.lane.b32.xlu0 %v2615_v3, %s7412_s22  ;;  %v7188_v58 = vld [vmem:[#allocation3 + $0x3a8] sm:$0xff] }
 0x4d0   :  { %5057 = vmatpush.bf16.msrb.mxu1 %v7147_v12  ;;  %5072 = vmatpush.bf16.msrb.mxu2 %v7153_v42  ;;  %v1844_v10 = vpop.f32.mrf.mxu1  ;;  %v7171_v12 = vld [vmem:[#allocation3 + $0x320] sm:$0xff]  ;;  %v2864_v42 = vpack.c.bf16 %v2832_v16, %v2832_v16  ;;  %v2835_v16 = vld [vmem:[#allocation2 + $0x70] sm:$0xff] }
 0x4d1   :  { %5081 = vmatpush.bf16.msrb.mxu3 %v7165_v4  ;;  %v2484_v47 = vmul.f32 %v8616_v24, %v2416_v48  ;;  %v2740_v54 = vpop.permute.xlu1 %2739  ;;  %v2134_v56 = vadd.f32 %v2133_v55, %v1844_v10  ;;  %v7177_v4 = vld [vmem:[#allocation3 + $0x350] sm:$0xff]  ;;  %v7176_v55 = vld [vmem:[#allocation3 + $0x348] sm:$0xff] }
 0x4d2   :  { %2742 = vst.msk [vmem:[#allocation2 + $0x90] sm:$0xff] %vm2633_vm3, %v2740_v54  ;;  %v7169_v54 = vld [vmem:[#allocation3 + $0x310] sm:$0xff] }
 0x4d3   :  { %v2552_v11 = vadd.f32 %v8623_v29, %v2484_v47 }
 0x4d4   :  { %5058 = vmatpush.bf16.msrb.mxu1 %v7146_v5  ;;  %5073 = vmatpush.bf16.msrb.mxu2 %v7152_v52  ;;  %v7170_v5 = vld [vmem:[#allocation3 + $0x318] sm:$0xff] }
 0x4d5   :  { %5082 = vmatpush.bf16.msrb.mxu3 %v7164_v36  ;;  %v2616_v0 = vmax.f32 %v2552_v11, 0.0 }
 0x4d6   :  { %v2135_v30 = vpop.f32.mrf.mxu2  ;;  %v2336_v49 = vpop.f32.mrf.mxu3 }
 0x4d7   :  { %2785 = vst.msk [vmem:[#allocation2 + $0xd0] sm:$0xff] %vm1603_vm2, %v2616_v0  ;;  %v2417_v57 = vadd.f32 %v2336_v49, %v2131_v26  ;;  %v2834_v26 = vld [vmem:[#allocation2 + $0x68] sm:$0xff] }
 0x4d8   :  { %5059 = vmatpush.bf16.msrb.mxu1 %v7145_v40  ;;  %5074 = vmatpush.bf16.msrb.mxu2 %v7151_v45  ;;  %v1846_v60 = vpop.f32.mrf.mxu1  ;;  %v7175_v45 = vld [vmem:[#allocation3 + $0x340] sm:$0xff]  ;;  %v7168_v0 = vld [vmem:[#allocation3 + $0x308] sm:$0xff]  ;;  %v2866_v49 = vpack.c.bf16 %v2834_v26, %v2834_v26 }
 0x4d9   :  { %5083 = vmatpush.bf16.msrb.mxu3 %v7163_v25  ;;  %v2485_v13 = vmul.f32 %v8616_v24, %v2417_v57  ;;  %v2752_v22 = vpop.permute.xlu2 %2751  ;;  %v2136_v33 = vadd.f32 %v2135_v30, %v1846_v60  ;;  %v7187_v25 = vld [vmem:[#allocation3 + $0x3a0] sm:$0xff]  ;;  %v7186_v30 = vld [vmem:[#allocation3 + $0x398] sm:$0xff] }
 0x4da   :  { %2754 = vst.msk [vmem:[#allocation2 + $0xa0] sm:$0xff] %vm2633_vm3, %v2752_v22 }
 0x4db   :  { %5075 = vmatmul.bf16.vlgmr.msrb.gmra.mxu2 %v2863_v6  ;;  %v2553_v17 = vadd.f32 %v8623_v29, %v2485_v13  ;;  %v7167_v13 = vld [vmem:[#allocation3 + $0x300] sm:$0xff] }
 0x4dc   :  { %5106 = vmatpush.bf16.msra.mxu2 %v7182_v38  ;;  %5060 = vmatpush.bf16.msrb.mxu1 %v7144_v51  ;;  %v7206_v38 = vld [vmem:[#allocation3 + $0x438] sm:$0xff] }
 0x4dd   :  { %5084 = vmatpush.bf16.msrb.mxu3 %v7162_v23  ;;  %v2617_v46 = vmax.f32 %v2553_v17, 0.0  ;;  %v7205_v23 = vld [vmem:[#allocation3 + $0x430] sm:$0xff] }
 0x4de   :  { %v2138_v50 = vpop.f32.mrf.mxu2  ;;  %v2339_v20 = vpop.f32.mrf.mxu3 }
 0x4df   :  { %v2418_v39 = vadd.f32 %v2339_v20, %v2134_v56  ;;  %2787 = vrot.lane.b32.xlu2 %v2617_v46, %s7412_s22  ;;  %v2865_v56 = vpack.c.bf16 %v2833_v28, %v2833_v28  ;;  %v7184_v46 = vld [vmem:[#allocation3 + $0x388] sm:$0xff] }
 0x4e0   :  { %5107 = vmatpush.bf16.msra.mxu2 %v7181_v61  ;;  %5061 = vmatpush.bf16.msrb.mxu1 %v7143_v44  ;;  %v1849_v9 = vpop.f32.mrf.mxu1  ;;  %v7185_v44 = vld [vmem:[#allocation3 + $0x390] sm:$0xff] }
 0x4e1   :  { %5085 = vmatpush.bf16.msrb.mxu3 %v7161_v27  ;;  %v2486_v1 = vmul.f32 %v8616_v24, %v2418_v39  ;;  %v2746_v32 = vpop.permute.xlu0 %2745  ;;  %v2139_v36 = vadd.f32 %v2138_v50, %v1849_v9  ;;  %v7198_v27 = vld [vmem:[#allocation3 + $0x3f8] sm:$0xff]  ;;  %v7197_v50 = vld [vmem:[#allocation3 + $0x3f0] sm:$0xff] }
 0x4e2   :  { %2748 = vst.msk [vmem:[#allocation2 + $0x98] sm:$0xff] %vm2633_vm3, %v2746_v32  ;;  %v7196_v32 = vld [vmem:[#allocation3 + $0x3e8] sm:$0xff] }
 0x4e3   :  { %5062 = vmatmul.bf16.vlgmr.msrb.gmra.mxu1 %v2862_v43  ;;  %v2554_v21 = vadd.f32 %v8623_v29, %v2486_v1  ;;  %v7203_v43 = vld [vmem:[#allocation3 + $0x420] sm:$0xff] }
 0x4e4   :  { %5093 = vmatpush.bf16.msra.mxu1 %v7174_v31  ;;  %5108 = vmatpush.bf16.msra.mxu2 %v7180_v63  ;;  %v7204_v63 = vld [vmem:[#allocation3 + $0x428] sm:$0xff]  ;;  %v7183_v1 = vld [vmem:[#allocation3 + $0x380] sm:$0xff] }
 0x4e5   :  { %5086 = vmatpush.bf16.msrb.mxu3 %v7160_v2  ;;  %v2618_v8 = vmax.f32 %v2554_v21, 0.0  ;;  %v7214_v21 = vld [vmem:[#allocation3 + $0x478] sm:$0xff] }
 0x4e6   :  { %v2140_v62 = vpop.f32.mrf.mxu2  ;;  %v2341_v19 = vpop.f32.mrf.mxu3 }
 0x4e7   :  { %2791 = vst.msk [vmem:[#allocation2 + $0xd8] sm:$0xff] %vm1603_vm2, %v2618_v8  ;;  %v2419_v14 = vadd.f32 %v2341_v19, %v2136_v33  ;;  %v7195_v8 = vld [vmem:[#allocation3 + $0x3e0] sm:$0xff]  ;;  %v7201_v19 = vld [vmem:[#allocation3 + $0x410] sm:$0xff] }
 0x4e8   :  { %5094 = vmatpush.bf16.msra.mxu1 %v7173_v53  ;;  %5109 = vmatpush.bf16.msra.mxu2 %v7179_v35  ;;  %v1851_v59 = vpop.f32.mrf.mxu1 }
 0x4e9   :  { %5087 = vmatpush.bf16.msrb.mxu3 %v7159_v18  ;;  %v2487_v3 = vmul.f32 %v8616_v24, %v2419_v14  ;;  %v2141_v57 = vadd.f32 %v2140_v62, %v1851_v59  ;;  %v2867_v62 = vpack.c.bf16 %v2835_v16, %v2835_v16  ;;  %v2838_v16 = vld [vmem:[#allocation2 + $0x88] sm:$0xff] }
 0x4eb   :  { %v2555_v52 = vadd.f32 %v8623_v29, %v2487_v3  ;;  %v7194_v3 = vld [vmem:[#allocation3 + $0x3d8] sm:$0xff] }
 0x4ec   :  { %5095 = vmatpush.bf16.msra.mxu1 %v7172_v41  ;;  %5110 = vmatpush.bf16.msra.mxu2 %v7178_v15  ;;  %v7202_v41 = vld [vmem:[#allocation3 + $0x418] sm:$0xff] }
 0x4ed   :  { %5119 = vmatpush.bf16.msra.mxu3 %v7190_v37  ;;  %v2619_v48 = vmax.f32 %v2555_v52, 0.0 }
 0x4ee   :  { %5088 = vmatmul.bf16.vlgmr.msrb.gmra.mxu3 %v2864_v42  ;;  %v2143_v10 = vpop.f32.mrf.mxu2  ;;  %v2344_v47 = vpop.f32.mrf.mxu3 }
 0x4ef   :  { %v2420_v40 = vadd.f32 %v2344_v47, %v2139_v36  ;;  %2793 = vrot.lane.b32.xlu1 %v2619_v48, %s7412_s22  ;;  %v7193_v48 = vld [vmem:[#allocation3 + $0x3d0] sm:$0xff]  ;;  %v7199_v47 = vld [vmem:[#allocation3 + $0x400] sm:$0xff] }
 0x4f0   :  { %5096 = vmatpush.bf16.msra.mxu1 %v7171_v12  ;;  %5111 = vmatpush.bf16.msra.mxu2 %v7177_v4  ;;  %v1854_v11 = vpop.f32.mrf.mxu1  ;;  %v7213_v12 = vld [vmem:[#allocation3 + $0x470] sm:$0xff] }
 0x4f1   :  { %5120 = vmatpush.bf16.msra.mxu3 %v7189_v7  ;;  %v2488_v34 = vmul.f32 %v8616_v24, %v2420_v40  ;;  %v2144_v2 = vadd.f32 %v2143_v10, %v1854_v11 }
 0x4f3   :  { %v2556_v51 = vadd.f32 %v8623_v29, %v2488_v34  ;;  %v2837_v34 = vld [vmem:[#allocation2 + $0x80] sm:$0xff] }
 0x4f4   :  { %5097 = vmatpush.bf16.msra.mxu1 %v7170_v5  ;;  %5112 = vmatpush.bf16.msra.mxu2 %v7176_v55  ;;  %v7200_v55 = vld [vmem:[#allocation3 + $0x408] sm:$0xff] }
 0x4f5   :  { %5121 = vmatpush.bf16.msra.mxu3 %v7188_v58  ;;  %v2620_v6 = vmax.f32 %v2556_v51, 0.0  ;;  %v7212_v58 = vld [vmem:[#allocation3 + $0x468] sm:$0xff] }
 0x4f6   :  { %v2145_v61 = vpop.f32.mrf.mxu2  ;;  %v2346_v60 = vpop.f32.mrf.mxu3 }
 0x4f7   :  { %2797 = vst.msk [vmem:[#allocation2 + $0xe0] sm:$0xff] %vm1603_vm2, %v2620_v6  ;;  %v2421_v22 = vadd.f32 %v2346_v60, %v2141_v57  ;;  %v2869_v57 = vpack.c.bf16 %v2837_v34, %v2837_v34  ;;  %v7229_v6 = vld [vmem:[#allocation3 + $0x4f0] sm:$0xff]  ;;  %v7191_v60 = vld [vmem:[#allocation3 + $0x3c0] sm:$0xff] }
 0x4f8   :  { %5098 = vmatpush.bf16.msra.mxu1 %v7169_v54  ;;  %5113 = vmatpush.bf16.msra.mxu2 %v7175_v45  ;;  %v1856_v31 = vpop.f32.mrf.mxu1  ;;  %v7211_v54 = vld [vmem:[#allocation3 + $0x460] sm:$0xff]  ;;  %v7230_v45 = vld [vmem:[#allocation3 + $0x4f8] sm:$0xff] }
 0x4f9   :  { %5122 = vmatpush.bf16.msra.mxu3 %v7187_v25  ;;  %v2489_v17 = vmul.f32 %v8616_v24, %v2421_v22  ;;  %v2146_v14 = vadd.f32 %v2145_v61, %v1856_v31  ;;  %v7222_v22 = vld [vmem:[#allocation3 + $0x4b8] sm:$0xff]  ;;  %v7228_v31 = vld [vmem:[#allocation3 + $0x4e8] sm:$0xff] }
 0x4fb   :  { %5114 = vmatmul.bf16.vlgmr.msra.gmra.mxu2 %v2866_v49  ;;  %v2557_v20 = vadd.f32 %v8623_v29, %v2489_v17 }
 0x4fc   :  { %5145 = vmatpush.bf16.msrb.mxu2 %v7206_v38  ;;  %5099 = vmatpush.bf16.msra.mxu1 %v7168_v0  ;;  %v7192_v0 = vld [vmem:[#allocation3 + $0x3c8] sm:$0xff] }
 0x4fd   :  { %5123 = vmatpush.bf16.msra.mxu3 %v7186_v30  ;;  %v2621_v53 = vmax.f32 %v2557_v20, 0.0  ;;  %v7210_v30 = vld [vmem:[#allocation3 + $0x458] sm:$0xff]  ;;  %v7208_v20 = vld [vmem:[#allocation3 + $0x448] sm:$0xff] }
 0x4fe   :  { %v2148_v39 = vpop.f32.mrf.mxu2  ;;  %v2349_v35 = vpop.f32.mrf.mxu3 }
 0x4ff   :  { %v2422_v9 = vadd.f32 %v2349_v35, %v2144_v2  ;;  %2799 = vrot.lane.b32.xlu0 %v2621_v53, %s7412_s22  ;;  %v7227_v53 = vld [vmem:[#allocation3 + $0x4e0] sm:$0xff] }
 0x500   :  { %5146 = vmatpush.bf16.msrb.mxu2 %v7205_v23  ;;  %5100 = vmatpush.bf16.msra.mxu1 %v7167_v13  ;;  %v1859_v18 = vpop.f32.mrf.mxu1  ;;  %v7209_v13 = vld [vmem:[#allocation3 + $0x450] sm:$0xff]  ;;  %v7207_v35 = vld [vmem:[#allocation3 + $0x440] sm:$0xff] }
 0x501   :  { %5124 = vmatpush.bf16.msra.mxu3 %v7185_v44  ;;  %v2490_v15 = vmul.f32 %v8616_v24, %v2422_v9  ;;  %v2758_v37 = vpop.permute.xlu1 %2757  ;;  %v2149_v40 = vadd.f32 %v2148_v39, %v1859_v18  ;;  %v7220_v9 = vld [vmem:[#allocation3 + $0x4a8] sm:$0xff]  ;;  %v7238_v18 = vld [vmem:[#allocation3 + $0x538] sm:$0xff] }
 0x502   :  { %2760 = vst.msk [vmem:[#allocation2 + $0xa8] sm:$0xff] %vm2633_vm3, %v2758_v37 }
 0x503   :  { %5101 = vmatmul.bf16.vlgmr.msra.gmra.mxu1 %v2865_v56  ;;  %v2558_v33 = vadd.f32 %v8623_v29, %v2490_v15 }
 0x504   :  { %5132 = vmatpush.bf16.msrb.mxu1 %v7198_v27  ;;  %5147 = vmatpush.bf16.msrb.mxu2 %v7204_v63  ;;  %v2836_v63 = vld [vmem:[#allocation2 + $0x78] sm:$0xff] }
 0x505   :  { %5125 = vmatpush.bf16.msra.mxu3 %v7184_v46  ;;  %v2622_v42 = vmax.f32 %v2558_v33, 0.0 }
 0x506   :  { %v2150_v4 = vpop.f32.mrf.mxu2  ;;  %v2351_v7 = vpop.f32.mrf.mxu3 }
 0x507   :  { %2803 = vst.msk [vmem:[#allocation2 + $0xe8] sm:$0xff] %vm1603_vm2, %v2622_v42  ;;  %v2423_v59 = vadd.f32 %v2351_v7, %v2146_v14  ;;  %v2870_v14 = vpack.c.bf16 %v2838_v16, %v2838_v16  ;;  %v7225_v42 = vld [vmem:[#allocation3 + $0x4d0] sm:$0xff] }
 0x508   :  { %5133 = vmatpush.bf16.msrb.mxu1 %v7197_v50  ;;  %5148 = vmatpush.bf16.msrb.mxu2 %v7203_v43  ;;  %v1861_v5 = vpop.f32.mrf.mxu1  ;;  %v2868_v50 = vpack.c.bf16 %v2836_v63, %v2836_v63  ;;  %v7221_v43 = vld [vmem:[#allocation3 + $0x4b0] sm:$0xff] }
 0x509   :  { %5126 = vmatpush.bf16.msra.mxu3 %v7183_v1  ;;  %v2491_v52 = vmul.f32 %v8616_v24, %v2423_v59  ;;  %v2770_v36 = vpop.permute.xlu2 %2769  ;;  %v2151_v44 = vadd.f32 %v2150_v4, %v1861_v5  ;;  %v7237_v4 = vld [vmem:[#allocation3 + $0x530] sm:$0xff] }
 0x50a   :  { %2772 = vst.msk [vmem:[#allocation2 + $0xb8] sm:$0xff] %vm2633_vm3, %v2770_v36 }
 0x50b   :  { %v2559_v10 = vadd.f32 %v8623_v29, %v2491_v52  ;;  %v7236_v52 = vld [vmem:[#allocation3 + $0x528] sm:$0xff] }
 0x50c   :  { %5134 = vmatpush.bf16.msrb.mxu1 %v7196_v32  ;;  %5149 = vmatpush.bf16.msrb.mxu2 %v7202_v41  ;;  %v7226_v32 = vld [vmem:[#allocation3 + $0x4d8] sm:$0xff] }
 0x50d   :  { %5158 = vmatpush.bf16.msrb.mxu3 %v7214_v21  ;;  %v2623_v25 = vmax.f32 %v2559_v10, 0.0  ;;  %v7350_v21 = vld [vmem:[%s8714_s8] ss:$0 sm:$0xff] }
 0x50e   :  { %5127 = vmatmul.bf16.vlgmr.msra.gmra.mxu3 %v2867_v62  ;;  %v2153_v11 = vpop.f32.mrf.mxu2  ;;  %v2354_v38 = vpop.f32.mrf.mxu3  ;;  %v7219_v62 = vld [vmem:[#allocation3 + $0x4a0] sm:$0xff] }
 0x50f   :  { %v2424_v26 = vadd.f32 %v2354_v38, %v2149_v40  ;;  %2805 = vrot.lane.b32.xlu2 %v2623_v25, %s7412_s22  ;;  %v7235_v25 = vld [vmem:[#allocation3 + $0x520] sm:$0xff]  ;;  %v2840_v38 = vld [vmem:[#allocation2 + $0x98] sm:$0xff] }
 0x510   :  { %5135 = vmatpush.bf16.msrb.mxu1 %v7195_v8  ;;  %5150 = vmatpush.bf16.msrb.mxu2 %v7201_v19  ;;  %v1864_v51 = vpop.f32.mrf.mxu1 }
 0x511   :  { %5159 = vmatpush.bf16.msrb.mxu3 %v7213_v12  ;;  %v2492_v49 = vmul.f32 %v8616_v24, %v2424_v26  ;;  %v2764_v23 = vpop.permute.xlu0 %2763  ;;  %v2154_v1 = vadd.f32 %v2153_v11, %v1864_v51  ;;  %v7254_v11 = vld [vmem:[#allocation3 + $0x5b8] sm:$0xff]  ;;  %v7216_v26 = vld [vmem:[#allocation3 + $0x488] sm:$0xff] }
 0x512   :  { %2766 = vst.msk [vmem:[#allocation2 + $0xb0] sm:$0xff] %vm2633_vm3, %v2764_v23  ;;  %v2872_v23 = vpack.c.bf16 %v2840_v38, %v2840_v38 }
 0x513   :  { %v2560_v61 = vadd.f32 %v8623_v29, %v2492_v49 }
 0x514   :  { %5136 = vmatpush.bf16.msrb.mxu1 %v7194_v3  ;;  %5151 = vmatpush.bf16.msrb.mxu2 %v7200_v55  ;;  %v7218_v3 = vld [vmem:[#allocation3 + $0x498] sm:$0xff] }
 0x515   :  { %5160 = vmatpush.bf16.msrb.mxu3 %v7212_v58  ;;  %v2624_v27 = vmax.f32 %v2560_v61, 0.0  ;;  %v7224_v58 = vld [vmem:[#allocation3 + $0x4c8] sm:$0xff]  ;;  %v7215_v61 = vld [vmem:[#allocation3 + $0x480] sm:$0xff] }
 0x516   :  { %v2155_v28 = vpop.f32.mrf.mxu2  ;;  %v2356_v17 = vpop.f32.mrf.mxu3 }
 0x517   :  { %2809 = vst.msk [vmem:[#allocation2 + $0xf0] sm:$0xff] %vm1603_vm2, %v2624_v27  ;;  %v2425_v56 = vadd.f32 %v2356_v17, %v2151_v44  ;;  %v7252_v44 = vld [vmem:[#allocation3 + $0x5a8] sm:$0xff]  ;;  %v2839_v27 = vld [vmem:[#allocation2 + $0x90] sm:$0xff] }
 0x518   :  { %5137 = vmatpush.bf16.msrb.mxu1 %v7193_v48  ;;  %5152 = vmatpush.bf16.msrb.mxu2 %v7199_v47  ;;  %v1866_v46 = vpop.f32.mrf.mxu1  ;;  %v2871_v63 = vpack.c.bf16 %v2839_v27, %v2839_v27  ;;  %v7245_v17 = vld [vmem:[#allocation3 + $0x570] sm:$0xff] }
 0x519   :  { %5161 = vmatpush.bf16.msrb.mxu3 %v7211_v54  ;;  %v2493_v2 = vmul.f32 %v8616_v24, %v2425_v56  ;;  %v2156_v5 = vadd.f32 %v2155_v28, %v1866_v46  ;;  %v7217_v54 = vld [vmem:[#allocation3 + $0x490] sm:$0xff]  ;;  %v7232_v28 = vld [vmem:[#allocation3 + $0x508] sm:$0xff] }
 0x51b   :  { %5153 = vmatmul.bf16.vlgmr.msrb.gmra.mxu2 %v2869_v57  ;;  %v2561_v39 = vadd.f32 %v8623_v29, %v2493_v2  ;;  %v7253_v57 = vld [vmem:[#allocation3 + $0x5b0] sm:$0xff]  ;;  %v7231_v2 = vld [vmem:[#allocation3 + $0x500] sm:$0xff] }
 0x51c   :  { %5184 = vmatpush.bf16.msra.mxu2 %v7230_v45  ;;  %5138 = vmatpush.bf16.msrb.mxu1 %v7192_v0  ;;  %v7223_v45 = vld [vmem:[#allocation3 + $0x4c0] sm:$0xff]  ;;  %v7234_v0 = vld [vmem:[#allocation3 + $0x518] sm:$0xff] }
 0x51d   :  { %5162 = vmatpush.bf16.msrb.mxu3 %v7210_v30  ;;  %v2625_v41 = vmax.f32 %v2561_v39, 0.0  ;;  %v7250_v39 = vld [vmem:[#allocation3 + $0x598] sm:$0xff] }
 0x51e   :  { %v2359_v15 = vpop.f32.mrf.mxu3  ;;  %v4959_v37 = vpop.f32.mrf.mxu2 }
 0x51f   :  { %v2426_v33 = vadd.f32 %v2359_v15, %v2154_v1  ;;  %2811 = vrot.lane.b32.xlu1 %v2625_v41, %s7412_s22  ;;  %v7243_v1 = vld [vmem:[#allocation3 + $0x560] sm:$0xff]  ;;  %v7261_v15 = vld [vmem:[#allocation3 + $0x5f0] sm:$0xff] }
 0x520   :  { %5185 = vmatpush.bf16.msra.mxu2 %v7229_v6  ;;  %5139 = vmatpush.bf16.msrb.mxu1 %v7191_v60  ;;  %v4946_v8 = vpop.f32.mrf.mxu1 }
 0x521   :  { %5163 = vmatpush.bf16.msrb.mxu3 %v7209_v13  ;;  %v2494_v19 = vmul.f32 %v8616_v24, %v2426_v33  ;;  %v4947_v12 = vadd.f32 %v7350_v21, %v4946_v8  ;;  %v7233_v13 = vld [vmem:[#allocation3 + $0x510] sm:$0xff] }
 0x522   :  { %v7249_v21 = vld [vmem:[#allocation3 + $0x590] sm:$0xff] }
 0x523   :  { %5140 = vmatmul.bf16.vlgmr.msrb.gmra.mxu1 %v2868_v50  ;;  %v2562_v7 = vadd.f32 %v8623_v29, %v2494_v19  ;;  %v4960_v59 = vadd.f32 %v4959_v37, %v4947_v12  ;;  %v7251_v50 = vld [vmem:[#allocation3 + $0x5a0] sm:$0xff]  ;;  %v7248_v19 = vld [vmem:[#allocation3 + $0x588] sm:$0xff] }
 0x524   :  { %5171 = vmatpush.bf16.msra.mxu1 %v7222_v22  ;;  %5186 = vmatpush.bf16.msra.mxu2 %v7228_v31  ;;  %v7246_v22 = vld [vmem:[#allocation3 + $0x578] sm:$0xff]  ;;  %v7260_v12 = vld [vmem:[#allocation3 + $0x5e8] sm:$0xff] }
 0x525   :  { %5164 = vmatpush.bf16.msrb.mxu3 %v7208_v20  ;;  %v2626_v55 = vmax.f32 %v2562_v7, 0.0 }
 0x526   :  { %v2361_v36 = vpop.f32.mrf.mxu3  ;;  %v4961_v48 = vpop.f32.mrf.mxu2 }
 0x527   :  { %2815 = vst.msk [vmem:[#allocation2 + $0xf8] sm:$0xff] %vm1603_vm2, %v2626_v55  ;;  %v2427_v10 = vadd.f32 %v2361_v36, %v2156_v5  ;;  %v7278_v5 = vld [vmem:[#allocation3 + $0x678] sm:$0xff] }
 0x528   :  { %5172 = vmatpush.bf16.msra.mxu1 %v7221_v43  ;;  %5187 = vmatpush.bf16.msra.mxu2 %v7227_v53  ;;  %v4948_v47 = vpop.f32.mrf.mxu1  ;;  %v7244_v53 = vld [vmem:[#allocation3 + $0x568] sm:$0xff]  ;;  %v7258_v36 = vld [vmem:[#allocation3 + $0x5d8] sm:$0xff] }
 0x529   :  { %5165 = vmatpush.bf16.msrb.mxu3 %v7207_v35  ;;  %v2495_v40 = vmul.f32 %v8616_v24, %v2427_v10  ;;  %v7262_v35 = vld [vmem:[#allocation3 + $0x5f8] sm:$0xff]  ;;  %v7277_v10 = vld [vmem:[#allocation3 + $0x670] sm:$0xff]  ;;  %v7239_v47 = vld [vmem:[#allocation3 + $0x540] sm:$0xff] }
 0x52b   :  { %v2563_v34 = vadd.f32 %v8623_v29, %v2495_v40  ;;  %v7270_v40 = vld [vmem:[#allocation3 + $0x638] sm:$0xff] }
 0x52c   :  { %5173 = vmatpush.bf16.msra.mxu1 %v7220_v9  ;;  %5188 = vmatpush.bf16.msra.mxu2 %v7226_v32  ;;  %v2841_v9 = vld [vmem:[#allocation2 + $0xa0] sm:$0xff] }
 0x52d   :  { %5197 = vmatpush.bf16.msra.mxu3 %v7238_v18  ;;  %v2627_v51 = vmax.f32 %v2563_v34, 0.0  ;;  %v2873_v41 = vpack.c.bf16 %v2841_v9, %v2841_v9  ;;  %v7282_v9 = vld [vmem:[#allocation3 + $0x698] sm:$0xff] }
 0x52e   :  { %5166 = vmatmul.bf16.vlgmr.msrb.gmra.mxu3 %v2870_v14  ;;  %v4972_v30 = vpop.f32.mrf.mxu3  ;;  %v4998_v49 = vpop.f32.mrf.mxu2 }
 0x52f   :  { %v4973_v24 = vadd.f32 %v4972_v30, %v4960_v59  ;;  %2817 = vrot.lane.b32.xlu0 %v2627_v51, %s7412_s22  ;;  %v7247_v59 = vld [vmem:[#allocation3 + $0x580] sm:$0xff] }
 0x530   :  { %5174 = vmatpush.bf16.msra.mxu1 %v7219_v62  ;;  %5189 = vmatpush.bf16.msra.mxu2 %v7225_v42  ;;  %v4985_v6 = vpop.f32.mrf.mxu1  ;;  %v7242_v62 = vld [vmem:[#allocation3 + $0x558] sm:$0xff]  ;;  %v7241_v42 = vld [vmem:[#allocation3 + $0x550] sm:$0xff]  ;;  %v7275_v51 = vld [vmem:[#allocation3 + $0x660] sm:$0xff] }
 0x531   :  { %5198 = vmatpush.bf16.msra.mxu3 %v7237_v4  ;;  %v4986_v29 = vadd.f32 %v4985_v6, %v4973_v24  ;;  %v2776_v60 = vpop.permute.xlu1 %2775  ;;  %v7255_v30 = vld [vmem:[#allocation3 + $0x5c0] sm:$0xff]  ;;  %v7286_v24 = vld [vmem:[#allocation3 + $0x6b8] sm:$0xff] }
 0x532   :  { %2778 = vst.msk [vmem:[#allocation2 + $0xc0] sm:$0xff] %vm2633_vm3, %v2776_v60  ;;  %v2844_v6 = vld [vmem:[#allocation2 + $0xb8] sm:$0xff]  ;;  %v7273_v60 = vld [vmem:[#allocation3 + $0x650] sm:$0xff] }
 0x533   :  { %v4999_v31 = vadd.f32 %v4998_v49, %v4986_v29  ;;  %v7268_v49 = vld [vmem:[#allocation3 + $0x628] sm:$0xff]  ;;  %v2876_v29 = vpack.c.bf16 %v2844_v6, %v2844_v6  ;;  %v7325_v6 = vld [vmem:[#allocation3 + $0x7f0] sm:$0xff] }
 0x534   :  { %5175 = vmatpush.bf16.msra.mxu1 %v7218_v3  ;;  %5190 = vmatpush.bf16.msra.mxu2 %v7224_v58  ;;  %v7259_v3 = vld [vmem:[#allocation3 + $0x5e0] sm:$0xff]  ;;  %v2843_v58 = vld [vmem:[#allocation2 + $0xb0] sm:$0xff] }
 0x535   :  { %5199 = vmatpush.bf16.msra.mxu3 %v7236_v52  ;;  %v7240_v52 = vld [vmem:[#allocation3 + $0x548] sm:$0xff]  ;;  %v2875_v48 = vpack.c.bf16 %v2843_v58, %v2843_v58  ;;  %v7291_v58 = vld [vmem:[#allocation3 + $0x6e0] sm:$0xff] }
 0x536   :  { %v4974_v56 = vpop.f32.mrf.mxu3  ;;  %v5000_v46 = vpop.f32.mrf.mxu2 }
 0x537   :  { %v7265_v46 = vld [vmem:[#allocation3 + $0x610] sm:$0xff] }
 0x538   :  { %5176 = vmatpush.bf16.msra.mxu1 %v7217_v54  ;;  %5191 = vmatpush.bf16.msra.mxu2 %v7223_v45  ;;  %v4987_v20 = vpop.f32.mrf.mxu1  ;;  %v7257_v54 = vld [vmem:[#allocation3 + $0x5d0] sm:$0xff] }
 0x539   :  { %5200 = vmatpush.bf16.msra.mxu3 %v7235_v25  ;;  %v2788_v43 = vpop.permute.xlu2 %2787  ;;  %v7276_v25 = vld [vmem:[#allocation3 + $0x668] sm:$0xff]  ;;  %v7283_v20 = vld [vmem:[#allocation3 + $0x6a0] sm:$0xff] }
 0x53a   :  { %2790 = vst.msk [vmem:[#allocation2 + $0xd0] sm:$0xff] %vm2633_vm3, %v2788_v43 }
 0x53b   :  { %5192 = vmatmul.bf16.vlgmr.msra.gmra.mxu2 %v2872_v23 }
 0x53c   :  { %5223 = vmatpush.bf16.msrb.mxu2 %v7254_v11  ;;  %5177 = vmatpush.bf16.msra.mxu1 %v7216_v26  ;;  %v2842_v11 = vld [vmem:[#allocation2 + $0xa8] sm:$0xff] }
 0x53d   :  { %5201 = vmatpush.bf16.msra.mxu3 %v7234_v0  ;;  %v2874_v34 = vpack.c.bf16 %v2842_v11, %v2842_v11  ;;  %v7256_v26 = vld [vmem:[#allocation3 + $0x5c8] sm:$0xff]  ;;  %v7269_v0 = vld [vmem:[#allocation3 + $0x630] sm:$0xff] }
 0x53e   :  { %v5011_v32 = vpop.f32.mrf.mxu3  ;;  %v5037_v18 = vpop.f32.mrf.mxu2 }
 0x53f   :  { %v5012_v37 = vadd.f32 %v5011_v32, %v4999_v31  ;;  %v7266_v31 = vld [vmem:[#allocation3 + $0x618] sm:$0xff]  ;;  %v7301_v32 = vld [vmem:[#allocation3 + $0x730] sm:$0xff] }
 0x540   :  { %5224 = vmatpush.bf16.msrb.mxu2 %v7253_v57  ;;  %5178 = vmatpush.bf16.msra.mxu1 %v7215_v61  ;;  %v5024_v16 = vpop.f32.mrf.mxu1  ;;  %v7274_v57 = vld [vmem:[#allocation3 + $0x658] sm:$0xff]  ;;  %v7267_v61 = vld [vmem:[#allocation3 + $0x620] sm:$0xff] }
 0x541   :  { %5202 = vmatpush.bf16.msra.mxu3 %v7233_v13  ;;  %v5025_v33 = vadd.f32 %v5024_v16, %v5012_v37  ;;  %v2782_v8 = vpop.permute.xlu0 %2781  ;;  %v7285_v13 = vld [vmem:[#allocation3 + $0x6b0] sm:$0xff]  ;;  %v7300_v16 = vld [vmem:[#allocation3 + $0x728] sm:$0xff] }
 0x542   :  { %2784 = vst.msk [vmem:[#allocation2 + $0xc8] sm:$0xff] %vm2633_vm3, %v2782_v8 }
 0x543   :  { %5179 = vmatmul.bf16.vlgmr.msra.gmra.mxu1 %v2871_v63  ;;  %v5038_v14 = vadd.f32 %v5037_v18, %v5025_v33  ;;  %v7272_v63 = vld [vmem:[#allocation3 + $0x648] sm:$0xff]  ;;  %v2845_v33 = vld [vmem:[#allocation2 + $0xc0] sm:$0xff] }
 0x544   :  { %5210 = vmatpush.bf16.msrb.mxu1 %v7246_v22  ;;  %5225 = vmatpush.bf16.msrb.mxu2 %v7252_v44 }
 0x545   :  { %5203 = vmatpush.bf16.msra.mxu3 %v7232_v28  ;;  %v7284_v28 = vld [vmem:[#allocation3 + $0x6a8] sm:$0xff] }
 0x546   :  { %v5013_v4 = vpop.f32.mrf.mxu3  ;;  %v5039_v7 = vpop.f32.mrf.mxu2 }
 0x547   :  { %v7279_v4 = vld [vmem:[#allocation3 + $0x680] sm:$0xff]  ;;  %v7292_v7 = vld [vmem:[#allocation3 + $0x6e8] sm:$0xff] }
 0x548   :  { %5211 = vmatpush.bf16.msrb.mxu1 %v7245_v17  ;;  %5226 = vmatpush.bf16.msrb.mxu2 %v7251_v50  ;;  %v5026_v55 = vpop.f32.mrf.mxu1  ;;  %v7271_v50 = vld [vmem:[#allocation3 + $0x640] sm:$0xff] }
 0x549   :  { %5204 = vmatpush.bf16.msra.mxu3 %v7231_v2  ;;  %v7302_v2 = vld [vmem:[#allocation3 + $0x738] sm:$0xff]  ;;  %v2847_v55 = vld [vmem:[#allocation2 + $0xd0] sm:$0xff] }
 0x54c   :  { %5212 = vmatpush.bf16.msrb.mxu1 %v7244_v53  ;;  %5227 = vmatpush.bf16.msrb.mxu2 %v7250_v39  ;;  %v2846_v39 = vld [vmem:[#allocation2 + $0xc8] sm:$0xff] }
 0x54d   :  { %5236 = vmatpush.bf16.msrb.mxu3 %v7262_v35  ;;  %v7264_v35 = vld [vmem:[#allocation3 + $0x608] sm:$0xff] }
 0x54e   :  { %5205 = vmatmul.bf16.vlgmr.msra.gmra.mxu3 %v2873_v41  ;;  %v7263_v41 = vld [vmem:[#allocation3 + $0x600] sm:$0xff] }
 0x550   :  { %5213 = vmatpush.bf16.msrb.mxu1 %v7243_v1  ;;  %5228 = vmatpush.bf16.msrb.mxu2 %v7249_v21  ;;  %v2878_v1 = vpack.c.bf16 %v2846_v39, %v2846_v39  ;;  %v7281_v21 = vld [vmem:[#allocation3 + $0x690] sm:$0xff] }
 0x551   :  { %5237 = vmatpush.bf16.msrb.mxu3 %v7261_v15  ;;  %v5050_v45 = vpop.f32.mrf.mxu3  ;;  %v7294_v15 = vld [vmem:[#allocation3 + $0x6f8] sm:$0xff] }
 0x552   :  { %v5051_v38 = vadd.f32 %v5050_v45, %v5038_v14  ;;  %v7299_v14 = vld [vmem:[#allocation3 + $0x720] sm:$0xff]  ;;  %v7296_v45 = vld [vmem:[#allocation3 + $0x708] sm:$0xff] }
 0x554   :  { %5214 = vmatpush.bf16.msrb.mxu1 %v7242_v62  ;;  %5229 = vmatpush.bf16.msrb.mxu2 %v7248_v19  ;;  %v2877_v62 = vpack.c.bf16 %v2845_v33, %v2845_v33  ;;  %v7280_v19 = vld [vmem:[#allocation3 + $0x688] sm:$0xff] }
 0x555   :  { %5238 = vmatpush.bf16.msrb.mxu3 %v7260_v12  ;;  %v7293_v12 = vld [vmem:[#allocation3 + $0x6f0] sm:$0xff] }
 0x558   :  { %5215 = vmatpush.bf16.msrb.mxu1 %v7241_v42  ;;  %5230 = vmatpush.bf16.msrb.mxu2 %v7247_v59 }
 0x559   :  { %5239 = vmatpush.bf16.msrb.mxu3 %v7259_v3  ;;  %v5052_v23 = vpop.f32.mrf.mxu3  ;;  %v7298_v3 = vld [vmem:[#allocation3 + $0x718] sm:$0xff] }
 0x55a   :  { %v7288_v23 = vld [vmem:[#allocation3 + $0x6c8] sm:$0xff] }
 0x55b   :  { %5231 = vmatmul.bf16.vlgmr.msrb.gmra.mxu2 %v2875_v48  ;;  %v7309_v48 = vld [vmem:[#allocation3 + $0x770] sm:$0xff] }
 0x55c   :  { %5262 = vmatpush.bf16.msra.mxu2 %v7278_v5  ;;  %5216 = vmatpush.bf16.msrb.mxu1 %v7240_v52  ;;  %v7310_v5 = vld [vmem:[#allocation3 + $0x778] sm:$0xff]  ;;  %v2879_v52 = vpack.c.bf16 %v2847_v55, %v2847_v55 }
 0x55d   :  { %5240 = vmatpush.bf16.msrb.mxu3 %v7258_v36  ;;  %v7297_v36 = vld [vmem:[#allocation3 + $0x710] sm:$0xff] }
 0x55e   :  { %v5076_v22 = vpop.f32.mrf.mxu2 }
 0x560   :  { %5263 = vmatpush.bf16.msra.mxu2 %v7277_v10  ;;  %5217 = vmatpush.bf16.msrb.mxu1 %v7239_v47  ;;  %v5063_v44 = vpop.f32.mrf.mxu1 }
 0x561   :  { %5241 = vmatpush.bf16.msrb.mxu3 %v7257_v54  ;;  %v5064_v27 = vadd.f32 %v5063_v44, %v5051_v38  ;;  %v2794_v56 = vpop.permute.xlu1 %2793  ;;  %v7289_v38 = vld [vmem:[#allocation3 + $0x6d0] sm:$0xff]  ;;  %v7324_v44 = vld [vmem:[#allocation3 + $0x7e8] sm:$0xff] }
 0x562   :  { %2796 = vst.msk [vmem:[#allocation2 + $0xd8] sm:$0xff] %vm2633_vm3, %v2794_v56  ;;  %v7303_v56 = vld [vmem:[#allocation3 + $0x740] sm:$0xff] }
 0x563   :  { %5218 = vmatmul.bf16.vlgmr.msrb.gmra.mxu1 %v2874_v34  ;;  %v5077_v17 = vadd.f32 %v5076_v22, %v5064_v27  ;;  %v7295_v34 = vld [vmem:[#allocation3 + $0x700] sm:$0xff] }
 0x564   :  { %5249 = vmatpush.bf16.msra.mxu1 %v7270_v40  ;;  %5264 = vmatpush.bf16.msra.mxu2 %v7276_v25  ;;  %v7290_v40 = vld [vmem:[#allocation3 + $0x6d8] sm:$0xff]  ;;  %v7308_v25 = vld [vmem:[#allocation3 + $0x768] sm:$0xff] }
 0x565   :  { %5242 = vmatpush.bf16.msrb.mxu3 %v7256_v26  ;;  %v7307_v26 = vld [vmem:[#allocation3 + $0x760] sm:$0xff] }
 0x566   :  { %v5078_v43 = vpop.f32.mrf.mxu2 }
 0x567   :  { %v7322_v43 = vld [vmem:[#allocation3 + $0x7d8] sm:$0xff] }
 0x568   :  { %5250 = vmatpush.bf16.msra.mxu1 %v7269_v0  ;;  %5265 = vmatpush.bf16.msra.mxu2 %v7275_v51  ;;  %v5065_v53 = vpop.f32.mrf.mxu1  ;;  %v7326_v51 = vld [vmem:[#allocation3 + $0x7f8] sm:$0xff] }
 0x569   :  { %5243 = vmatpush.bf16.msrb.mxu3 %v7255_v30  ;;  %v2806_v18 = vpop.permute.xlu2 %2805  ;;  %v2848_v22 = vld [vmem:[#allocation2 + $0xd8] sm:$0xff]  ;;  %v7315_v53 = vld [vmem:[#allocation3 + $0x7a0] sm:$0xff] }
 0x56a   :  { %2808 = vst.msk [vmem:[#allocation2 + $0xe8] sm:$0xff] %vm2633_vm3, %v2806_v18  ;;  %v7314_v18 = vld [vmem:[#allocation3 + $0x798] sm:$0xff] }
 0x56c   :  { %5251 = vmatpush.bf16.msra.mxu1 %v7268_v49  ;;  %5266 = vmatpush.bf16.msra.mxu2 %v7274_v57  ;;  %v7306_v57 = vld [vmem:[#allocation3 + $0x758] sm:$0xff] }
 0x56d   :  { %5275 = vmatpush.bf16.msra.mxu3 %v7286_v24 }
 0x56e   :  { %5244 = vmatmul.bf16.vlgmr.msrb.gmra.mxu3 %v2876_v29  ;;  %v7305_v29 = vld [vmem:[#allocation3 + $0x750] sm:$0xff] }
 0x570   :  { %5252 = vmatpush.bf16.msra.mxu1 %v7267_v61  ;;  %5267 = vmatpush.bf16.msra.mxu2 %v7273_v60  ;;  %v7287_v61 = vld [vmem:[#allocation3 + $0x6c0] sm:$0xff]  ;;  %v7318_v60 = vld [vmem:[#allocation3 + $0x7b8] sm:$0xff] }
 0x571   :  { %5276 = vmatpush.bf16.msra.mxu3 %v7285_v13  ;;  %v5089_v37 = vpop.f32.mrf.mxu3  ;;  %v2800_v42 = vpop.permute.xlu0 %2799 }
 0x572   :  { %v5090_v8 = vadd.f32 %v5089_v37, %v5077_v17  ;;  %2802 = vst.msk [vmem:[#allocation2 + $0xe0] sm:$0xff] %vm2633_vm3, %v2800_v42  ;;  %v7323_v17 = vld [vmem:[#allocation3 + $0x7e0] sm:$0xff] }
 0x573   :  { %v7319_v37 = vld [vmem:[#allocation3 + $0x7c0] sm:$0xff] }
 0x574   :  { %5253 = vmatpush.bf16.msra.mxu1 %v7266_v31  ;;  %5268 = vmatpush.bf16.msra.mxu2 %v7272_v63  ;;  %v2880_v31 = vpack.c.bf16 %v2848_v22, %v2848_v22  ;;  %v7304_v63 = vld [vmem:[#allocation3 + $0x748] sm:$0xff]  ;;  %v7329_v22 = vld [vmem:[%s8715_s9 + $0x10] sm:$0xff] }
 0x575   :  { %5277 = vmatpush.bf16.msra.mxu3 %v7284_v28  ;;  %v7317_v28 = vld [vmem:[#allocation3 + $0x7b0] sm:$0xff] }
 0x578   :  { %5254 = vmatpush.bf16.msra.mxu1 %v7265_v46  ;;  %5269 = vmatpush.bf16.msra.mxu2 %v7271_v50  ;;  %v7316_v46 = vld [vmem:[#allocation3 + $0x7a8] sm:$0xff] }
 0x579   :  { %5278 = vmatpush.bf16.msra.mxu3 %v7283_v20  ;;  %v5091_v59 = vpop.f32.mrf.mxu3  ;;  %v2849_v49 = vld [vmem:[#allocation2 + $0xe0] sm:$0xff] }
 0x57a   :  { %v2881_v24 = vpack.c.bf16 %v2849_v49, %v2849_v49  ;;  %v7334_v49 = vld [vmem:[%s8715_s9 + $0x38] sm:$0xff] }
 0x57b   :  { %5270 = vmatmul.bf16.vlgmr.msra.gmra.mxu2 %v2878_v1 }
 0x57c   :  { %5301 = vmatpush.bf16.msrb.mxu2 %v7302_v2  ;;  %5255 = vmatpush.bf16.msra.mxu1 %v7264_v35  ;;  %v2850_v2 = vld [vmem:[#allocation2 + $0xe8] sm:$0xff]  ;;  %v7321_v35 = vld [vmem:[#allocation3 + $0x7d0] sm:$0xff] }
 0x57d   :  { %5279 = vmatpush.bf16.msra.mxu3 %v7282_v9  ;;  %v2882_v39 = vpack.c.bf16 %v2850_v2, %v2850_v2 }
 0x57e   :  { %v5115_v10 = vpop.f32.mrf.mxu2 }
 0x580   :  { %5302 = vmatpush.bf16.msrb.mxu2 %v7301_v32  ;;  %5256 = vmatpush.bf16.msra.mxu1 %v7263_v41  ;;  %v5102_v47 = vpop.f32.mrf.mxu1  ;;  %v7320_v41 = vld [vmem:[#allocation3 + $0x7c8] sm:$0xff] }
 0x581   :  { %5280 = vmatpush.bf16.msra.mxu3 %v7281_v21  ;;  %v5103_v54 = vadd.f32 %v5102_v47, %v5090_v8  ;;  %v7312_v8 = vld [vmem:[#allocation3 + $0x788] sm:$0xff] }
 0x583   :  { %5257 = vmatmul.bf16.vlgmr.msra.gmra.mxu1 %v2877_v62  ;;  %v5116_v11 = vadd.f32 %v5115_v10, %v5103_v54 }
 0x584   :  { %5288 = vmatpush.bf16.msrb.mxu1 %v7294_v15  ;;  %5303 = vmatpush.bf16.msrb.mxu2 %v7300_v16  ;;  %v7313_v15 = vld [vmem:[#allocation3 + $0x790] sm:$0xff] }
 0x585   :  { %5281 = vmatpush.bf16.msra.mxu3 %v7280_v19  ;;  %v7311_v19 = vld [vmem:[#allocation3 + $0x780] sm:$0xff] }
 0x586   :  { %v5117_v0 = vpop.f32.mrf.mxu2 }
 0x588   :  { %5289 = vmatpush.bf16.msrb.mxu1 %v7293_v12  ;;  %5304 = vmatpush.bf16.msrb.mxu2 %v7299_v14  ;;  %v5104_v30 = vpop.f32.mrf.mxu1 }
 0x589   :  { %5282 = vmatpush.bf16.msra.mxu3 %v7279_v4 }
 0x58c   :  { %5290 = vmatpush.bf16.msrb.mxu1 %v7292_v7  ;;  %5305 = vmatpush.bf16.msrb.mxu2 %v7298_v3 }
 0x58d   :  { %5314 = vmatpush.bf16.msrb.mxu3 %v7310_v5 }
 0x58e   :  { %5283 = vmatmul.bf16.vlgmr.msra.gmra.mxu3 %v2879_v52 }
 0x590   :  { %5291 = vmatpush.bf16.msrb.mxu1 %v7291_v58  ;;  %5306 = vmatpush.bf16.msrb.mxu2 %v7297_v36 }
 0x591   :  { %5315 = vmatpush.bf16.msrb.mxu3 %v7309_v48  ;;  %v5128_v13 = vpop.f32.mrf.mxu3  ;;  %v2812_v20 = vpop.permute.xlu1 %2811 }
 0x592   :  { %v5129_v27 = vadd.f32 %v5128_v13, %v5116_v11  ;;  %2814 = vst.msk [vmem:[#allocation2 + $0xf0] sm:$0xff] %vm2633_vm3, %v2812_v20  ;;  %v7330_v13 = vld [vmem:[%s8715_s9 + $0x18] sm:$0xff] }
 0x594   :  { %5292 = vmatpush.bf16.msrb.mxu1 %v7290_v40  ;;  %5307 = vmatpush.bf16.msrb.mxu2 %v7296_v45 }
 0x595   :  { %5316 = vmatpush.bf16.msrb.mxu3 %v7308_v25 }
 0x598   :  { %5293 = vmatpush.bf16.msrb.mxu1 %v7289_v38  ;;  %5308 = vmatpush.bf16.msrb.mxu2 %v7295_v34 }
 0x599   :  { %5317 = vmatpush.bf16.msrb.mxu3 %v7307_v26  ;;  %v5130_v50 = vpop.f32.mrf.mxu3  ;;  %v2851_v14 = vld [vmem:[#allocation2 + $0xf0] sm:$0xff] }
 0x59a   :  { %v2883_v4 = vpack.c.bf16 %v2851_v14, %v2851_v14 }
 0x59b   :  { %5309 = vmatmul.bf16.vlgmr.msrb.gmra.mxu2 %v2881_v24  ;;  %v7333_v24 = vld [vmem:[%s8715_s9 + $0x30] sm:$0xff] }
 0x59c   :  { %5340 = vmatpush.bf16.msra.mxu2 %v7326_v51  ;;  %5294 = vmatpush.bf16.msrb.mxu1 %v7288_v23 }
 0x59d   :  { %5318 = vmatpush.bf16.msrb.mxu3 %v7306_v57 }
 0x59e   :  { %v5154_v9 = vpop.f32.mrf.mxu2 }
 0x5a0   :  { %5341 = vmatpush.bf16.msra.mxu2 %v7325_v6  ;;  %5295 = vmatpush.bf16.msrb.mxu1 %v7287_v61  ;;  %v5141_v1 = vpop.f32.mrf.mxu1  ;;  %v7332_v61 = vld [vmem:[%s8715_s9 + $0x28] sm:$0xff] }
 0x5a1   :  { %5319 = vmatpush.bf16.msrb.mxu3 %v7305_v29  ;;  %v5142_v32 = vadd.f32 %v5141_v1, %v5129_v27  ;;  %v2818_v62 = vpop.permute.xlu0 %2817  ;;  %v7331_v29 = vld [vmem:[%s8715_s9 + $0x20] sm:$0xff] }
 0x5a2   :  { %2820 = vst.msk [vmem:[#allocation2 + $0xf8] sm:$0xff] %vm2633_vm3, %v2818_v62 }
 0x5a3   :  { %5296 = vmatmul.bf16.vlgmr.msrb.gmra.mxu1 %v2880_v31  ;;  %v5155_v21 = vadd.f32 %v5154_v9, %v5142_v32  ;;  %v7328_v31 = vld [vmem:[%s8715_s9 + $0x8] sm:$0xff] }
 0x5a4   :  { %5327 = vmatpush.bf16.msra.mxu1 %v7318_v60  ;;  %5342 = vmatpush.bf16.msra.mxu2 %v7324_v44 }
 0x5a5   :  { %5320 = vmatpush.bf16.msrb.mxu3 %v7304_v63 }
 0x5a6   :  { %v5156_v16 = vpop.f32.mrf.mxu2 }
 0x5a7   :  { %v7351_v16 = vld [vmem:[%s8716_s10] ss:$0 sm:$0xff] }
 0x5a8   :  { %5328 = vmatpush.bf16.msra.mxu1 %v7317_v28  ;;  %5343 = vmatpush.bf16.msra.mxu2 %v7323_v17  ;;  %v5143_v33 = vpop.f32.mrf.mxu1  ;;  %v7327_v17 = vld [vmem:[%s8715_s9] sm:$0xff] }
 0x5a9   :  { %5321 = vmatpush.bf16.msrb.mxu3 %v7303_v56  ;;  %v2852_v7 = vld [vmem:[#allocation2 + $0xf8] sm:$0xff] }
 0x5aa   :  { %v2884_v59 = vpack.c.bf16 %v2852_v7, %v2852_v7 }
 0x5ac   :  { %5329 = vmatpush.bf16.msra.mxu1 %v7316_v46  ;;  %5344 = vmatpush.bf16.msra.mxu2 %v7322_v43 }
 0x5ad   :  { %5322 = vmatmul.bf16.vlgmr.msrb.gmra.mxu3 %v2882_v39 }
 0x5ae   :  { %5423 = vmatpush.bf16.msra.mxu3 %v7334_v49 }
 0x5b0   :  { %5330 = vmatpush.bf16.msra.mxu1 %v7315_v53  ;;  %5345 = vmatpush.bf16.msra.mxu2 %v7321_v35 }
 0x5b1   :  { %v5167_v12 = vpop.f32.mrf.mxu3 }
 0x5b2   :  { %v5168_v42 = vadd.f32 %v5167_v12, %v5155_v21  ;;  %5424 = vmatpush.bf16.msra.mxu3 %v7333_v24 }
 0x5b4   :  { %5331 = vmatpush.bf16.msra.mxu1 %v7314_v18  ;;  %5346 = vmatpush.bf16.msra.mxu2 %v7320_v41 }
 0x5b6   :  { %5425 = vmatpush.bf16.msra.mxu3 %v7332_v61 }
 0x5b8   :  { %5332 = vmatpush.bf16.msra.mxu1 %v7313_v15  ;;  %5347 = vmatpush.bf16.msra.mxu2 %v7319_v37 }
 0x5b9   :  { %v5169_v3 = vpop.f32.mrf.mxu3 }
 0x5ba   :  { %5426 = vmatpush.bf16.msra.mxu3 %v7331_v29 }
 0x5bb   :  { %5348 = vmatmul.bf16.vlgmr.msra.gmra.mxu2 %v2884_v59 }
 0x5bc   :  { %5333 = vmatpush.bf16.msra.mxu1 %v7312_v8 }
 0x5be   :  { %v5193_v5 = vpop.f32.mrf.mxu2  ;;  %5427 = vmatpush.bf16.msra.mxu3 %v7330_v13 }
 0x5c0   :  { %5334 = vmatpush.bf16.msra.mxu1 %v7311_v19  ;;  %v5180_v55 = vpop.f32.mrf.mxu1 }
 0x5c1   :  { %v5181_v58 = vadd.f32 %v5180_v55, %v5168_v42 }
 0x5c2   :  { %5428 = vmatpush.bf16.msra.mxu3 %v7329_v22 }
 0x5c3   :  { %5335 = vmatmul.bf16.vlgmr.msra.gmra.mxu1 %v2883_v4  ;;  %v5194_v52 = vadd.f32 %v5193_v5, %v5181_v58 }
 0x5c6   :  { %v5195_v36 = vpop.f32.mrf.mxu2  ;;  %5429 = vmatpush.bf16.msra.mxu3 %v7328_v31 }
 0x5c8   :  { %v5182_v48 = vpop.f32.mrf.mxu1 }
 0x5ca   :  { %5430 = vmatpush.bf16.msra.mxu3 %v7327_v17 }
 0x5d1   :  { %v5206_v10 = vpop.f32.mrf.mxu3 }
 0x5d2   :  { %v5207_v47 = vadd.f32 %v5206_v10, %v5194_v52 }
 0x5d9   :  { %v5208_v54 = vpop.f32.mrf.mxu3 }
 0x5de   :  { %v5232_v40 = vpop.f32.mrf.mxu2 }
 0x5e0   :  { %v5219_v45 = vpop.f32.mrf.mxu1 }
 0x5e1   :  { %v5220_v25 = vadd.f32 %v5219_v45, %v5207_v47 }
 0x5e3   :  { %v5233_v11 = vadd.f32 %v5232_v40, %v5220_v25 }
 0x5e6   :  { %v5234_v38 = vpop.f32.mrf.mxu2 }
 0x5e8   :  { %v5221_v34 = vpop.f32.mrf.mxu1 }
 0x5f1   :  { %v5245_v26 = vpop.f32.mrf.mxu3 }
 0x5f2   :  { %v5246_v46 = vadd.f32 %v5245_v26, %v5233_v11 }
 0x5f9   :  { %v5247_v0 = vpop.f32.mrf.mxu3 }
 0x5fe   :  { %v5271_v51 = vpop.f32.mrf.mxu2 }
 0x600   :  { %v5258_v30 = vpop.f32.mrf.mxu1 }
 0x601   :  { %v5259_v50 = vadd.f32 %v5258_v30, %v5246_v46 }
 0x603   :  { %v5272_v20 = vadd.f32 %v5271_v51, %v5259_v50 }
 0x606   :  { %v5273_v23 = vpop.f32.mrf.mxu2 }
 0x608   :  { %v5260_v57 = vpop.f32.mrf.mxu1 }
 0x611   :  { %v5284_v6 = vpop.f32.mrf.mxu3 }
 0x612   :  { %v5285_v2 = vadd.f32 %v5284_v6, %v5272_v20 }
 0x619   :  { %v5286_v60 = vpop.f32.mrf.mxu3 }
 0x61e   :  { %v5310_v44 = vpop.f32.mrf.mxu2 }
 0x620   :  { %v5297_v27 = vpop.f32.mrf.mxu1 }
 0x621   :  { %v5298_v53 = vadd.f32 %v5297_v27, %v5285_v2 }
 0x623   :  { %v5311_v35 = vadd.f32 %v5310_v44, %v5298_v53 }
 0x626   :  { %v5312_v63 = vpop.f32.mrf.mxu2 }
 0x628   :  { %v5299_v28 = vpop.f32.mrf.mxu1 }
 0x630   :  { %v5323_v56 = vpop.f32.mrf.mxu3 }
 0x631   :  { %v5324_v9 = vadd.f32 %v5323_v56, %v5311_v35 }
 0x638   :  { %v5325_v43 = vpop.f32.mrf.mxu3 }
 0x63e   :  { %v5349_v32 = vpop.f32.mrf.mxu2 }
 0x640   :  { %v5336_v39 = vpop.f32.mrf.mxu1 }
 0x641   :  { %v5337_v1 = vadd.f32 %v5336_v39, %v5324_v9 }
 0x643   :  { %v5350_v41 = vadd.f32 %v5349_v32, %v5337_v1 }
 0x645   :  { %v5353_v21 = vmax.f32 %v5350_v41, 0.0 }
 0x646   :  { %v5351_v37 = vpop.f32.mrf.mxu2 }
 0x647   :  { %v5354_v15 = vpack.c.bf16 %v5353_v21, %v5353_v21 }
 0x648   :  { %v5338_v18 = vpop.f32.mrf.mxu1 }
 0x649   :  { %5431 = vmatmul.bf16.vlgmr.msra.gmra.mxu3 %v5354_v15 }
 0x6cc   :  { %v5432_v33 = vpop.f32.mrf.mxu3 }
 0x6cd   :  { %v5433_v8 = vadd.f32 %v7351_v16, %v5432_v33 }
 0x6cf   :  { %5436 = vst [vmem:[#allocation6] sm:$0xff] %v5433_v8 }
 0x6d0   :  { %5447 = dma.vmem_to_hbm [thread:$0]  %s5443_s29, 128, %s5445_s1, [#allocation5]  }
 0x6d4   :  { %v5434_v62 = vpop.f32.mrf.mxu3 }
 0x6d5   :  { %7409 = dma.done.wait [#allocation5], 128  }
 0x6d6   :  { %7410 = vsyncadd [#allocation5], 4294967168 }
 0x6d7   :  { %5452 = vsyncpa [#allocation4], 1 }
 0x6d8   :  { %5453 = vsyncpa [#allocation5], 1 }

</bundles_post_ra>
